<compile_context>
chip_gen: v5e
topology: v5e:2x2
jax: 0.10.0
libtpu: 0.0.40
codegen_flags: <defaults>
</compile_context>

<pallas_src>
import jax
import jax.numpy as jnp
import numpy as np
from jax.experimental import pallas as pl
from jax.experimental.pallas import tpu as pltpu


# ------------------------------ small helpers ------------------------------ #

def _round_up(v, m):
    return (v + m - 1) // m * m


def _pad_vec(v, n_p):
    return jnp.pad(v.astype(jnp.float32), (0, n_p - v.shape[0]))[None, :]


def _fold_bn(gamma, beta, mean, var, n_p, eps=1e-5):
    scale = gamma / jnp.sqrt(var + eps)
    bias = beta - mean * scale
    # Zero-padded scale AND bias => padded channels stay exactly 0 after
    # BN+ReLU (required so padded lanes never pollute the matmuls).
    return _pad_vec(scale, n_p), _pad_vec(bias, n_p)


def _prep_w3x3(w, cin_p, cout_p, dtype):
    # torch layout (Cout, Cin, kh, kw) -> (9, Cin_p, Cout_p), tap order dy*3+dx.
    cout, cin = w.shape[0], w.shape[1]
    wr = jnp.transpose(w, (2, 3, 1, 0)).reshape(9, cin, cout)
    wr = jnp.pad(wr, ((0, 0), (0, cin_p - cin), (0, cout_p - cout)))
    return wr.astype(dtype)


def _prep_w1x1(w, cin_p, cout_p, dtype):
    # torch layout (Cout, Cin, 1, 1) -> (Cin_p, Cout_p)
    cout, cin = w.shape[0], w.shape[1]
    wr = jnp.transpose(w[:, :, 0, 0], (1, 0))
    wr = jnp.pad(wr, ((0, cin_p - cin), (0, cout_p - cout)))
    return wr.astype(dtype)


_VMEM_LIMIT = 32 * 1024 * 1024       # explicit; safe on v7x, fine on v5e/v6e.
_WEIGHT_BUF_BUDGET = 6 * 1024 * 1024   # per weight buffer (double-buffered).
_BATCH_BLOCK_BUDGET = 16 * 1024 * 1024


def _pick_tco(cin_p, co_p):
    """Widest Cout tile (multiple of 128 dividing co_p) whose weight tile fits."""
    for tco in range(co_p, 127, -128):
        if co_p % tco == 0 and 9 * cin_p * tco * 2 <= _WEIGHT_BUF_BUDGET:
            return tco
    return 128


def _pick_nb(N, H, W, cin_p, co_p):
    """Batch block so the per-step VMEM footprint stays within budget."""
    per_img = ((H + 2) * (W + 2) * cin_p * 2      # activation scratch (bf16)
               + 2 * H * W * cin_p * 2            # double-buffered input block
               + 2 * H * W * co_p * 4             # double-buffered output block
               + H * W * co_p * 4)                # f32 accumulator
    nb = int(max(1, min(8, N, _BATCH_BLOCK_BUDGET // max(per_img, 1))))
    while N % nb:
        nb -= 1
    return nb


# ----------------------------- Pallas kernels ------------------------------ #

def _make_conv_s1_kernel(H, W, nb, shortcut):
    """Fused BN+ReLU + 3x3 conv (stride 1, pad 1) + optional shortcut add.

    The BN+ReLU activation (with zero spatial border acting as the conv's zero
    padding) is cached in VMEM scratch at co-tile 0 and reused by every co tile
    of the same batch block.
    """

    def kernel(*refs):
        if shortcut == "none":
            x_ref, s_ref, b_ref, w_ref, cb_ref, o_ref, act_s = refs
            xs_ref = wsc_ref = bsc_ref = None
        elif shortcut == "identity":
            x_ref, s_ref, b_ref, w_ref, cb_ref, xs_ref, o_ref, act_s = refs
            wsc_ref = bsc_ref = None
        else:  # "project"
            (x_ref, s_ref, b_ref, w_ref, cb_ref,
             xs_ref, wsc_ref, bsc_ref, o_ref, act_s) = refs

        cin_p = x_ref.shape[-1]
        tco = w_ref.shape[-1]

        @pl.when(pl.program_id(1) == 0)
        def _():
            # Zero border == conv zero padding (ReLU(bias) on pad pixels must
            # not leak in); single f32->compute_dtype cast on store.
            act_s[...] = jnp.zeros_like(act_s)
            xv = x_ref[...].astype(jnp.float32)                  # (nb, H, W, Cin_p)
            a = jnp.maximum(xv * s_ref[...] + b_ref[...], 0.0)
            act_s[:, 1:H + 1, 1:W + 1, :] = a.astype(act_s.dtype)

        # 3x3 conv as nine shifted matmuls, f32 accumulation on the MXU.
        acc = jnp.zeros((nb * H * W, tco), jnp.float32)
        for dy in range(3):
            for dx in range(3):
                slab = act_s[:, dy:dy + H, dx:dx + W, :].reshape(nb * H * W, cin_p)
                acc = acc + jnp.dot(slab, w_ref[dy * 3 + dx],
                                    preferred_element_type=jnp.float32)
        acc = acc + cb_ref[...]

        if shortcut == "identity":
            acc = acc + xs_ref[...].reshape(nb * H * W, tco).astype(jnp.float32)
        elif shortcut == "project":
            cpx = xs_ref.shape[-1]
            acc = acc + jnp.dot(xs_ref[...].reshape(nb * H * W, cpx), wsc_ref[...],
                                preferred_element_type=jnp.float32)
            acc = acc + bsc_ref[...]

        o_ref[...] = acc.reshape(nb, H, W, tco).astype(o_ref.dtype)

    return kernel


def _make_conv_s2_kernel(H, W, nb):
    """Fused BN+ReLU + 3x3 conv (stride 2, pad 1) + 1x1 stride-2 projection."""
    Ho, Wo = H // 2, W // 2
    Hp2, Wp2 = Ho + 1, Wo + 1

    def kernel(ph_ref, s_ref, b_ref, w_ref, cb_ref, xs_ref, wsc_ref, bsc_ref,
               o_ref, act_s):
        cin_p = ph_ref.shape[-1]
        tco = w_ref.shape[-1]
        cpx = xs_ref.shape[-1]

        @pl.when(pl.program_id(1) == 0)
        def _():
            # Activate the four phases once per batch block; store only the
            # valid rectangle of each phase so the zeroed border of the scratch
            # plays the role of the conv's zero padding.
            act_s[...] = jnp.zeros_like(act_s)
            a = jnp.maximum(ph_ref[...].astype(jnp.float32) * s_ref[...] + b_ref[...],
                            0.0).astype(act_s.dtype)
            for py in range(2):
                for px in range(2):
                    k = 2 * py + px
                    r0, c0 = 1 - py, 1 - px
                    act_s[:, k * Hp2 + r0:k * Hp2 + r0 + Ho, c0:c0 + Wo, :] = \
                        a[:, k * Hp2 + r0:k * Hp2 + r0 + Ho, c0:c0 + Wo, :]

        acc = jnp.zeros((nb * Ho * Wo, tco), jnp.float32)
        for dy in range(3):
            for dx in range(3):
                k = (dy % 2) * 2 + (dx % 2)
                slab = act_s[:, k * Hp2 + dy // 2:k * Hp2 + dy // 2 + Ho,
                             dx // 2:dx // 2 + Wo, :].reshape(nb * Ho * Wo, cin_p)
                acc = acc + jnp.dot(slab, w_ref[dy * 3 + dx],
                                    preferred_element_type=jnp.float32)
        acc = acc + cb_ref[...]

        # 1x1 stride-2 projection shortcut on the raw block input.
        acc = acc + jnp.dot(xs_ref[...].reshape(nb * Ho * Wo, cpx), wsc_ref[...],
                            preferred_element_type=jnp.float32)
        acc = acc + bsc_ref[...]

        o_ref[...] = acc.reshape(nb, Ho, Wo, tco).astype(o_ref.dtype)

    return kernel


# --------------------------- pallas_call wrappers --------------------------- #

def _conv3x3_s1(x, s, b, w, cb, *, H, W, nb, out_dtype,
                shortcut="none", xs=None, wsc=None, bsc=None):
    N, _, _, cin_p = x.shape
    co_p = w.shape[-1]
    tco = _pick_tco(cin_p, co_p)
    n_co = co_p // tco
    kernel = _make_conv_s1_kernel(H, W, nb, shortcut)

    in_specs = [
        pl.BlockSpec((nb, H, W, cin_p), lambda g, co: (g, 0, 0, 0)),   # resident across co
        pl.BlockSpec((1, cin_p), lambda g, co: (0, 0)),
        pl.BlockSpec((1, cin_p), lambda g, co: (0, 0)),
        pl.BlockSpec((9, cin_p, tco), lambda g, co: (0, 0, co)),       # streams over co
        pl.BlockSpec((1, tco), lambda g, co: (0, co)),
    ]
    args = [x, s, b, w, cb]
    if shortcut == "identity":
        in_specs.append(pl.BlockSpec((nb, H, W, tco), lambda g, co: (g, 0, 0, co)))
        args.append(xs)
    elif shortcut == "project":
        cpx = xs.shape[-1]
        in_specs += [
            pl.BlockSpec((nb, H, W, cpx), lambda g, co: (g, 0, 0, 0)),
            pl.BlockSpec((cpx, tco), lambda g, co: (0, co)),
            pl.BlockSpec((1, tco), lambda g, co: (0, co)),
        ]
        args += [xs, wsc, bsc]

    return pl.pallas_call(
        kernel,
        out_shape=jax.ShapeDtypeStruct((N, H, W, co_p), out_dtype),
        grid=(N // nb, n_co),
        in_specs=in_specs,
        out_specs=pl.BlockSpec((nb, H, W, tco), lambda g, co: (g, 0, 0, co)),
        scratch_shapes=[pltpu.VMEM((nb, H + 2, W + 2, cin_p), x.dtype)],
        compiler_params=pltpu.CompilerParams(
            dimension_semantics=("parallel", "arbitrary"),
            vmem_limit_bytes=_VMEM_LIMIT),
    )(*args)


def _conv3x3_s2_proj(phases, s, b, w, cb, xs, wsc, bsc, *, H, W, nb, out_dtype):
    N = phases.shape[0]
    cin_p = phases.shape[-1]
    Ho, Wo = H // 2, W // 2
    Hp2, Wp2 = Ho + 1, Wo + 1
    co_p = w.shape[-1]
    cpx = xs.shape[-1]
    tco = _pick_tco(cin_p, co_p)
    n_co = co_p // tco
    kernel = _make_conv_s2_kernel(H, W, nb)

    return pl.pallas_call(
        kernel,
        out_shape=jax.ShapeDtypeStruct((N, Ho, Wo, co_p), out_dtype),
        grid=(N // nb, n_co),
        in_specs=[
            pl.BlockSpec((nb, 4 * Hp2, Wp2, cin_p), lambda g, co: (g, 0, 0, 0)),
            pl.BlockSpec((1, cin_p), lambda g, co: (0, 0)),
            pl.BlockSpec((1, cin_p), lambda g, co: (0, 0)),
            pl.BlockSpec((9, cin_p, tco), lambda g, co: (0, 0, co)),
            pl.BlockSpec((1, tco), lambda g, co: (0, co)),
            pl.BlockSpec((nb, Ho, Wo, cpx), lambda g, co: (g, 0, 0, 0)),
            pl.BlockSpec((cpx, tco), lambda g, co: (0, co)),
            pl.BlockSpec((1, tco), lambda g, co: (0, co)),
        ],
        out_specs=pl.BlockSpec((nb, Ho, Wo, tco), lambda g, co: (g, 0, 0, co)),
        scratch_shapes=[pltpu.VMEM((nb, 4 * Hp2, Wp2, cin_p), phases.dtype)],
        compiler_params=pltpu.CompilerParams(
            dimension_semantics=("parallel", "arbitrary"),
            vmem_limit_bytes=_VMEM_LIMIT),
    )(phases, s, b, w, cb, xs, wsc, bsc)


# ------------------------------- forward pass -------------------------------- #

def wide_basic_forward(x_nchw, params, stride, compute_dtype=jnp.bfloat16):
    """Pallas implementation of wide_basic.forward.  x_nchw: (N, Cin, H, W)."""
    assert stride in (1, 2), "only strides 1 and 2 are supported"
    x = jnp.transpose(x_nchw, (0, 2, 3, 1))                      # NHWC
    N, H, W, Cin = x.shape
    Cout = params["conv1_w"].shape[0]
    cin_p = _round_up(Cin, 128)
    co_p = _round_up(Cout, 128)

    # Fold BN (inference stats) into per-channel scale/bias.
    s1, b1 = _fold_bn(params["bn1_gamma"], params["bn1_beta"],
                      params["bn1_mean"], params["bn1_var"], cin_p)
    s2, b2 = _fold_bn(params["bn2_gamma"], params["bn2_beta"],
                      params["bn2_mean"], params["bn2_var"], co_p)

    # Single fused channel-pad + cast (no wrapper-side spatial pad: the kernels
    # handle conv zero-padding via their zero-bordered VMEM scratch).
    x_cp = jnp.pad(x, ((0, 0), (0, 0), (0, 0), (0, cin_p - Cin))).astype(compute_dtype)

    w1 = _prep_w3x3(params["conv1_w"], cin_p, co_p, compute_dtype)
    cb1 = _pad_vec(params["conv1_b"], co_p)
    w2 = _prep_w3x3(params["conv2_w"], co_p, co_p, compute_dtype)
    cb2 = _pad_vec(params["conv2_b"], co_p)

    nb = _pick_nb(N, H, W, cin_p, co_p)

    # Conv1: BN1+ReLU fused; unpadded NHWC bf16 output feeds conv2 directly.
    a1 = _conv3x3_s1(x_cp, s1, b1, w1, cb1, H=H, W=W, nb=nb,
                     out_dtype=compute_dtype, shortcut="none")

    # TODO(synk): dropout is inference-mode identity (train RNG mask not implemented).

    need_proj = (stride != 1) or (Cin != Cout)
    if need_proj:
        wsc = _prep_w1x1(params["sc_w"], cin_p, co_p, compute_dtype)
        bsc = _pad_vec(params["sc_b"], co_p)

    if stride == 1:
        Ho, Wo = H, W
        if need_proj:
            out = _conv3x3_s1(a1, s2, b2, w2, cb2, H=H, W=W, nb=nb,
                              out_dtype=jnp.float32, shortcut="project",
                              xs=x_cp, wsc=wsc, bsc=bsc)
        else:
            out = _conv3x3_s1(a1, s2, b2, w2, cb2, H=H, W=W, nb=nb,
                              out_dtype=jnp.float32, shortcut="identity", xs=x_cp)
    else:
        assert H % 2 == 0 and W % 2 == 0, "stride-2 path assumes even H, W"
        Ho, Wo = H // 2, W // 2
        # Even/odd phase split of the (zero-padded) conv1 output; same total
        # bytes, keeps every in-kernel slice contiguous.
        a1p = jnp.pad(a1, ((0, 0), (1, 1), (1, 1), (0, 0)))
        phases = jnp.concatenate(
            [a1p[:, py::2, px::2, :] for py in (0, 1) for px in (0, 1)], axis=1)
        xs = x_cp[:, ::2, ::2, :]
        out = _conv3x3_s2_proj(phases, s2, b2, w2, cb2, xs, wsc, bsc,
                               H=H, W=W, nb=nb, out_dtype=jnp.float32)

    out = out[..., :Cout]                                        # (N, Ho, Wo, Cout)
    return jnp.transpose(out, (0, 3, 1, 2))                      # back to NCHW


# --------------------------- Pure-JAX reference ------------------------------ #

def reference_forward(x, params, stride):
    eps = 1e-5

    def bn(v, g, b, m, var):
        return ((v - m[None, :, None, None]) / jnp.sqrt(var[None, :, None, None] + eps)
                * g[None, :, None, None] + b[None, :, None, None])

    def conv(v, w, b, s, pad):
        y = jax.lax.conv_general_dilated(
            v, w, (s, s), [(pad, pad), (pad, pad)],
            dimension_numbers=("NCHW", "OIHW", "NCHW"))
        return y + b[None, :, None, None]

    Cin = x.shape[1]
    C = params["conv1_w"].shape[0]
    a = jax.nn.relu(bn(x, params["bn1_gamma"], params["bn1_beta"],
                       params["bn1_mean"], params["bn1_var"]))
    a = conv(a, params["conv1_w"], params["conv1_b"], 1, 1)
    a = jax.nn.relu(bn(a, params["bn2_gamma"], params["bn2_beta"],
                       params["bn2_mean"], params["bn2_var"]))
    a = conv(a, params["conv2_w"], params["conv2_b"], stride, 1)
    if stride != 1 or Cin != C:
        sc = conv(x, params["sc_w"], params["sc_b"], stride, 0)
    else:
        sc = x
    return a + sc


# --------------------------------- main -------------------------------------- #

def make_params(key, in_channels, channels):
    ks = jax.random.split(key, 14)
    u = lambda k, s: jax.random.uniform(k, s, jnp.float32, 0.5, 1.5)
    n = lambda k, s, sc=0.1: jax.random.normal(k, s, jnp.float32) * sc
    return {
        "bn1_gamma": u(ks[0], (in_channels,)),
        "bn1_beta": n(ks[1], (in_channels,)),
        "bn1_mean": n(ks[2], (in_channels,)),
        "bn1_var": u(ks[3], (in_channels,)),
        "conv1_w": n(ks[4], (channels, in_channels, 3, 3)),
        "conv1_b": n(ks[5], (channels,)),
        "bn2_gamma": u(ks[6], (channels,)),
        "bn2_beta": n(ks[7], (channels,)),
        "bn2_mean": n(ks[8], (channels,)),
        "bn2_var": u(ks[9], (channels,)),
        "conv2_w": n(ks[10], (channels, channels, 3, 3)),
        "conv2_b": n(ks[11], (channels,)),
        "sc_w": n(ks[12], (channels, in_channels, 1, 1)),
        "sc_b": n(ks[13], (channels,)),
    }


if __name__ == "__main__":
    key = jax.random.PRNGKey(0)
    k_x, k_p1, k_p2, k_p3 = jax.random.split(key, 4)

    N, Cin, C, H, W = 2, 4, 8, 16, 16

    x1 = jax.random.normal(k_x, (N, Cin, H, W), jnp.float32)
    x2 = jax.random.normal(k_x, (N, C, H, W), jnp.float32)

    cases = [
        # (name, x, params, stride, expected output shape)
        ("proj_stride2", x1, make_params(k_p1, Cin, C), 2, (N, C, H // 2, W // 2)),
        ("identity_stride1", x2, make_params(k_p2, C, C), 1, (N, C, H, W)),
        ("proj_stride1", x1, make_params(k_p3, Cin, C), 1, (N, C, H, W)),
    ]

    for name, x, params, stride, expect_shape in cases:
        ref = jax.block_until_ready(reference_forward(x, params, stride))

        # Exactness check: f32 compute path.
        out32 = jax.block_until_ready(
            wide_basic_forward(x, params, stride, compute_dtype=jnp.float32))
        assert out32.shape == expect_shape
        np.testing.assert_allclose(np.asarray(out32), np.asarray(ref),
                                   rtol=1e-4, atol=1e-4, err_msg=name + "/f32")

        # Performance path: bf16 activations/weights, f32 accumulation.
        # (Identity shortcut adds the bf16-cast input; documented precision choice.)
        outbf = jax.block_until_ready(
            wide_basic_forward(x, params, stride, compute_dtype=jnp.bfloat16))
        assert outbf.shape == expect_shape
        np.testing.assert_allclose(np.asarray(outbf), np.asarray(ref),
                                   rtol=5e-2, atol=5e-2, err_msg=name + "/bf16")

    print("KERNEL_OK")
</pallas_src>

<mosaic_0001>
module attributes {stable_mosaic.version = 11 : i64} {
  func.func @kernel(%arg0: i32, %arg1: i32, %arg2: memref<2x16x16x128xf32, #tpu.memory_space<vmem>>, %arg3: memref<1x128xf32, #tpu.memory_space<vmem>>, %arg4: memref<1x128xf32, #tpu.memory_space<vmem>>, %arg5: memref<9x128x128xf32, #tpu.memory_space<vmem>>, %arg6: memref<1x128xf32, #tpu.memory_space<vmem>>, %arg7: memref<2x16x16x128xf32, #tpu.memory_space<vmem>>, %arg8: memref<2x18x18x128xf32, #tpu.memory_space<vmem>>) attributes {dimension_semantics = [#tpu.dimension_semantics<parallel>, #tpu.dimension_semantics<arbitrary>], iteration_bounds = array<i64: 1, 1>, scalar_prefetch = 0 : i64, scratch_operands = 1 : i64, tpu.core_type = #tpu.core_type<tc>, window_params = [{transform_indices = @transform_0, window_bounds = array<i64: 2, 16, 16, 128>}, {pipeline_mode = #tpu.pipeline_mode<synchronous>, transform_indices = @transform_1, window_bounds = array<i64: 1, 128>}, {pipeline_mode = #tpu.pipeline_mode<synchronous>, transform_indices = @transform_2, window_bounds = array<i64: 1, 128>}, {transform_indices = @transform_3, window_bounds = array<i64: 9, 128, 128>}, {transform_indices = @transform_4, window_bounds = array<i64: 1, 128>}, {transform_indices = @transform_5, window_bounds = array<i64: 2, 16, 16, 128>}]} {
    %c0_i32 = arith.constant 0 : i32
    %0 = arith.cmpi eq, %arg1, %c0_i32 : i32
    %1 = arith.extui %0 : i1 to i32
    %c0_i32_0 = arith.constant 0 : i32
    %2 = arith.cmpi ne, %1, %c0_i32_0 : i32
    scf.if %2 {
      %cst_70 = arith.constant 0.000000e+00 : f32
      %63 = vector.broadcast %cst_70 : f32 to vector<2x18x18x128xf32>
      %c0_71 = arith.constant 0 : index
      %c0_72 = arith.constant 0 : index
      %c0_73 = arith.constant 0 : index
      %c0_74 = arith.constant 0 : index
      %64 = vector.load %arg8[%c0_71, %c0_72, %c0_73, %c0_74] : memref<2x18x18x128xf32, #tpu.memory_space<vmem>>, vector<2x18x18x128xf32>
      tpu.vector_store %arg8[%c0_71, %c0_72, %c0_73, %c0_74], %63 {strides = array<i32>} : memref<2x18x18x128xf32, #tpu.memory_space<vmem>>, vector<2x18x18x128xf32>,
      %c0_75 = arith.constant 0 : index
      %c0_76 = arith.constant 0 : index
      %c0_77 = arith.constant 0 : index
      %c0_78 = arith.constant 0 : index
      %65 = vector.load %arg2[%c0_75, %c0_76, %c0_77, %c0_78] : memref<2x16x16x128xf32, #tpu.memory_space<vmem>>, vector<2x16x16x128xf32>
      %c0_79 = arith.constant 0 : index
      %c0_80 = arith.constant 0 : index
      %66 = vector.load %arg3[%c0_79, %c0_80] : memref<1x128xf32, #tpu.memory_space<vmem>>, vector<1x128xf32>
      %67 = vector.shape_cast %66 : vector<1x128xf32> to vector<1x1x1x128xf32>
      %68 = vector.broadcast %67 : vector<1x1x1x128xf32> to vector<2x16x16x128xf32>
      %69 = arith.mulf %65, %68 : vector<2x16x16x128xf32>
      %c0_81 = arith.constant 0 : index
      %c0_82 = arith.constant 0 : index
      %70 = vector.load %arg4[%c0_81, %c0_82] : memref<1x128xf32, #tpu.memory_space<vmem>>, vector<1x128xf32>
      %71 = vector.shape_cast %70 : vector<1x128xf32> to vector<1x1x1x128xf32>
      %72 = vector.broadcast %71 : vector<1x1x1x128xf32> to vector<2x16x16x128xf32>
      %73 = arith.addf %69, %72 : vector<2x16x16x128xf32>
      %cst_83 = arith.constant 0.000000e+00 : f32
      %74 = vector.broadcast %cst_83 : f32 to vector<2x16x16x128xf32>
      %75 = arith.maximumf %73, %74 : vector<2x16x16x128xf32>
      %c0_84 = arith.constant 0 : index
      %c1_85 = arith.constant 1 : index
      %c1_86 = arith.constant 1 : index
      %c0_87 = arith.constant 0 : index
      %76 = vector.load %arg8[%c0_84, %c1_85, %c1_86, %c0_87] : memref<2x18x18x128xf32, #tpu.memory_space<vmem>>, vector<2x16x16x128xf32>
      tpu.vector_store %arg8[%c0_84, %c1_85, %c1_86, %c0_87], %75 {strides = array<i32>} : memref<2x18x18x128xf32, #tpu.memory_space<vmem>>, vector<2x16x16x128xf32>,
    } else {
    }
    %cst = arith.constant 0.000000e+00 : f32
    %3 = vector.broadcast %cst : f32 to vector<512x128xf32>
    %c0 = arith.constant 0 : index
    %c0_1 = arith.constant 0 : index
    %c0_2 = arith.constant 0 : index
    %c0_3 = arith.constant 0 : index
    %4 = vector.load %arg8[%c0, %c0_1, %c0_2, %c0_3] : memref<2x18x18x128xf32, #tpu.memory_space<vmem>>, vector<2x16x16x128xf32>
    %5 = vector.shape_cast %4 : vector<2x16x16x128xf32> to vector<512x128xf32>
    %c0_4 = arith.constant 0 : index
    %c0_5 = arith.constant 0 : index
    %c0_6 = arith.constant 0 : index
    %6 = vector.load %arg5[%c0_4, %c0_5, %c0_6] : memref<9x128x128xf32, #tpu.memory_space<vmem>>, vector<1x128x128xf32>
    %7 = vector.shape_cast %6 : vector<1x128x128xf32> to vector<128x128xf32>
    %cst_7 = arith.constant dense<0.000000e+00> : vector<512x128xf32>
    %8 = tpu.matmul %5, %7, %cst_7 {dimension_numbers = #tpu.dot_dimension_numbers<[1], [0], [0], [1], [0, 0, 1, 1], [], []>} : vector<512x128xf32>, vector<128x128xf32>, vector<512x128xf32> -> vector<512x128xf32>
    %9 = arith.addf %3, %8 : vector<512x128xf32>
    %c0_8 = arith.constant 0 : index
    %c0_9 = arith.constant 0 : index
    %c1 = arith.constant 1 : index
    %c0_10 = arith.constant 0 : index
    %10 = vector.load %arg8[%c0_8, %c0_9, %c1, %c0_10] : memref<2x18x18x128xf32, #tpu.memory_space<vmem>>, vector<2x16x16x128xf32>
    %11 = vector.shape_cast %10 : vector<2x16x16x128xf32> to vector<512x128xf32>
    %c1_11 = arith.constant 1 : index
    %c0_12 = arith.constant 0 : index
    %c0_13 = arith.constant 0 : index
    %12 = vector.load %arg5[%c1_11, %c0_12, %c0_13] : memref<9x128x128xf32, #tpu.memory_space<vmem>>, vector<1x128x128xf32>
    %13 = vector.shape_cast %12 : vector<1x128x128xf32> to vector<128x128xf32>
    %cst_14 = arith.constant dense<0.000000e+00> : vector<512x128xf32>
    %14 = tpu.matmul %11, %13, %cst_14 {dimension_numbers = #tpu.dot_dimension_numbers<[1], [0], [0], [1], [0, 0, 1, 1], [], []>} : vector<512x128xf32>, vector<128x128xf32>, vector<512x128xf32> -> vector<512x128xf32>
    %15 = arith.addf %9, %14 : vector<512x128xf32>
    %c0_15 = arith.constant 0 : index
    %c0_16 = arith.constant 0 : index
    %c2 = arith.constant 2 : index
    %c0_17 = arith.constant 0 : index
    %16 = vector.load %arg8[%c0_15, %c0_16, %c2, %c0_17] : memref<2x18x18x128xf32, #tpu.memory_space<vmem>>, vector<2x16x16x128xf32>
    %17 = vector.shape_cast %16 : vector<2x16x16x128xf32> to vector<512x128xf32>
    %c2_18 = arith.constant 2 : index
    %c0_19 = arith.constant 0 : index
    %c0_20 = arith.constant 0 : index
    %18 = vector.load %arg5[%c2_18, %c0_19, %c0_20] : memref<9x128x128xf32, #tpu.memory_space<vmem>>, vector<1x128x128xf32>
    %19 = vector.shape_cast %18 : vector<1x128x128xf32> to vector<128x128xf32>
    %cst_21 = arith.constant dense<0.000000e+00> : vector<512x128xf32>
    %20 = tpu.matmul %17, %19, %cst_21 {dimension_numbers = #tpu.dot_dimension_numbers<[1], [0], [0], [1], [0, 0, 1, 1], [], []>} : vector<512x128xf32>, vector<128x128xf32>, vector<512x128xf32> -> vector<512x128xf32>
    %21 = arith.addf %15, %20 : vector<512x128xf32>
    %c0_22 = arith.constant 0 : index
    %c1_23 = arith.constant 1 : index
    %c0_24 = arith.constant 0 : index
    %c0_25 = arith.constant 0 : index
    %22 = vector.load %arg8[%c0_22, %c1_23, %c0_24, %c0_25] : memref<2x18x18x128xf32, #tpu.memory_space<vmem>>, vector<2x16x16x128xf32>
    %23 = vector.shape_cast %22 : vector<2x16x16x128xf32> to vector<512x128xf32>
    %c3 = arith.constant 3 : index
    %c0_26 = arith.constant 0 : index
    %c0_27 = arith.constant 0 : index
    %24 = vector.load %arg5[%c3, %c0_26, %c0_27] : memref<9x128x128xf32, #tpu.memory_space<vmem>>, vector<1x128x128xf32>
    %25 = vector.shape_cast %24 : vector<1x128x128xf32> to vector<128x128xf32>
    %cst_28 = arith.constant dense<0.000000e+00> : vector<512x128xf32>
    %26 = tpu.matmul %23, %25, %cst_28 {dimension_numbers = #tpu.dot_dimension_numbers<[1], [0], [0], [1], [0, 0, 1, 1], [], []>} : vector<512x128xf32>, vector<128x128xf32>, vector<512x128xf32> -> vector<512x128xf32>
    %27 = arith.addf %21, %26 : vector<512x128xf32>
    %c0_29 = arith.constant 0 : index
    %c1_30 = arith.constant 1 : index
    %c1_31 = arith.constant 1 : index
    %c0_32 = arith.constant 0 : index
    %28 = vector.load %arg8[%c0_29, %c1_30, %c1_31, %c0_32] : memref<2x18x18x128xf32, #tpu.memory_space<vmem>>, vector<2x16x16x128xf32>
    %29 = vector.shape_cast %28 : vector<2x16x16x128xf32> to vector<512x128xf32>
    %c4 = arith.constant 4 : index
    %c0_33 = arith.constant 0 : index
    %c0_34 = arith.constant 0 : index
    %30 = vector.load %arg5[%c4, %c0_33, %c0_34] : memref<9x128x128xf32, #tpu.memory_space<vmem>>, vector<1x128x128xf32>
    %31 = vector.shape_cast %30 : vector<1x128x128xf32> to vector<128x128xf32>
    %cst_35 = arith.constant dense<0.000000e+00> : vector<512x128xf32>
    %32 = tpu.matmul %29, %31, %cst_35 {dimension_numbers = #tpu.dot_dimension_numbers<[1], [0], [0], [1], [0, 0, 1, 1], [], []>} : vector<512x128xf32>, vector<128x128xf32>, vector<512x128xf32> -> vector<512x128xf32>
    %33 = arith.addf %27, %32 : vector<512x128xf32>
    %c0_36 = arith.constant 0 : index
    %c1_37 = arith.constant 1 : index
    %c2_38 = arith.constant 2 : index
    %c0_39 = arith.constant 0 : index
    %34 = vector.load %arg8[%c0_36, %c1_37, %c2_38, %c0_39] : memref<2x18x18x128xf32, #tpu.memory_space<vmem>>, vector<2x16x16x128xf32>
    %35 = vector.shape_cast %34 : vector<2x16x16x128xf32> to vector<512x128xf32>
    %c5 = arith.constant 5 : index
    %c0_40 = arith.constant 0 : index
    %c0_41 = arith.constant 0 : index
    %36 = vector.load %arg5[%c5, %c0_40, %c0_41] : memref<9x128x128xf32, #tpu.memory_space<vmem>>, vector<1x128x128xf32>
    %37 = vector.shape_cast %36 : vector<1x128x128xf32> to vector<128x128xf32>
    %cst_42 = arith.constant dense<0.000000e+00> : vector<512x128xf32>
    %38 = tpu.matmul %35, %37, %cst_42 {dimension_numbers = #tpu.dot_dimension_numbers<[1], [0], [0], [1], [0, 0, 1, 1], [], []>} : vector<512x128xf32>, vector<128x128xf32>, vector<512x128xf32> -> vector<512x128xf32>
    %39 = arith.addf %33, %38 : vector<512x128xf32>
    %c0_43 = arith.constant 0 : index
    %c2_44 = arith.constant 2 : index
    %c0_45 = arith.constant 0 : index
    %c0_46 = arith.constant 0 : index
    %40 = vector.load %arg8[%c0_43, %c2_44, %c0_45, %c0_46] : memref<2x18x18x128xf32, #tpu.memory_space<vmem>>, vector<2x16x16x128xf32>
    %41 = vector.shape_cast %40 : vector<2x16x16x128xf32> to vector<512x128xf32>
    %c6 = arith.constant 6 : index
    %c0_47 = arith.constant 0 : index
    %c0_48 = arith.constant 0 : index
    %42 = vector.load %arg5[%c6, %c0_47, %c0_48] : memref<9x128x128xf32, #tpu.memory_space<vmem>>, vector<1x128x128xf32>
    %43 = vector.shape_cast %42 : vector<1x128x128xf32> to vector<128x128xf32>
    %cst_49 = arith.constant dense<0.000000e+00> : vector<512x128xf32>
    %44 = tpu.matmul %41, %43, %cst_49 {dimension_numbers = #tpu.dot_dimension_numbers<[1], [0], [0], [1], [0, 0, 1, 1], [], []>} : vector<512x128xf32>, vector<128x128xf32>, vector<512x128xf32> -> vector<512x128xf32>
    %45 = arith.addf %39, %44 : vector<512x128xf32>
    %c0_50 = arith.constant 0 : index
    %c2_51 = arith.constant 2 : index
    %c1_52 = arith.constant 1 : index
    %c0_53 = arith.constant 0 : index
    %46 = vector.load %arg8[%c0_50, %c2_51, %c1_52, %c0_53] : memref<2x18x18x128xf32, #tpu.memory_space<vmem>>, vector<2x16x16x128xf32>
    %47 = vector.shape_cast %46 : vector<2x16x16x128xf32> to vector<512x128xf32>
    %c7 = arith.constant 7 : index
    %c0_54 = arith.constant 0 : index
    %c0_55 = arith.constant 0 : index
    %48 = vector.load %arg5[%c7, %c0_54, %c0_55] : memref<9x128x128xf32, #tpu.memory_space<vmem>>, vector<1x128x128xf32>
    %49 = vector.shape_cast %48 : vector<1x128x128xf32> to vector<128x128xf32>
    %cst_56 = arith.constant dense<0.000000e+00> : vector<512x128xf32>
    %50 = tpu.matmul %47, %49, %cst_56 {dimension_numbers = #tpu.dot_dimension_numbers<[1], [0], [0], [1], [0, 0, 1, 1], [], []>} : vector<512x128xf32>, vector<128x128xf32>, vector<512x128xf32> -> vector<512x128xf32>
    %51 = arith.addf %45, %50 : vector<512x128xf32>
    %c0_57 = arith.constant 0 : index
    %c2_58 = arith.constant 2 : index
    %c2_59 = arith.constant 2 : index
    %c0_60 = arith.constant 0 : index
    %52 = vector.load %arg8[%c0_57, %c2_58, %c2_59, %c0_60] : memref<2x18x18x128xf32, #tpu.memory_space<vmem>>, vector<2x16x16x128xf32>
    %53 = vector.shape_cast %52 : vector<2x16x16x128xf32> to vector<512x128xf32>
    %c8 = arith.constant 8 : index
    %c0_61 = arith.constant 0 : index
    %c0_62 = arith.constant 0 : index
    %54 = vector.load %arg5[%c8, %c0_61, %c0_62] : memref<9x128x128xf32, #tpu.memory_space<vmem>>, vector<1x128x128xf32>
    %55 = vector.shape_cast %54 : vector<1x128x128xf32> to vector<128x128xf32>
    %cst_63 = arith.constant dense<0.000000e+00> : vector<512x128xf32>
    %56 = tpu.matmul %53, %55, %cst_63 {dimension_numbers = #tpu.dot_dimension_numbers<[1], [0], [0], [1], [0, 0, 1, 1], [], []>} : vector<512x128xf32>, vector<128x128xf32>, vector<512x128xf32> -> vector<512x128xf32>
    %57 = arith.addf %51, %56 : vector<512x128xf32>
    %c0_64 = arith.constant 0 : index
    %c0_65 = arith.constant 0 : index
    %58 = vector.load %arg6[%c0_64, %c0_65] : memref<1x128xf32, #tpu.memory_space<vmem>>, vector<1x128xf32>
    %59 = vector.broadcast %58 : vector<1x128xf32> to vector<512x128xf32>
    %60 = arith.addf %57, %59 : vector<512x128xf32>
    %61 = vector.shape_cast %60 : vector<512x128xf32> to vector<2x16x16x128xf32>
    %c0_66 = arith.constant 0 : index
    %c0_67 = arith.constant 0 : index
    %c0_68 = arith.constant 0 : index
    %c0_69 = arith.constant 0 : index
    %62 = vector.load %arg7[%c0_66, %c0_67, %c0_68, %c0_69] : memref<2x16x16x128xf32, #tpu.memory_space<vmem>>, vector<2x16x16x128xf32>
    tpu.vector_store %arg7[%c0_66, %c0_67, %c0_68, %c0_69], %61 {strides = array<i32>} : memref<2x16x16x128xf32, #tpu.memory_space<vmem>>, vector<2x16x16x128xf32>,
    return
  }
  func.func @transform_0(%arg0: i32, %arg1: i32) -> (i32, i32, i32, i32) {
    %c0_i32 = arith.constant 0 : i32
    %c0_i32_0 = arith.constant 0 : i32
    %c0_i32_1 = arith.constant 0 : i32
    %c0_i32_2 = arith.constant 0 : i32
    return %arg0, %c0_i32, %c0_i32_0, %c0_i32_1 : i32, i32, i32, i32
  }
  func.func @transform_1(%arg0: i32, %arg1: i32) -> (i32, i32) {
    %c0_i32 = arith.constant 0 : i32
    %c0_i32_0 = arith.constant 0 : i32
    %c0_i32_1 = arith.constant 0 : i32
    return %c0_i32, %c0_i32_0 : i32, i32
  }
  func.func @transform_2(%arg0: i32, %arg1: i32) -> (i32, i32) {
    %c0_i32 = arith.constant 0 : i32
    %c0_i32_0 = arith.constant 0 : i32
    %c0_i32_1 = arith.constant 0 : i32
    return %c0_i32, %c0_i32_0 : i32, i32
  }
  func.func @transform_3(%arg0: i32, %arg1: i32) -> (i32, i32, i32) {
    %c0_i32 = arith.constant 0 : i32
    %c0_i32_0 = arith.constant 0 : i32
    %c0_i32_1 = arith.constant 0 : i32
    return %c0_i32, %c0_i32_0, %arg1 : i32, i32, i32
  }
  func.func @transform_4(%arg0: i32, %arg1: i32) -> (i32, i32) {
    %c0_i32 = arith.constant 0 : i32
    %c0_i32_0 = arith.constant 0 : i32
    return %c0_i32, %arg1 : i32, i32
  }
  func.func @transform_5(%arg0: i32, %arg1: i32) -> (i32, i32, i32, i32) {
    %c0_i32 = arith.constant 0 : i32
    %c0_i32_0 = arith.constant 0 : i32
    %c0_i32_1 = arith.constant 0 : i32
    return %arg0, %c0_i32, %c0_i32_0, %arg1 : i32, i32, i32, i32
  }
}

</mosaic_0001>

<bundles_post_ra>
// kernel: tpu_custom_call.1
= control target key start
LH: loop header
LB: loop body
LE: loop exit
PB: predicated region body
PF: predicated region fallthrough
CT: control target
= control target key end

     0   :  { %10 = vsyncpa [#allocation4], 0  ;;  %s5522_s0 = inlined_call_operand.hbm [shape: f32[2,16,16,128], index: 0, kind: input, shape index: {}]   ;;  %s5523_s1 = inlined_call_operand.hbm [shape: f32[1,128], index: 1, kind: input, shape index: {}]   ;;  %s5524_s2 = inlined_call_operand.vmem [shape: f32[1,128], index: 2, kind: input, shape index: {}]   ;;  %s5525_s3 = inlined_call_operand.hbm [shape: f32[9,128,128], index: 3, kind: input, shape index: {}]   ;;  %s5526_s4 = inlined_call_operand.vmem [shape: f32[1,128], index: 4, kind: input, shape index: {}]   ;;  %s5527_s5 = inlined_call_operand.hbm [shape: f32[2,16,16,128], index: 5, kind: output, shape index: {}]  }
   0x1   :  { %11 = vsyncpa [#allocation7], 0  ;;  %s31_s20 = sshll.u32 %s5523_s1, 4  ;;  %s32_s20 = int_to_ptr.hbm [resolvable:$true] %s31_s20 }
   0x2   :  { %12 = vsyncpa [#allocation5], 0  ;;  %s3888_s21 = smov [#allocation6]   ;;  %s17_s25 = sshll.u32 %s5522_s0, 4  ;;  %s18_s25 = int_to_ptr.hbm [resolvable:$true] %s17_s25 }
   0x3   :  { %s33_s22 = sshll.u32 %s3888_s21, 4  ;;  %s3889_s26 = smov [#allocation3]   ;;  %s34_s22 = int_to_ptr.vmem [resolvable:$true] %s33_s22 }
   0x4   :  { %36 = dma.hbm_to_vmem [thread:$0]  %s32_s20, 16, %s34_s22, [#allocation7]  }
   0x5   :  { %s19_s27 = sshll.u32 %s3889_s26, 4  ;;  %s3890_s28 = smov 128   ;;  %s20_s27 = int_to_ptr.vmem [resolvable:$true] %s19_s27 }
   0x6   :  { %s3891_s29 = smov 8   ;;  %s43_s6 = sshll.u32 %s5525_s3, 4  ;;  %s44_s6 = int_to_ptr.hbm [resolvable:$true] %s43_s6 }
   0x7   :  { %25 = dma.hbm_to_vmem [thread:$0]  %s18_s25, 8192, %s20_s27, [#allocation4], %s3890_s28, %s3890_s28, %s3891_s29  }
   0x8   :  { %s3892_s7 = smov [#allocation8]  }
   0x9   :  { %s45_s8 = sshll.u32 %s3892_s7, 4  ;;  %s46_s8 = int_to_ptr.vmem [resolvable:$true] %s45_s8 }
   0xa   :  { %51 = dma.hbm_to_vmem [thread:$0]  %s44_s6, 18432, %s46_s8, [#allocation7], %s3890_s28, %s3890_s28, %s3891_s29  }
   0xb   :  { %3882 = dma.done.wait [#allocation4], 8192  }
   0xc   :  { %3883 = vsyncadd [#allocation4], 4294959104 }
   0xd   :  { %3884 = dma.done.wait [#allocation7], 18448  }
   0xe   :  { %3885 = vsyncadd [#allocation7], 4294948848  ;;  %v3893_v0 = vmov 0.0   ;;  %v667_v1 = vld [vmem:[#allocation8 + $0xf8] sm:$0xff]  ;;  %v666_v2 = vld [vmem:[#allocation8 + $0xf0] sm:$0xff]  ;;  %s3704_s21 = sshll.u32 %s5527_s5, 4  ;;  %s3705_s21 = int_to_ptr.hbm [resolvable:$true] %s3704_s21 }
   0xf   :  { %94 = vst [vmem:[#allocation2 + $0xc0] sm:$0xff] %v3893_v0  ;;  %3718 = vmatpush.msra.mxu1 %v667_v1  ;;  %3719 = vmatpush.msra.mxu2 %v667_v1  ;;  %v665_v3 = vld [vmem:[#allocation8 + $0xe8] sm:$0xff]  ;;  %v664_v4 = vld [vmem:[#allocation8 + $0xe0] sm:$0xff]  ;;  %v663_v5 = vld [vmem:[#allocation8 + $0xd8] sm:$0xff] }
  0x10   :  { %95 = vst [vmem:[#allocation2 + $0xc8] sm:$0xff] %v3893_v0  ;;  %3720 = vmatpush.msra.mxu3 %v667_v1  ;;  %668 = vmatpush.msra.mxu0 %v667_v1  ;;  %v192_v6 = vld [vmem:[#allocation3 + $0x70] sm:$0xff]  ;;  %v3952_v7 = vld [vmem:[#allocation6] ss:$0 sm:$0xff]  ;;  %v660_v13 = vld [vmem:[#allocation8 + $0xc0] sm:$0xff] }
  0x11   :  { %70 = vst [vmem:[#allocation2] sm:$0xff] %v3893_v0  ;;  %3721 = vmatpush.msra.mxu1 %v666_v2  ;;  %3722 = vmatpush.msra.mxu2 %v666_v2  ;;  %v3957_v8 = vld [vmem:[%s5524_s2] ss:$0 sm:$0xff]  ;;  %v662_v9 = vld [vmem:[#allocation8 + $0xd0] sm:$0xff]  ;;  %v260_v10 = vmul.f32 %v3952_v7, %v192_v6  ;;  %v661_v11 = vld [vmem:[#allocation8 + $0xc8] sm:$0xff] }
  0x12   :  { %71 = vst [vmem:[#allocation2 + $0x8] sm:$0xff] %v3893_v0  ;;  %3723 = vmatpush.msra.mxu3 %v666_v2  ;;  %669 = vmatpush.msra.mxu0 %v666_v2  ;;  %v659_v15 = vld [vmem:[#allocation8 + $0xb8] sm:$0xff]  ;;  %v658_v16 = vld [vmem:[#allocation8 + $0xb0] sm:$0xff]  ;;  %v657_v17 = vld [vmem:[#allocation8 + $0xa8] sm:$0xff] }
  0x13   :  { %72 = vst [vmem:[#allocation2 + $0x10] sm:$0x3] %v3893_v0  ;;  %3724 = vmatpush.msra.mxu1 %v665_v3  ;;  %3725 = vmatpush.msra.mxu2 %v665_v3  ;;  %v3964_v12 = vadd.f32 %v3957_v8, %v260_v10  ;;  %v656_v18 = vld [vmem:[#allocation8 + $0xa0] sm:$0xff]  ;;  %v655_v19 = vld [vmem:[#allocation8 + $0x98] sm:$0xff]  ;;  %v224_v20 = vld [vmem:[#allocation3 + $0x170] sm:$0xff] }
  0x14   :  { %73 = vst [vmem:[#allocation2 + $0x18] sm:$0xff] %v3893_v0  ;;  %3726 = vmatpush.msra.mxu3 %v665_v3  ;;  %670 = vmatpush.msra.mxu0 %v665_v3  ;;  %v292_v21 = vmul.f32 %v3952_v7, %v224_v20  ;;  %v654_v22 = vld [vmem:[#allocation8 + $0x90] sm:$0xff]  ;;  %v653_v24 = vld [vmem:[#allocation8 + $0x88] sm:$0xff]  ;;  %v652_v25 = vld [vmem:[#allocation8 + $0x80] sm:$0xff] }
  0x15   :  { %74 = vst [vmem:[#allocation2 + $0x20] sm:$0xff] %v3893_v0  ;;  %3727 = vmatpush.msra.mxu1 %v664_v4  ;;  %3728 = vmatpush.msra.mxu2 %v664_v4  ;;  %v392_v14 = vmax.f32 %v3964_v12, 0.0  ;;  %v193_v26 = vld [vmem:[#allocation3 + $0x78] sm:$0xff]  ;;  %v194_v35 = vld [vmem:[#allocation3 + $0x80] sm:$0xff]  ;;  %v195_v45 = vld [vmem:[#allocation3 + $0x88] sm:$0xff] }
  0x16   :  { %75 = vst [vmem:[#allocation2 + $0x28] sm:$0x3] %v3893_v0  ;;  %3729 = vmatpush.msra.mxu3 %v664_v4  ;;  %671 = vmatpush.msra.mxu0 %v664_v4  ;;  %v3986_v23 = vadd.f32 %v3957_v8, %v292_v21  ;;  %v261_v28 = vmul.f32 %v3952_v7, %v193_v26  ;;  %v225_v29 = vld [vmem:[#allocation3 + $0x178] sm:$0xff]  ;;  %v226_v38 = vld [vmem:[#allocation3 + $0x180] sm:$0xff]  ;;  %v227_v48 = vld [vmem:[#allocation3 + $0x188] sm:$0xff] }
  0x17   :  { %76 = vst [vmem:[#allocation2 + $0x30] sm:$0xff] %v3893_v0  ;;  %3730 = vmatpush.msra.mxu1 %v663_v5  ;;  %3731 = vmatpush.msra.mxu2 %v663_v5  ;;  %v293_v30 = vmul.f32 %v3952_v7, %v225_v29  ;;  %v262_v37 = vmul.f32 %v3952_v7, %v194_v35  ;;  %v178_v47 = vld [vmem:[#allocation3] sm:$0xff]  ;;  %v196_v57 = vld [vmem:[#allocation3 + $0x90] sm:$0xff]  ;;  %v179_v59 = vld [vmem:[#allocation3 + $0x8] sm:$0xff] }
  0x18   :  { %77 = vst [vmem:[#allocation2 + $0x38] sm:$0xff] %v3893_v0  ;;  %3732 = vmatpush.msra.mxu3 %v663_v5  ;;  %672 = vmatpush.msra.mxu0 %v663_v5  ;;  %v424_v27 = vmax.f32 %v3986_v23, 0.0  ;;  %v4001_v31 = vadd.f32 %v3957_v8, %v261_v28  ;;  %v294_v40 = vmul.f32 %v3952_v7, %v226_v38  ;;  %v228_v60 = vld [vmem:[#allocation3 + $0x190] sm:$0xff]  ;;  %v210_v4 = vld [vmem:[#allocation3 + $0x100] sm:$0xff]  ;;  %v197_v10 = vld [vmem:[#allocation3 + $0x98] sm:$0xff] }
  0x19   :  { %78 = vst [vmem:[#allocation2 + $0x40] sm:$0x3] %v3893_v0  ;;  %3733 = vmatpush.msra.mxu1 %v662_v9  ;;  %3734 = vmatpush.msra.mxu2 %v662_v9  ;;  %v4007_v32 = vadd.f32 %v3957_v8, %v293_v30  ;;  %v587_v34 = vld [vmem:[#allocation2 + $0x1] sm:$0xff]  ;;  %v4022_v39 = vadd.f32 %v3957_v8, %v262_v37  ;;  %v181_v35 = vld [vmem:[#allocation3 + $0x18] sm:$0xff] }
  0x1a   :  { %79 = vst [vmem:[#allocation2 + $0x48] sm:$0xff] %v3893_v0  ;;  %3735 = vmatpush.msra.mxu3 %v662_v9  ;;  %673 = vmatpush.msra.mxu0 %v662_v9  ;;  %v393_v33 = vmax.f32 %v4001_v31, 0.0  ;;  %v4030_v41 = vadd.f32 %v3957_v8, %v294_v40  ;;  %v588_v43 = vld [vmem:[#allocation2 + $0x9] sm:$0xff]  ;;  %v263_v46 = vmul.f32 %v3952_v7, %v195_v45  ;;  %v198_v26 = vld [vmem:[#allocation3 + $0xa0] sm:$0xff] }
  0x1b   :  { %80 = vst [vmem:[#allocation2 + $0x50] sm:$0xff] %v3893_v0  ;;  %3736 = vmatpush.msra.mxu1 %v661_v11  ;;  %3737 = vmatpush.msra.mxu2 %v661_v11  ;;  %v425_v36 = vmax.f32 %v4007_v32, 0.0  ;;  %v394_v42 = vmax.f32 %v4022_v39, 0.0  ;;  %v246_v50 = vmul.f32 %v3952_v7, %v178_v47  ;;  %v295_v51 = vmul.f32 %v3952_v7, %v227_v48  ;;  %v1166_v30 = vld [vmem:[#allocation8 + $0x178] sm:$0xff]  ;;  %v1165_v47 = vld [vmem:[#allocation8 + $0x170] sm:$0xff] }
  0x1c   :  { %81 = vst [vmem:[#allocation2 + $0x58] sm:$0x3] %v3893_v0  ;;  %3738 = vmatpush.msra.mxu3 %v661_v11  ;;  %674 = vmatpush.msra.mxu0 %v661_v11  ;;  %v426_v44 = vmax.f32 %v4030_v41, 0.0  ;;  %v4044_v49 = vadd.f32 %v3957_v8, %v263_v46  ;;  %v264_v58 = vmul.f32 %v3952_v7, %v196_v57  ;;  %v230_v37 = vld [vmem:[#allocation3 + $0x1a0] sm:$0xff]  ;;  %v216_v32 = vld [vmem:[#allocation3 + $0x130] sm:$0xff] }
  0x1d   :  { %82 = vst [vmem:[#allocation2 + $0x60] sm:$0xff] %v3893_v0  ;;  %3739 = vmatpush.msra.mxu1 %v660_v13  ;;  %3740 = vmatpush.msra.mxu2 %v660_v13  ;;  %v314_v52 = vadd.f32 %v3957_v8, %v246_v50  ;;  %v4055_v53 = vadd.f32 %v3957_v8, %v295_v51  ;;  %v1521_v38 = vld [vmem:[#allocation8 + $0x1f8] sm:$0xff]  ;;  %v1520_v50 = vld [vmem:[#allocation8 + $0x1f0] sm:$0xff] }
  0x1e   :  { %83 = vst [vmem:[#allocation2 + $0x68] sm:$0xff] %v3893_v0  ;;  %3741 = vmatpush.msra.mxu3 %v660_v13  ;;  %675 = vmatpush.msra.mxu0 %v660_v13  ;;  %v395_v54 = vmax.f32 %v4044_v49, 0.0  ;;  %v4071_v61 = vadd.f32 %v3957_v8, %v264_v58  ;;  %v247_v62 = vmul.f32 %v3952_v7, %v179_v59  ;;  %v180_v13 = vld [vmem:[#allocation3 + $0x10] sm:$0xff]  ;;  %v586_v40 = vld [vmem:[#allocation8 + $0x78] sm:$0xff] }
  0x1f   :  { %84 = vst [vmem:[#allocation2 + $0x70] sm:$0x3] %v3893_v0  ;;  %3742 = vmatpush.msra.mxu1 %v659_v15  ;;  %3743 = vmatpush.msra.mxu2 %v659_v15  ;;  %v4059_v55 = vmax.f32 %v314_v52, 0.0  ;;  %v427_v56 = vmax.f32 %v4055_v53, 0.0  ;;  %v296_v63 = vmul.f32 %v3952_v7, %v228_v60  ;;  %v265_v11 = vmul.f32 %v3952_v7, %v197_v10  ;;  %v1875_v51 = vld [vmem:[#allocation8 + $0x278] sm:$0xff]  ;;  %v585_v52 = vld [vmem:[#allocation8 + $0x70] sm:$0xff] }
  0x20   :  { %85 = vst [vmem:[#allocation2 + $0x78] sm:$0xff] %v3893_v0  ;;  %3744 = vmatpush.msra.mxu3 %v659_v15  ;;  %676 = vmatpush.msra.mxu0 %v659_v15  ;;  %v315_v2 = vadd.f32 %v3957_v8, %v247_v62  ;;  %v396_v5 = vmax.f32 %v4071_v61, 0.0  ;;  %v278_v12 = vmul.f32 %v3952_v7, %v210_v4  ;;  %v1164_v59 = vld [vmem:[#allocation8 + $0x168] sm:$0xff]  ;;  %v1874_v4 = vld [vmem:[#allocation8 + $0x270] sm:$0xff]  ;;  %v1155_v61 = vld [vmem:[#allocation8 + $0x120] sm:$0xff] }
  0x21   :  { %86 = vst [vmem:[#allocation2 + $0x80] sm:$0xff] %v3893_v0  ;;  %3745 = vmatpush.msra.mxu1 %v658_v16  ;;  %3746 = vmatpush.msra.mxu2 %v658_v16  ;;  %v4082_v3 = vadd.f32 %v3957_v8, %v296_v63  ;;  %v266_v29 = vmul.f32 %v3952_v7, %v198_v26  ;;  %v212_v62 = vld [vmem:[#allocation3 + $0x110] sm:$0xff] }
  0x22   :  { %457 = vst [vmem:[#allocation2 + $0xc1] sm:$0xff] %v392_v14  ;;  %3747 = vmatpush.msra.mxu3 %v658_v16  ;;  %677 = vmatpush.msra.mxu0 %v658_v16  ;;  %v4086_v6 = vmax.f32 %v315_v2, 0.0  ;;  %v4099_v16 = vadd.f32 %v3957_v8, %v265_v11  ;;  %v4110_v20 = vadd.f32 %v3957_v8, %v278_v12  ;;  %v1519_v2 = vld [vmem:[#allocation8 + $0x1e8] sm:$0xff]  ;;  %v1163_v12 = vld [vmem:[#allocation8 + $0x160] sm:$0xff] }
  0x23   :  { %87 = vst [vmem:[#allocation2 + $0x88] sm:$0x3] %v3893_v0  ;;  %3748 = vmatpush.msra.mxu1 %v657_v17  ;;  %3749 = vmatpush.msra.mxu2 %v657_v17  ;;  %v428_v9 = vmax.f32 %v4082_v3, 0.0  ;;  %v4131_v45 = vadd.f32 %v3957_v8, %v266_v29  ;;  %v249_v46 = vmul.f32 %v3952_v7, %v181_v35  ;;  %v584_v10 = vld [vmem:[#allocation8 + $0x68] sm:$0xff]  ;;  %v1518_v29 = vld [vmem:[#allocation8 + $0x1e0] sm:$0xff] }
  0x24   :  { %88 = vst [vmem:[#allocation2 + $0x90] sm:$0xff] %v3893_v0  ;;  %3750 = vmatpush.msra.mxu3 %v657_v17  ;;  %678 = vmatpush.msra.mxu0 %v657_v17  ;;  %v248_v17 = vmul.f32 %v3952_v7, %v180_v13  ;;  %v298_v48 = vmul.f32 %v3952_v7, %v230_v37  ;;  %v199_v11 = vld [vmem:[#allocation3 + $0xa8] sm:$0xff] }
  0x25   :  { %89 = vst [vmem:[#allocation2 + $0x98] sm:$0xff] %v3893_v0  ;;  %3751 = vmatpush.msra.mxu1 %v656_v18  ;;  %3752 = vmatpush.msra.mxu2 %v656_v18  ;;  %v317_v57 = vadd.f32 %v3957_v8, %v249_v46  ;;  %v398_v63 = vmax.f32 %v4131_v45, 0.0  ;;  %v280_v13 = vmul.f32 %v3952_v7, %v212_v62  ;;  %v583_v35 = vld [vmem:[#allocation8 + $0x60] sm:$0xff] }
  0x26   :  { %90 = vst [vmem:[#allocation2 + $0xa0] sm:$0x3] %v3893_v0  ;;  %3753 = vmatpush.msra.mxu3 %v656_v18  ;;  %679 = vmatpush.msra.mxu0 %v656_v18  ;;  %v4142_v58 = vadd.f32 %v3957_v8, %v298_v48 }
  0x27   :  { %91 = vst [vmem:[#allocation2 + $0xa8] sm:$0xff] %v3893_v0  ;;  %3754 = vmatpush.msra.mxu1 %v655_v19  ;;  %3755 = vmatpush.msra.mxu2 %v655_v19 }
  0x28   :  { %92 = vst [vmem:[#allocation2 + $0xb0] sm:$0xff] %v3893_v0  ;;  %3756 = vmatpush.msra.mxu3 %v655_v19  ;;  %680 = vmatpush.msra.mxu0 %v655_v19  ;;  %v316_v19 = vadd.f32 %v3957_v8, %v248_v17  ;;  %v182_v17 = vld [vmem:[#allocation3 + $0x20] sm:$0xff] }
  0x29   :  { %93 = vst [vmem:[#allocation2 + $0xb8] sm:$0x3] %v3893_v0  ;;  %3757 = vmatpush.msra.mxu1 %v654_v22  ;;  %3758 = vmatpush.msra.mxu2 %v654_v22 }
  0x2a   :  { %96 = vst [vmem:[#allocation2 + $0xd0] sm:$0x3] %v3893_v0  ;;  %3759 = vmatpush.msra.mxu3 %v654_v22  ;;  %681 = vmatpush.msra.mxu0 %v654_v22  ;;  %v397_v22 = vmax.f32 %v4099_v16, 0.0 }
  0x2b   :  { %97 = vst [vmem:[#allocation2 + $0xd8] sm:$0xff] %v3893_v0  ;;  %3760 = vmatpush.msra.mxu1 %v653_v24  ;;  %3761 = vmatpush.msra.mxu2 %v653_v24 }
  0x2c   :  { %98 = vst [vmem:[#allocation2 + $0xe0] sm:$0xff] %v3893_v0  ;;  %3762 = vmatpush.msra.mxu3 %v653_v24  ;;  %682 = vmatpush.msra.mxu0 %v653_v24  ;;  %v4117_v24 = vmax.f32 %v316_v19, 0.0 }
  0x2d   :  { %99 = vst [vmem:[#allocation2 + $0xe8] sm:$0x3] %v3893_v0  ;;  %3763 = vmatpush.msra.mxu1 %v652_v25  ;;  %3764 = vmatpush.msra.mxu2 %v652_v25 }
  0x2e   :  { %100 = vst [vmem:[#allocation2 + $0xf0] sm:$0xff] %v3893_v0  ;;  %732 = vmatmul.f32.vlgmr.msra.gmra.mxu1 %v392_v14  ;;  %3765 = vmatpush.msra.mxu3 %v652_v25  ;;  %v229_v14 = vld [vmem:[#allocation3 + $0x198] sm:$0xff] }
  0x2f   :  { %101 = vst [vmem:[#allocation2 + $0xf8] sm:$0xff] %v3893_v0  ;;  %828 = vmatmul.f32.vlgmr.msra.gmra.mxu3 %v424_v27  ;;  %683 = vmatpush.msra.mxu0 %v652_v25  ;;  %v297_v18 = vmul.f32 %v3952_v7, %v229_v14  ;;  %v211_v25 = vld [vmem:[#allocation3 + $0x108] sm:$0xff]  ;;  %v5532_v14 = vmax.f32 %v4142_v58, 0.0 }
  0x30   :  { %102 = vst [vmem:[#allocation2 + $0x100] sm:$0x3] %v3893_v0  ;;  %684 = vmatmul.f32.vlgmr.msra.gmra.mxu0 %v587_v34  ;;  %v410_v34 = vmax.f32 %v4110_v20, 0.0  ;;  %1167 = vmatpush.msrb.mxu2 %v1166_v30  ;;  %v1873_v30 = vld [vmem:[#allocation8 + $0x268] sm:$0xff] }
  0x31   :  { %103 = vst [vmem:[#allocation2 + $0x108] sm:$0xff] %v3893_v0  ;;  %v4113_v21 = vadd.f32 %v3957_v8, %v297_v18  ;;  %1522 = vmatpush.msrb.mxu3 %v1521_v38  ;;  %877 = vmatpush.msrb.mxu1 %v586_v40  ;;  %v231_v18 = vld [vmem:[#allocation3 + $0x1a8] sm:$0xff]  ;;  %v4174_v40 = vadd.f32 %v3957_v8, %v280_v13 }
  0x32   :  { %104 = vst [vmem:[#allocation2 + $0x110] sm:$0xff] %v3893_v0  ;;  %1168 = vmatpush.msrb.mxu2 %v1165_v47  ;;  %1876 = vmatpush.msrb.mxu0 %v1875_v51  ;;  %v299_v26 = vmul.f32 %v3952_v7, %v231_v18  ;;  %v213_v47 = vld [vmem:[#allocation3 + $0x118] sm:$0xff]  ;;  %v576_v20 = vld [vmem:[#allocation8 + $0x28] sm:$0xff] }
  0x33   :  { %105 = vst [vmem:[#allocation2 + $0x118] sm:$0x3] %v3893_v0  ;;  %v429_v28 = vmax.f32 %v4113_v21, 0.0  ;;  %1523 = vmatpush.msrb.mxu3 %v1520_v50  ;;  %878 = vmatpush.msrb.mxu1 %v585_v52  ;;  %v1517_v51 = vld [vmem:[#allocation8 + $0x1d8] sm:$0xff]  ;;  %v1872_v52 = vld [vmem:[#allocation8 + $0x260] sm:$0xff]  ;;  %v412_v62 = vmax.f32 %v4174_v40, 0.0  ;;  %v281_v13 = vmul.f32 %v3952_v7, %v213_v47 }
  0x34   :  { %106 = vst [vmem:[#allocation2 + $0x120] sm:$0xff] %v3893_v0  ;;  %1169 = vmatpush.msrb.mxu2 %v1164_v59  ;;  %1877 = vmatpush.msrb.mxu0 %v1874_v4  ;;  %v4179_v46 = vadd.f32 %v3957_v8, %v299_v26  ;;  %v200_v59 = vld [vmem:[#allocation3 + $0xb0] sm:$0xff]  ;;  %v1510_v40 = vld [vmem:[#allocation8 + $0x1a0] sm:$0xff] }
  0x35   :  { %107 = vst [vmem:[#allocation2 + $0x128] sm:$0xff] %v3893_v0  ;;  %1524 = vmatpush.msrb.mxu3 %v1519_v2  ;;  %879 = vmatpush.msrb.mxu1 %v584_v10  ;;  %v1161_v2 = vld [vmem:[#allocation8 + $0x150] sm:$0xff]  ;;  %v268_v10 = vmul.f32 %v3952_v7, %v200_v59  ;;  %v4216_v47 = vadd.f32 %v3957_v8, %v281_v13 }
  0x36   :  { %108 = vst [vmem:[#allocation2 + $0x130] sm:$0x3] %v3893_v0  ;;  %735 = vmatmul.f32.gmra.mxu1 %v393_v33  ;;  %1170 = vmatpush.msrb.mxu2 %v1163_v12  ;;  %v5530_v4 = vmax.f32 %v4179_v46, 0.0  ;;  %v232_v12 = vld [vmem:[#allocation3 + $0x1b0] sm:$0xff] }
  0x37   :  { %109 = vst [vmem:[#allocation2 + $0x138] sm:$0xff] %v3893_v0  ;;  %831 = vmatmul.f32.gmra.mxu3 %v425_v36  ;;  %1878 = vmatpush.msrb.mxu0 %v1873_v30  ;;  %v1516_v18 = vld [vmem:[#allocation8 + $0x1d0] sm:$0xff] }
  0x38   :  { %110 = vst [vmem:[#allocation2 + $0x140] sm:$0xff] %v3893_v0  ;;  %687 = vmatmul.f32.gmra.mxu0 %v588_v43  ;;  %v279_v43 = vmul.f32 %v3952_v7, %v211_v25  ;;  %v250_v25 = vmul.f32 %v3952_v7, %v182_v17  ;;  %1525 = vmatpush.msrb.mxu3 %v1518_v29  ;;  %v581_v26 = vld [vmem:[#allocation8 + $0x50] sm:$0xff] }
  0x39   :  { %111 = vst [vmem:[#allocation2 + $0x148] sm:$0x3] %v3893_v0  ;;  %880 = vmatpush.msrb.mxu1 %v583_v35  ;;  %1879 = vmatpush.msrb.mxu0 %v1872_v52  ;;  %v300_v17 = vmul.f32 %v3952_v7, %v232_v12  ;;  %v4202_v29 = vadd.f32 %v3957_v8, %v268_v10  ;;  %v214_v35 = vld [vmem:[#allocation3 + $0x120] sm:$0xff]  ;;  %v1870_v59 = vld [vmem:[#allocation8 + $0x250] sm:$0xff] }
  0x3a   :  { %112 = vst [vmem:[#allocation2 + $0x150] sm:$0xff] %v3893_v0  ;;  %v4148_v60 = vadd.f32 %v3957_v8, %v279_v43  ;;  %v318_v38 = vadd.f32 %v3957_v8, %v250_v25  ;;  %v1162_v43 = vld [vmem:[#allocation8 + $0x158] sm:$0xff]  ;;  %1526 = vmatpush.msrb.mxu3 %v1517_v51  ;;  %v282_v10 = vmul.f32 %v3952_v7, %v214_v35  ;;  %v1159_v12 = vld [vmem:[#allocation8 + $0x140] sm:$0xff] }
  0x3b   :  { %113 = vst [vmem:[#allocation2 + $0x158] sm:$0xff] %v3893_v0  ;;  %1171 = vmatpush.msrb.mxu2 %v1162_v43  ;;  %v1871_v25 = vld [vmem:[#allocation8 + $0x258] sm:$0xff]  ;;  %v4210_v43 = vadd.f32 %v3957_v8, %v300_v17  ;;  %v5529_v51 = vmax.f32 %v4202_v29, 0.0  ;;  %v184_v17 = vld [vmem:[#allocation3 + $0x30] sm:$0xff]  ;;  %v1514_v35 = vld [vmem:[#allocation8 + $0x1c0] sm:$0xff] }
  0x3c   :  { %114 = vst [vmem:[#allocation2 + $0x160] sm:$0x3] %v3893_v0  ;;  %v411_v19 = vmax.f32 %v4148_v60, 0.0  ;;  %v4185_v50 = vmax.f32 %v318_v38, 0.0  ;;  %1527 = vmatpush.msrb.mxu3 %v1516_v18  ;;  %1880 = vmatpush.msrb.mxu0 %v1871_v25  ;;  %v1160_v38 = vld [vmem:[#allocation8 + $0x148] sm:$0xff]  ;;  %v233_v18 = vld [vmem:[#allocation3 + $0x1b8] sm:$0xff] }
  0x3d   :  { %115 = vst [vmem:[#allocation2 + $0x168] sm:$0xff] %v3893_v0  ;;  %1172 = vmatpush.msrb.mxu2 %v1161_v2  ;;  %v580_v2 = vld [vmem:[#allocation8 + $0x48] sm:$0xff]  ;;  %v5528_v13 = vmax.f32 %v4210_v43, 0.0  ;;  %v413_v25 = vmax.f32 %v4216_v47, 0.0 }
  0x3e   :  { %116 = vst [vmem:[#allocation2 + $0x170] sm:$0xff] %v3893_v0  ;;  %738 = vmatmul.f32.gmra.mxu1 %v394_v42  ;;  %1881 = vmatpush.msrb.mxu0 %v1870_v59 }
  0x3f   :  { %117 = vst [vmem:[#allocation2 + $0x178] sm:$0x3] %v3893_v0  ;;  %834 = vmatmul.f32.gmra.mxu3 %v426_v44  ;;  %1173 = vmatpush.msrb.mxu2 %v1160_v38  ;;  %v1869_v38 = vld [vmem:[#allocation8 + $0x248] sm:$0xff] }
  0x40   :  { %118 = vst [vmem:[#allocation2 + $0x180] sm:$0xff] %v3893_v0  ;;  %690 = vmatmul.f32.gmra.mxu0 %v4059_v55 }
  0x41   :  { %119 = vst [vmem:[#allocation2 + $0x188] sm:$0xff] %v3893_v0  ;;  %1174 = vmatpush.msrb.mxu2 %v1159_v12  ;;  %1882 = vmatpush.msrb.mxu0 %v1869_v38  ;;  %v1158_v12 = vld [vmem:[#allocation8 + $0x138] sm:$0xff] }
  0x42   :  { %120 = vst [vmem:[#allocation2 + $0x190] sm:$0x3] %v3893_v0  ;;  %v578_v38 = vld [vmem:[#allocation8 + $0x38] sm:$0xff] }
  0x43   :  { %121 = vst [vmem:[#allocation2 + $0x198] sm:$0xff] %v3893_v0  ;;  %1175 = vmatpush.msrb.mxu2 %v1158_v12 }
  0x44   :  { %122 = vst [vmem:[#allocation2 + $0x1a0] sm:$0xff] %v3893_v0 }
  0x45   :  { %123 = vst [vmem:[#allocation2 + $0x1a8] sm:$0x3] %v3893_v0 }
  0x46   :  { %124 = vst [vmem:[#allocation2 + $0x1b0] sm:$0xff] %v3893_v0  ;;  %741 = vmatmul.f32.gmra.mxu1 %v395_v54 }
  0x47   :  { %125 = vst [vmem:[#allocation2 + $0x1b8] sm:$0xff] %v3893_v0  ;;  %837 = vmatmul.f32.gmra.mxu3 %v427_v56 }
  0x48   :  { %126 = vst [vmem:[#allocation2 + $0x1c0] sm:$0x3] %v3893_v0  ;;  %693 = vmatmul.f32.gmra.mxu0 %v4086_v6 }
  0x49   :  { %127 = vst [vmem:[#allocation2 + $0x1c8] sm:$0xff] %v3893_v0 }
  0x4a   :  { %128 = vst [vmem:[#allocation2 + $0x1d0] sm:$0xff] %v3893_v0 }
  0x4b   :  { %129 = vst [vmem:[#allocation2 + $0x1d8] sm:$0x3] %v3893_v0 }
  0x4c   :  { %130 = vst [vmem:[#allocation2 + $0x1e0] sm:$0xff] %v3893_v0 }
  0x4d   :  { %131 = vst [vmem:[#allocation2 + $0x1e8] sm:$0xff] %v3893_v0 }
  0x4e   :  { %132 = vst [vmem:[#allocation2 + $0x1f0] sm:$0x3] %v3893_v0  ;;  %v619_v1 = vld [vmem:[#allocation2 + $0x1b1] sm:$0xff]  ;;  %744 = vmatmul.f32.gmra.mxu1 %v396_v5 }
  0x4f   :  { %133 = vst [vmem:[#allocation2 + $0x1f8] sm:$0xff] %v3893_v0  ;;  %780 = vmatmul.f32.vlgmr.msra.gmra.mxu2 %v619_v1  ;;  %v620_v15 = vld [vmem:[#allocation2 + $0x1b9] sm:$0xff]  ;;  %840 = vmatmul.f32.gmra.mxu3 %v428_v9  ;;  %v4151_v1 = vmax.f32 %v317_v57, 0.0 }
  0x50   :  { %134 = vst [vmem:[#allocation2 + $0x200] sm:$0xff] %v3893_v0  ;;  %696 = vmatmul.f32.gmra.mxu0 %v4117_v24  ;;  %v582_v57 = vld [vmem:[#allocation8 + $0x58] sm:$0xff] }
  0x51   :  { %135 = vst [vmem:[#allocation2 + $0x208] sm:$0x3] %v3893_v0  ;;  %881 = vmatpush.msrb.mxu1 %v582_v57  ;;  %v1515_v57 = vld [vmem:[#allocation8 + $0x1c8] sm:$0xff] }
  0x52   :  { %136 = vst [vmem:[#allocation2 + $0x210] sm:$0xff] %v3893_v0  ;;  %1528 = vmatpush.msrb.mxu3 %v1515_v57  ;;  %v579_v57 = vld [vmem:[#allocation8 + $0x40] sm:$0xff] }
  0x53   :  { %137 = vst [vmem:[#allocation2 + $0x218] sm:$0xff] %v3893_v0  ;;  %882 = vmatpush.msrb.mxu1 %v581_v26  ;;  %v252_v26 = vmul.f32 %v3952_v7, %v184_v17 }
  0x54   :  { %138 = vst [vmem:[#allocation2 + $0x220] sm:$0x3] %v3893_v0  ;;  %1529 = vmatpush.msrb.mxu3 %v1514_v35  ;;  %v1868_v35 = vld [vmem:[#allocation8 + $0x240] sm:$0xff] }
  0x55   :  { %139 = vst [vmem:[#allocation2 + $0x228] sm:$0xff] %v3893_v0  ;;  %883 = vmatpush.msrb.mxu1 %v580_v2  ;;  %v4240_v2 = vadd.f32 %v3957_v8, %v282_v10  ;;  %v215_v10 = vld [vmem:[#allocation3 + $0x128] sm:$0xff]  ;;  %1883 = vmatpush.msrb.mxu0 %v1868_v35  ;;  %v1512_v35 = vld [vmem:[#allocation8 + $0x1b0] sm:$0xff] }
  0x56   :  { %140 = vst [vmem:[#allocation2 + $0x230] sm:$0xff] %v3893_v0  ;;  %747 = vmatmul.f32.gmra.mxu1 %v397_v22 }
  0x57   :  { %141 = vst [vmem:[#allocation2 + $0x238] sm:$0x3] %v3893_v0  ;;  %783 = vmatmul.f32.gmra.mxu2 %v620_v15  ;;  %843 = vmatmul.f32.gmra.mxu3 %v429_v28  ;;  %v267_v15 = vmul.f32 %v3952_v7, %v199_v11  ;;  %v183_v11 = vld [vmem:[#allocation3 + $0x28] sm:$0xff] }
  0x58   :  { %142 = vst [vmem:[#allocation2 + $0x240] sm:$0xff] %v3893_v0  ;;  %699 = vmatmul.f32.gmra.mxu0 %v4151_v1  ;;  %884 = vmatpush.msrb.mxu1 %v579_v57  ;;  %v202_v57 = vld [vmem:[#allocation3 + $0xc0] sm:$0xff] }
  0x59   :  { %143 = vst [vmem:[#allocation2 + $0x248] sm:$0xff] %v3893_v0  ;;  %v4168_v37 = vadd.f32 %v3957_v8, %v267_v15  ;;  %v251_v15 = vmul.f32 %v3952_v7, %v183_v11  ;;  %v201_v11 = vld [vmem:[#allocation3 + $0xb8] sm:$0xff]  ;;  %v270_v12 = vmul.f32 %v3952_v7, %v202_v57 }
  0x5a   :  { %144 = vst [vmem:[#allocation2 + $0x250] sm:$0x3] %v3893_v0  ;;  %885 = vmatpush.msrb.mxu1 %v578_v38  ;;  %v1867_v38 = vld [vmem:[#allocation8 + $0x238] sm:$0xff]  ;;  %v577_v57 = vld [vmem:[#allocation8 + $0x30] sm:$0xff] }
  0x5b   :  { %145 = vst [vmem:[#allocation2 + $0x258] sm:$0xff] %v3893_v0  ;;  %v5531_v48 = vmax.f32 %v4168_v37, 0.0  ;;  %v319_v30 = vadd.f32 %v3957_v8, %v251_v15  ;;  %v269_v15 = vmul.f32 %v3952_v7, %v201_v11  ;;  %v320_v11 = vadd.f32 %v3957_v8, %v252_v26  ;;  %v1513_v26 = vld [vmem:[#allocation8 + $0x1b8] sm:$0xff]  ;;  %1884 = vmatpush.msrb.mxu0 %v1867_v38 }
  0x5c   :  { %146 = vst [vmem:[#allocation2 + $0x260] sm:$0xff] %v3893_v0  ;;  %1530 = vmatpush.msrb.mxu3 %v1513_v26  ;;  %886 = vmatpush.msrb.mxu1 %v577_v57  ;;  %v236_v57 = vld [vmem:[#allocation3 + $0x1d0] sm:$0xff] }
  0x5d   :  { %147 = vst [vmem:[#allocation2 + $0x268] sm:$0x3] %v3893_v0  ;;  %v4219_v52 = vmax.f32 %v319_v30, 0.0  ;;  %v301_v30 = vmul.f32 %v3952_v7, %v233_v18  ;;  %v4236_v59 = vadd.f32 %v3957_v8, %v269_v15  ;;  %v4253_v18 = vmax.f32 %v320_v11, 0.0 }
  0x5e   :  { %148 = vst [vmem:[#allocation2 + $0x270] sm:$0xff] %v3893_v0  ;;  %750 = vmatmul.f32.gmra.mxu1 %v398_v63  ;;  %1531 = vmatpush.msrb.mxu3 %v1512_v35  ;;  %v204_v35 = vld [vmem:[#allocation3 + $0xd0] sm:$0xff] }
  0x5f   :  { %149 = vst [vmem:[#allocation2 + $0x278] sm:$0xff] %v3893_v0  ;;  %786 = vmatmul.f32.gmra.mxu2 %v410_v34  ;;  %846 = vmatmul.f32.gmra.mxu3 %v5532_v14  ;;  %v4247_v17 = vadd.f32 %v3957_v8, %v301_v30  ;;  %v401_v15 = vmax.f32 %v4236_v59, 0.0  ;;  %v414_v30 = vmax.f32 %v4240_v2, 0.0  ;;  %v4272_v14 = vadd.f32 %v3957_v8, %v270_v12 }
  0x60   :  { %150 = vst [vmem:[#allocation2 + $0x280] sm:$0x3] %v3893_v0  ;;  %702 = vmatmul.f32.gmra.mxu0 %v4185_v50  ;;  %887 = vmatpush.msrb.mxu1 %v576_v20  ;;  %v272_v38 = vmul.f32 %v3952_v7, %v204_v35  ;;  %v5533_v2 = vmax.f32 %v4142_v58, 0.0  ;;  %v205_v20 = vld [vmem:[#allocation3 + $0xd8] sm:$0xff] }
  0x61   :  { %151 = vst [vmem:[#allocation2 + $0x288] sm:$0xff] %v3893_v0  ;;  %v433_v11 = vmax.f32 %v4247_v17, 0.0  ;;  %v1508_v35 = vld [vmem:[#allocation8 + $0x190] sm:$0xff] }
  0x62   :  { %152 = vst [vmem:[#allocation2 + $0x290] sm:$0xff] %v3893_v0 }
  0x63   :  { %153 = vst [vmem:[#allocation2 + $0x298] sm:$0x3] %v3893_v0 }
  0x64   :  { %154 = vst [vmem:[#allocation2 + $0x2a0] sm:$0xff] %v3893_v0 }
  0x65   :  { %155 = vst [vmem:[#allocation2 + $0x2a8] sm:$0xff] %v3893_v0 }
  0x66   :  { %156 = vst [vmem:[#allocation2 + $0x2b0] sm:$0x3] %v3893_v0  ;;  %753 = vmatmul.f32.gmra.mxu1 %v5531_v48  ;;  %v283_v48 = vmul.f32 %v3952_v7, %v215_v10 }
  0x67   :  { %157 = vst [vmem:[#allocation2 + $0x2b8] sm:$0xff] %v3893_v0  ;;  %789 = vmatmul.f32.gmra.mxu2 %v411_v19  ;;  %849 = vmatmul.f32.gmra.mxu3 %v5530_v4  ;;  %v234_v4 = vld [vmem:[#allocation3 + $0x1c0] sm:$0xff] }
  0x68   :  { %158 = vst [vmem:[#allocation2 + $0x2c0] sm:$0xff] %v3893_v0  ;;  %705 = vmatmul.f32.gmra.mxu0 %v4219_v52  ;;  %v302_v26 = vmul.f32 %v3952_v7, %v234_v4  ;;  %v4289_v31 = vadd.f32 %v3957_v8, %v283_v48  ;;  %v1866_v4 = vld [vmem:[#allocation8 + $0x230] sm:$0xff] }
  0x69   :  { %159 = vst [vmem:[#allocation2 + $0x2c8] sm:$0x3] %v3893_v0  ;;  %1885 = vmatpush.msrb.mxu0 %v1866_v4  ;;  %v574_v4 = vld [vmem:[#allocation8 + $0x18] sm:$0xff] }
  0x6a   :  { %160 = vst [vmem:[#allocation2 + $0x2d0] sm:$0xff] %v3893_v0  ;;  %v415_v49 = vmax.f32 %v4289_v31, 0.0 }
  0x6b   :  { %161 = vst [vmem:[#allocation2 + $0x2d8] sm:$0xff] %v3893_v0 }
  0x6c   :  { %162 = vst [vmem:[#allocation2 + $0x2e0] sm:$0x3] %v3893_v0 }
  0x6d   :  { %163 = vst [vmem:[#allocation2 + $0x2e8] sm:$0xff] %v3893_v0 }
  0x6e   :  { %164 = vst [vmem:[#allocation2 + $0x2f0] sm:$0xff] %v3893_v0  ;;  %756 = vmatmul.f32.gmra.mxu1 %v5529_v51  ;;  %v185_v51 = vld [vmem:[#allocation3 + $0x38] sm:$0xff] }
  0x6f   :  { %165 = vst [vmem:[#allocation2 + $0x2f8] sm:$0x3] %v3893_v0  ;;  %792 = vmatmul.f32.gmra.mxu2 %v412_v62  ;;  %852 = vmatmul.f32.gmra.mxu3 %v5528_v13  ;;  %v1157_v13 = vld [vmem:[#allocation8 + $0x130] sm:$0xff] }
  0x70   :  { %166 = vst [vmem:[#allocation2 + $0x300] sm:$0xff] %v3893_v0  ;;  %708 = vmatmul.f32.gmra.mxu0 %v4253_v18  ;;  %1176 = vmatpush.msrb.mxu2 %v1157_v13 }
  0x71   :  { %167 = vst [vmem:[#allocation2 + $0x308] sm:$0xff] %v3893_v0 }
  0x72   :  { %168 = vst [vmem:[#allocation2 + $0x310] sm:$0x3] %v3893_v0 }
  0x73   :  { %169 = vst [vmem:[#allocation2 + $0x318] sm:$0xff] %v3893_v0 }
  0x74   :  { %170 = vst [vmem:[#allocation2 + $0x320] sm:$0xff] %v3893_v0 }
  0x75   :  { %171 = vst [vmem:[#allocation2 + $0x328] sm:$0x3] %v3893_v0 }
  0x76   :  { %172 = vst [vmem:[#allocation2 + $0x330] sm:$0xff] %v3893_v0  ;;  %759 = vmatmul.f32.gmra.mxu1 %v401_v15 }
  0x77   :  { %173 = vst [vmem:[#allocation2 + $0x338] sm:$0xff] %v3893_v0  ;;  %795 = vmatmul.f32.gmra.mxu2 %v413_v25  ;;  %855 = vmatmul.f32.gmra.mxu3 %v433_v11 }
  0x78   :  { %174 = vst [vmem:[#allocation2 + $0x340] sm:$0x3] %v3893_v0 }
  0x79   :  { %175 = vst [vmem:[#allocation2 + $0x348] sm:$0xff] %v3893_v0 }
  0x7a   :  { %176 = vst [vmem:[#allocation2 + $0x350] sm:$0xff] %v3893_v0 }
  0x7b   :  { %177 = vst [vmem:[#allocation2 + $0x358] sm:$0x3] %v3893_v0  ;;  %v253_v0 = vmul.f32 %v3952_v7, %v185_v51  ;;  %v235_v51 = vld [vmem:[#allocation3 + $0x1c8] sm:$0xff] }
  0x7c   :  { %489 = vst [vmem:[#allocation2 + $0x271] sm:$0xff] %v424_v27  ;;  %v4282_v27 = vadd.f32 %v3957_v8, %v302_v26  ;;  %v575_v26 = vld [vmem:[#allocation8 + $0x20] sm:$0xff] }
  0x7d   :  { %458 = vst [vmem:[#allocation2 + $0xc9] sm:$0xff] %v393_v33  ;;  %v321_v23 = vadd.f32 %v3957_v8, %v253_v0  ;;  %v402_v33 = vmax.f32 %v4272_v14, 0.0  ;;  %v217_v0 = vld [vmem:[#allocation3 + $0x138] sm:$0xff]  ;;  %888 = vmatpush.msrb.mxu1 %v575_v26  ;;  %v1507_v14 = vld [vmem:[#allocation8 + $0x188] sm:$0xff] }
  0x7e   :  { %490 = vst [vmem:[#allocation2 + $0x279] sm:$0xff] %v425_v36  ;;  %v1156_v36 = vld [vmem:[#allocation8 + $0x128] sm:$0xff]  ;;  %v434_v48 = vmax.f32 %v4282_v27, 0.0  ;;  %v285_v16 = vmul.f32 %v3952_v7, %v217_v0  ;;  %v1153_v26 = vld [vmem:[#allocation8 + $0x110] sm:$0xff] }
  0x7f   :  { %459 = vst [vmem:[#allocation2 + $0xd9] sm:$0xff] %v394_v42  ;;  %798 = vmatmul.f32.gmra.mxu2 %v414_v30  ;;  %v4292_v39 = vmax.f32 %v321_v23, 0.0  ;;  %v1511_v42 = vld [vmem:[#allocation8 + $0x1a8] sm:$0xff]  ;;  %762 = vmatmul.f32.gmra.mxu1 %v402_v33 }
  0x80   :  { %475 = vst [vmem:[#allocation2 + $0x1c9] sm:$0xff] %v410_v34  ;;  %1177 = vmatpush.msrb.mxu2 %v1156_v36  ;;  %1532 = vmatpush.msrb.mxu3 %v1511_v42  ;;  %v203_v34 = vld [vmem:[#allocation3 + $0xc8] sm:$0xff]  ;;  %v353_v21 = vadd.f32 %v3957_v8, %v285_v16  ;;  %v206_v16 = vld [vmem:[#allocation3 + $0xe0] sm:$0xff] }
  0x81   :  { %491 = vst [vmem:[#allocation2 + $0x289] sm:$0xff] %v426_v44  ;;  %711 = vmatmul.f32.gmra.mxu0 %v4292_v39  ;;  %v271_v41 = vmul.f32 %v3952_v7, %v203_v34  ;;  %v186_v44 = vld [vmem:[#allocation3 + $0x40] sm:$0xff]  ;;  %858 = vmatmul.f32.gmra.mxu3 %v434_v48  ;;  %v5534_v34 = vmax.f32 %v4168_v37, 0.0 }
  0x82   :  { %460 = vst [vmem:[#allocation2 + $0xe1] sm:$0xff] %v395_v54  ;;  %v284_v54 = vmul.f32 %v3952_v7, %v216_v32  ;;  %v254_v60 = vmul.f32 %v3952_v7, %v186_v44  ;;  %1178 = vmatpush.msrb.mxu2 %v1155_v61  ;;  %1533 = vmatpush.msrb.mxu3 %v1510_v40  ;;  %v1864_v42 = vld [vmem:[#allocation8 + $0x220] sm:$0xff]  ;;  %v188_v44 = vld [vmem:[#allocation3 + $0x50] sm:$0xff] }
  0x83   :  { %476 = vst [vmem:[#allocation2 + $0x1d1] sm:$0xff] %v411_v19  ;;  %v303_v19 = vmul.f32 %v3952_v7, %v235_v51  ;;  %v4313_v13 = vadd.f32 %v3957_v8, %v271_v41  ;;  %889 = vmatpush.msrb.mxu1 %v574_v4  ;;  %v237_v51 = vld [vmem:[#allocation3 + $0x1d8] sm:$0xff]  ;;  %v219_v61 = vld [vmem:[#allocation3 + $0x148] sm:$0xff] }
  0x84   :  { %443 = vst [vmem:[#allocation2 + $0x19] sm:$0xff] %v4059_v55  ;;  %v322_v10 = vadd.f32 %v3957_v8, %v254_v60  ;;  %v4329_v53 = vadd.f32 %v3957_v8, %v284_v54  ;;  %v417_v54 = vmax.f32 %v353_v21, 0.0  ;;  %v4388_v60 = vld [vmem:[%s5524_s2] ss:$0 sm:$0xff] }
  0x85   :  { %492 = vst [vmem:[#allocation2 + $0x291] sm:$0xff] %v427_v56  ;;  %v4323_v12 = vadd.f32 %v3957_v8, %v303_v19  ;;  %v403_v56 = vmax.f32 %v4313_v13, 0.0  ;;  %v5535_v19 = vmax.f32 %v4179_v46, 0.0  ;;  %v238_v21 = vld [vmem:[#allocation3 + $0x1e0] sm:$0xff] }
  0x86   :  { %461 = vst [vmem:[#allocation2 + $0xf1] sm:$0xff] %v396_v5  ;;  %v4332_v5 = vmax.f32 %v322_v10, 0.0  ;;  %v416_v23 = vmax.f32 %v4329_v53, 0.0  ;;  %v5536_v53 = vmax.f32 %v4202_v29, 0.0 }
  0x87   :  { %477 = vst [vmem:[#allocation2 + $0x1e1] sm:$0xff] %v412_v62  ;;  %801 = vmatmul.f32.gmra.mxu2 %v415_v49  ;;  %v1865_v62 = vld [vmem:[#allocation8 + $0x228] sm:$0xff]  ;;  %v435_v3 = vmax.f32 %v4323_v12, 0.0  ;;  %765 = vmatmul.f32.gmra.mxu1 %v403_v56 }
  0x88   :  { %444 = vst [vmem:[#allocation2 + $0x21] sm:$0xff] %v4086_v6  ;;  %1886 = vmatpush.msrb.mxu0 %v1865_v62 }
  0x89   :  { %493 = vst [vmem:[#allocation2 + $0x2a1] sm:$0xff] %v428_v9  ;;  %714 = vmatmul.f32.gmra.mxu0 %v4332_v5  ;;  %v187_v9 = vld [vmem:[#allocation3 + $0x48] sm:$0xff]  ;;  %861 = vmatmul.f32.gmra.mxu3 %v435_v3 }
  0x8a   :  { %462 = vst [vmem:[#allocation2 + $0xf9] sm:$0xff] %v397_v22  ;;  %v4349_v22 = vadd.f32 %v3957_v8, %v272_v38  ;;  %v255_v47 = vmul.f32 %v3952_v7, %v187_v9  ;;  %1887 = vmatpush.msrb.mxu0 %v1864_v42  ;;  %v1863_v38 = vld [vmem:[#allocation8 + $0x218] sm:$0xff]  ;;  %v5537_v9 = vmax.f32 %v4210_v43, 0.0 }
  0x8b   :  { %478 = vst [vmem:[#allocation2 + $0x1e9] sm:$0xff] %v413_v25  ;;  %v304_v25 = vmul.f32 %v3952_v7, %v236_v57 }
  0x8c   :  { %445 = vst [vmem:[#allocation2 + $0x31] sm:$0xff] %v4117_v24  ;;  %v323_v32 = vadd.f32 %v3957_v8, %v255_v47  ;;  %v404_v7 = vmax.f32 %v4349_v22, 0.0  ;;  %v220_v47 = vld [vmem:[#allocation3 + $0x150] sm:$0xff]  ;;  %1888 = vmatpush.msrb.mxu0 %v1863_v38 }
  0x8d   :  { %494 = vst [vmem:[#allocation2 + $0x2a9] sm:$0xff] %v429_v28  ;;  %v4363_v36 = vadd.f32 %v3957_v8, %v304_v25  ;;  %v1154_v28 = vld [vmem:[#allocation8 + $0x118] sm:$0xff] }
  0x8e   :  { %463 = vst [vmem:[#allocation2 + $0x109] sm:$0xff] %v398_v63  ;;  %v4368_v45 = vmax.f32 %v323_v32, 0.0  ;;  %v1509_v63 = vld [vmem:[#allocation8 + $0x198] sm:$0xff]  ;;  %1179 = vmatpush.msrb.mxu2 %v1154_v28 }
  0x8f   :  { %479 = vst [vmem:[#allocation2 + $0x1f9] sm:$0xff] %v414_v30  ;;  %804 = vmatmul.f32.gmra.mxu2 %v416_v23  ;;  %v218_v30 = vld [vmem:[#allocation3 + $0x140] sm:$0xff]  ;;  %1534 = vmatpush.msrb.mxu3 %v1509_v63  ;;  %v436_v58 = vmax.f32 %v4363_v36, 0.0  ;;  %v189_v32 = vld [vmem:[#allocation3 + $0x58] sm:$0xff]  ;;  %v191_v36 = vld [vmem:[#allocation3 + $0x68] sm:$0xff] }
  0x90   :  { %446 = vst [vmem:[#allocation2 + $0x39] sm:$0xff] %v4151_v1  ;;  %v4374_v8 = vld [vmem:[#allocation6] ss:$0 sm:$0xff]  ;;  %768 = vmatmul.f32.gmra.mxu1 %v404_v7  ;;  %1180 = vmatpush.msrb.mxu2 %v1153_v26  ;;  %v223_v26 = vld [vmem:[#allocation3 + $0x168] sm:$0xff] }
  0x91   :  { %495 = vst [vmem:[#allocation2 + $0x2b9] sm:$0xff] %v5533_v2  ;;  %v273_v41 = vmul.f32 %v4374_v8, %v205_v20  ;;  %717 = vmatmul.f32.gmra.mxu0 %v4368_v45  ;;  %v286_v37 = vmul.f32 %v4374_v8, %v218_v30  ;;  %v305_v10 = vmul.f32 %v4374_v8, %v237_v51  ;;  %v221_v30 = vld [vmem:[#allocation3 + $0x158] sm:$0xff] }
  0x92   :  { %464 = vst [vmem:[#allocation2 + $0x111] sm:$0xff] %v5534_v34  ;;  %864 = vmatmul.f32.gmra.mxu3 %v436_v58  ;;  %v287_v57 = vmul.f32 %v4374_v8, %v219_v61  ;;  %v274_v25 = vmul.f32 %v4374_v8, %v206_v16  ;;  %v288_v42 = vmul.f32 %v4374_v8, %v220_v47  ;;  %v571_v47 = vld [vmem:[#allocation8] sm:$0xff] }
  0x93   :  { %480 = vst [vmem:[#allocation2 + $0x201] sm:$0xff] %v415_v49  ;;  %v4391_v31 = vadd.f32 %v4388_v60, %v273_v41  ;;  %v256_v49 = vmul.f32 %v4374_v8, %v188_v44  ;;  %v4403_v62 = vadd.f32 %v4388_v60, %v305_v10  ;;  %v354_v46 = vadd.f32 %v4388_v60, %v286_v37  ;;  %v207_v37 = vld [vmem:[#allocation3 + $0xe8] sm:$0xff] }
  0x94   :  { %447 = vst [vmem:[#allocation2 + $0x49] sm:$0xff] %v4185_v50  ;;  %1535 = vmatpush.msrb.mxu3 %v1508_v35  ;;  %v4422_v59 = vadd.f32 %v4388_v60, %v274_v25  ;;  %v355_v63 = vadd.f32 %v4388_v60, %v287_v57  ;;  %v306_v2 = vmul.f32 %v4374_v8, %v238_v21  ;;  %v239_v10 = vld [vmem:[#allocation3 + $0x1e8] sm:$0xff] }
  0x95   :  { %496 = vst [vmem:[#allocation2 + $0x2c1] sm:$0xff] %v5535_v19  ;;  %v324_v40 = vadd.f32 %v4388_v60, %v256_v49  ;;  %v405_v0 = vmax.f32 %v4391_v31, 0.0  ;;  %v437_v43 = vmax.f32 %v4403_v62, 0.0  ;;  %v418_v28 = vmax.f32 %v354_v46, 0.0  ;;  %v222_v49 = vld [vmem:[#allocation3 + $0x160] sm:$0xff] }
  0x96   :  { %465 = vst [vmem:[#allocation2 + $0x121] sm:$0xff] %v5536_v53  ;;  %v4436_v20 = vadd.f32 %v4388_v60, %v306_v2  ;;  %v406_v17 = vmax.f32 %v4422_v59, 0.0  ;;  %v419_v41 = vmax.f32 %v355_v63, 0.0  ;;  %v356_v44 = vadd.f32 %v4388_v60, %v288_v42  ;;  %1536 = vmatpush.msrb.mxu3 %v1507_v14  ;;  %v1506_v57 = vld [vmem:[#allocation8 + $0x180] sm:$0xff]  ;;  %v2229_v59 = vld [vmem:[#allocation8 + $0x2f8] sm:$0xff] }
  0x97   :  { %481 = vst [vmem:[#allocation2 + $0x211] sm:$0xff] %v416_v23  ;;  %807 = vmatmul.f32.gmra.mxu2 %v417_v54  ;;  %v4408_v29 = vmax.f32 %v324_v40, 0.0  ;;  %v573_v23 = vld [vmem:[#allocation8 + $0x10] sm:$0xff]  ;;  %v289_v51 = vmul.f32 %v4374_v8, %v221_v30  ;;  %v275_v19 = vmul.f32 %v4374_v8, %v207_v37  ;;  %v290_v40 = vmul.f32 %v4374_v8, %v222_v49  ;;  %v3292_v30 = vld [vmem:[#allocation8 + $0x478] sm:$0xff] }
  0x98   :  { %448 = vst [vmem:[#allocation2 + $0x51] sm:$0xff] %v4219_v52  ;;  %890 = vmatpush.msrb.mxu1 %v573_v23  ;;  %v438_v27 = vmax.f32 %v4436_v20, 0.0  ;;  %v420_v53 = vmax.f32 %v356_v44, 0.0  ;;  %v307_v46 = vmul.f32 %v4374_v8, %v239_v10  ;;  %v1861_v23 = vld [vmem:[#allocation8 + $0x208] sm:$0xff]  ;;  %v291_v16 = vmul.f32 %v4374_v8, %v223_v26  ;;  %1537 = vmatpush.msrb.mxu3 %v1506_v57  ;;  %v1441_v63 = vld [vmem:[#allocation2 + $0x18] sm:$0xff]  ;;  %v1442_v20 = vld [vmem:[#allocation2 + $0x20] sm:$0xff] }
  0x99   :  { %497 = vst [vmem:[#allocation2 + $0x2d1] sm:$0xff] %v5537_v9  ;;  %720 = vmatmul.f32.gmra.mxu0 %v4408_v29  ;;  %771 = vmatmul.f32.gmra.mxu1 %v405_v0  ;;  %v343_v13 = vadd.f32 %v4388_v60, %v275_v19  ;;  %v4459_v61 = vadd.f32 %v4388_v60, %v289_v51  ;;  %v1444_v51 = vld [vmem:[#allocation2 + $0x38] sm:$0xff] }
  0x9a   :  { %466 = vst [vmem:[#allocation2 + $0x129] sm:$0xff] %v401_v15  ;;  %v257_v15 = vmul.f32 %v4374_v8, %v189_v32  ;;  %867 = vmatmul.f32.gmra.mxu3 %v437_v43  ;;  %v375_v38 = vadd.f32 %v4388_v60, %v307_v46  ;;  %v359_v21 = vadd.f32 %v4388_v60, %v291_v16  ;;  %v2583_v49 = vld [vmem:[#allocation8 + $0x370] sm:$0xff]  ;;  %v1088_v26 = vld [vmem:[#allocation2 + $0x1a] sm:$0xff] }
  0x9b   :  { %482 = vst [vmem:[#allocation2 + $0x219] sm:$0xff] %v417_v54  ;;  %v572_v54 = vld [vmem:[#allocation8 + $0x8] sm:$0xff]  ;;  %v407_v12 = vmax.f32 %v343_v13, 0.0  ;;  %v421_v22 = vmax.f32 %v4459_v61, 0.0  ;;  %v2937_v19 = vld [vmem:[#allocation8 + $0x3f0] sm:$0xff] }
  0x9c   :  { %449 = vst [vmem:[#allocation2 + $0x61] sm:$0xff] %v4253_v18  ;;  %v325_v4 = vadd.f32 %v4388_v60, %v257_v15  ;;  %891 = vmatpush.msrb.mxu1 %v572_v54  ;;  %v439_v25 = vmax.f32 %v375_v38, 0.0  ;;  %v423_v62 = vmax.f32 %v359_v21, 0.0  ;;  %v2938_v15 = vld [vmem:[#allocation8 + $0x3f8] sm:$0xff]  ;;  %v1086_v54 = vld [vmem:[#allocation2 + $0x2] sm:$0xff]  ;;  %v1087_v13 = vld [vmem:[#allocation2 + $0xa] sm:$0xff] }
  0x9d   :  { %498 = vst [vmem:[#allocation2 + $0x2d9] sm:$0xff] %v433_v11  ;;  %v1152_v11 = vld [vmem:[#allocation8 + $0x108] sm:$0xff]  ;;  %2939 = vmatpush.msra.mxu3 %v2938_v15  ;;  %v3291_v61 = vld [vmem:[#allocation8 + $0x470] sm:$0xff] }
  0x9e   :  { %467 = vst [vmem:[#allocation2 + $0x139] sm:$0xff] %v402_v33  ;;  %v4440_v34 = vmax.f32 %v325_v4, 0.0  ;;  %v1862_v33 = vld [vmem:[#allocation8 + $0x210] sm:$0xff]  ;;  %1181 = vmatpush.msrb.mxu2 %v1152_v11  ;;  %892 = vmatpush.msrb.mxu1 %v571_v47  ;;  %v1445_v10 = vld [vmem:[#allocation2 + $0x48] sm:$0xff] }
  0x9f   :  { %483 = vst [vmem:[#allocation2 + $0x229] sm:$0xff] %v418_v28  ;;  %810 = vmatmul.f32.gmra.mxu2 %v418_v28  ;;  %1889 = vmatpush.msrb.mxu0 %v1862_v33  ;;  %v1443_v33 = vld [vmem:[#allocation2 + $0x30] sm:$0xff] }
  0xa0   :  { %450 = vst [vmem:[#allocation2 + $0x69] sm:$0xff] %v4292_v39  ;;  %2230 = vmatpush.msra.mxu1 %v2229_v59  ;;  %2940 = vmatpush.msra.mxu3 %v2937_v19  ;;  %v3290_v15 = vld [vmem:[#allocation8 + $0x468] sm:$0xff] }
  0xa1   :  { %499 = vst [vmem:[#allocation2 + $0x2e9] sm:$0xff] %v434_v48  ;;  %723 = vmatmul.f32.gmra.mxu0 %v4440_v34  ;;  %v190_v48 = vld [vmem:[#allocation3 + $0x60] sm:$0xff]  ;;  %774 = vmatmul.f32.gmra.mxu1 %v406_v17 }
  0xa2   :  { %468 = vst [vmem:[#allocation2 + $0x141] sm:$0xff] %v403_v56  ;;  %v258_v56 = vmul.f32 %v4374_v8, %v190_v48  ;;  %870 = vmatmul.f32.gmra.mxu3 %v438_v27  ;;  %1890 = vmatpush.msrb.mxu0 %v1861_v23  ;;  %v1089_v23 = vld [vmem:[#allocation2 + $0x22] sm:$0xff] }
  0xa3   :  { %484 = vst [vmem:[#allocation2 + $0x231] sm:$0xff] %v419_v41  ;;  %v1447_v57 = vld [vmem:[#allocation2 + $0x60] sm:$0xff] }
  0xa4   :  { %451 = vst [vmem:[#allocation2 + $0x79] sm:$0xff] %v4332_v5  ;;  %v326_v35 = vadd.f32 %v4388_v60, %v258_v56 }
  0xa5   :  { %500 = vst [vmem:[#allocation2 + $0x2f1] sm:$0xff] %v435_v3  ;;  %v1151_v3 = vld [vmem:[#allocation8 + $0x100] sm:$0xff] }
  0xa6   :  { %469 = vst [vmem:[#allocation2 + $0x151] sm:$0xff] %v404_v7  ;;  %v4468_v9 = vmax.f32 %v326_v35, 0.0  ;;  %v358_v7 = vadd.f32 %v4388_v60, %v290_v40  ;;  %1182 = vmatpush.msrb.mxu2 %v1151_v3 }
  0xa7   :  { %485 = vst [vmem:[#allocation2 + $0x241] sm:$0xff] %v420_v53  ;;  %813 = vmatmul.f32.gmra.mxu2 %v419_v41  ;;  %v1448_v47 = vld [vmem:[#allocation2 + $0x68] sm:$0xff] }
  0xa8   :  { %452 = vst [vmem:[#allocation2 + $0x81] sm:$0xff] %v4368_v45  ;;  %v422_v32 = vmax.f32 %v358_v7, 0.0 }
  0xa9   :  { %501 = vst [vmem:[#allocation2 + $0x301] sm:$0xff] %v436_v58  ;;  %726 = vmatmul.f32.gmra.mxu0 %v4468_v9  ;;  %777 = vmatmul.f32.gmra.mxu1 %v407_v12  ;;  %v259_v58 = vmul.f32 %v4374_v8, %v191_v36  ;;  %v1860_v8 = vld [vmem:[#allocation8 + $0x200] sm:$0xff]  ;;  %v2582_v36 = vld [vmem:[#allocation8 + $0x368] sm:$0xff] }
  0xaa   :  { %470 = vst [vmem:[#allocation2 + $0x159] sm:$0xff] %v405_v0  ;;  %873 = vmatmul.f32.gmra.mxu3 %v439_v25  ;;  %v2584_v0 = vld [vmem:[#allocation8 + $0x378] sm:$0xff]  ;;  %1891 = vmatpush.msrb.mxu0 %v1860_v8 }
  0xab   :  { %486 = vst [vmem:[#allocation2 + $0x249] sm:$0xff] %v421_v22  ;;  %v327_v31 = vadd.f32 %v4388_v60, %v259_v58  ;;  %2585 = vmatpush.msra.mxu2 %v2584_v0  ;;  %v4493_v60 = vld [vmem:[#allocation2] sm:$0xff]  ;;  %v2936_v58 = vld [vmem:[#allocation8 + $0x3e8] sm:$0xff]  ;;  %v1449_v0 = vld [vmem:[#allocation2 + $0x78] sm:$0xff] }
  0xac   :  { %453 = vst [vmem:[#allocation2 + $0x91] sm:$0xff] %v4408_v29  ;;  %3293 = vmatpush.msra.mxu0 %v3292_v30  ;;  %2941 = vmatpush.msra.mxu3 %v2936_v58  ;;  %v1091_v8 = vld [vmem:[#allocation2 + $0x3a] sm:$0xff] }
  0xad   :  { %502 = vst [vmem:[#allocation2 + $0x309] sm:$0xff] %v437_v43  ;;  %v4487_v28 = vmax.f32 %v327_v31, 0.0  ;;  %v4489_v43 = vpop.f32.mrf.mxu1  ;;  %v4497_v42 = vpop.f32.mrf.mxu0  ;;  %2586 = vmatpush.msra.mxu2 %v2583_v49 }
  0xae   :  { %471 = vst [vmem:[#allocation2 + $0x169] sm:$0xff] %v406_v17  ;;  %3294 = vmatpush.msra.mxu0 %v3291_v61 }
  0xaf   :  { %487 = vst [vmem:[#allocation2 + $0x259] sm:$0xff] %v422_v32  ;;  %816 = vmatmul.f32.gmra.mxu2 %v420_v53 }
  0xb0   :  { %454 = vst [vmem:[#allocation2 + $0x99] sm:$0xff] %v4440_v34  ;;  %2587 = vmatpush.msra.mxu2 %v2582_v36  ;;  %3295 = vmatpush.msra.mxu0 %v3290_v15 }
  0xb1   :  { %503 = vst [vmem:[#allocation2 + $0x319] sm:$0xff] %v438_v27  ;;  %729 = vmatmul.f32.gmra.mxu0 %v4487_v28  ;;  %893 = vmatmul.f32.vlgmr.msrb.gmra.mxu1 %v4493_v60 }
  0xb2   :  { %472 = vst [vmem:[#allocation2 + $0x171] sm:$0xff] %v407_v12  ;;  %1538 = vmatmul.f32.vlgmr.msrb.gmra.mxu3 %v1441_v63  ;;  %v4499_v2 = vpop.f32.mrf.mxu3 }
  0xb3   :  { %488 = vst [vmem:[#allocation2 + $0x261] sm:$0xff] %v423_v62  ;;  %v1451_v19 = vld [vmem:[#allocation2 + $0x90] sm:$0xff] }
  0xb4   :  { %455 = vst [vmem:[#allocation2 + $0xa9] sm:$0xff] %v4468_v9 }
  0xb5   :  { %504 = vst [vmem:[#allocation2 + $0x321] sm:$0xff] %v439_v25  ;;  %v4501_v4 = vpop.f32.mrf.mxu1  ;;  %v4505_v17 = vpop.f32.mrf.mxu0  ;;  %v1090_v25 = vld [vmem:[#allocation2 + $0x32] sm:$0xff] }
  0xb6   :  { %456 = vst [vmem:[#allocation2 + $0xb1] sm:$0xff] %v4487_v28 }
  0xb7   :  { %819 = vmatmul.f32.gmra.mxu2 %v421_v22  ;;  %5538 = vst [vmem:[#allocation13_spill] sm:$0xff] %v4499_v2 }
  0xb9   :  { %1892 = vmatmul.f32.vlgmr.msrb.gmra.mxu0 %v4059_v55  ;;  %896 = vmatmul.f32.gmra.mxu1 %v4493_v60 }
  0xba   :  { %1541 = vmatmul.f32.gmra.mxu3 %v1442_v20  ;;  %v4507_v11 = vpop.f32.mrf.mxu3 }
  0xbb   :  { %5539 = vst [vmem:[#allocation14_spill] sm:$0xff] %v4507_v11  ;;  %v1453_v58 = vld [vmem:[#allocation2 + $0xa8] sm:$0xff] }
  0xbd   :  { %v4509_v14 = vpop.f32.mrf.mxu1  ;;  %v4512_v41 = vpop.f32.mrf.mxu0  ;;  %v1101_v2 = vld [vmem:[#allocation2 + $0xb2] sm:$0xff] }
  0xbf   :  { %822 = vmatmul.f32.gmra.mxu2 %v422_v32 }
  0xc1   :  { %1895 = vmatmul.f32.gmra.mxu0 %v4086_v6  ;;  %899 = vmatmul.f32.gmra.mxu1 %v1441_v63 }
  0xc2   :  { %1544 = vmatmul.f32.gmra.mxu3 %v1443_v33  ;;  %v4514_v55 = vpop.f32.mrf.mxu3 }
  0xc3   :  { %5540 = vst [vmem:[#allocation15_spill] sm:$0xff] %v4514_v55 }
  0xc5   :  { %v4516_v44 = vpop.f32.mrf.mxu1  ;;  %v4519_v37 = vpop.f32.mrf.mxu0 }
  0xc7   :  { %825 = vmatmul.f32.gmra.mxu2 %v423_v62 }
  0xc9   :  { %1898 = vmatmul.f32.gmra.mxu0 %v4117_v24  ;;  %902 = vmatmul.f32.gmra.mxu1 %v1442_v20  ;;  %v2228_v24 = vld [vmem:[#allocation8 + $0x2f0] sm:$0xff]  ;;  %v1092_v20 = vld [vmem:[#allocation2 + $0x4a] sm:$0xff] }
  0xca   :  { %1547 = vmatmul.f32.gmra.mxu3 %v1444_v51  ;;  %v4521_v6 = vpop.f32.mrf.mxu3  ;;  %2231 = vmatpush.msra.mxu1 %v2228_v24  ;;  %v1093_v24 = vld [vmem:[#allocation2 + $0x52] sm:$0xff] }
  0xcb   :  { %5541 = vst [vmem:[#allocation16_spill] sm:$0xff] %v4521_v6 }
  0xcd   :  { %v4523_v27 = vpop.f32.mrf.mxu1  ;;  %v4528_v56 = vpop.f32.mrf.mxu0 }
  0xcf   :  { %1183 = vmatmul.f32.vlgmr.msrb.gmra.mxu2 %v1086_v54 }
  0xd1   :  { %1901 = vmatmul.f32.gmra.mxu0 %v4151_v1  ;;  %905 = vmatmul.f32.gmra.mxu1 %v1443_v33  ;;  %v1446_v1 = vld [vmem:[#allocation2 + $0x50] sm:$0xff] }
  0xd2   :  { %v4525_v48 = vpop.f32.mrf.mxu2  ;;  %1550 = vmatmul.f32.gmra.mxu3 %v1445_v10  ;;  %v4530_v53 = vpop.f32.mrf.mxu3 }
  0xd3   :  { %5542 = vst [vmem:[#allocation17_spill] sm:$0xff] %v4530_v53 }
  0xd5   :  { %v4532_v40 = vpop.f32.mrf.mxu1  ;;  %v4537_v35 = vpop.f32.mrf.mxu0 }
  0xd7   :  { %1186 = vmatmul.f32.gmra.mxu2 %v1087_v13 }
  0xd9   :  { %1904 = vmatmul.f32.gmra.mxu0 %v4185_v50  ;;  %908 = vmatmul.f32.gmra.mxu1 %v1444_v51 }
  0xda   :  { %v4534_v46 = vpop.f32.mrf.mxu2  ;;  %1553 = vmatmul.f32.gmra.mxu3 %v1446_v1  ;;  %v4541_v12 = vpop.f32.mrf.mxu3 }
  0xdb   :  { %5543 = vst [vmem:[#allocation18_spill] sm:$0xff] %v4541_v12  ;;  %v3288_v12 = vld [vmem:[#allocation8 + $0x458] sm:$0xff] }
  0xdd   :  { %v4539_v38 = vpop.f32.mrf.mxu1  ;;  %v4546_v50 = vpop.f32.mrf.mxu0 }
  0xdf   :  { %1189 = vmatmul.f32.gmra.mxu2 %v1088_v26  ;;  %v1094_v26 = vld [vmem:[#allocation2 + $0x62] sm:$0xff] }
  0xe1   :  { %1907 = vmatmul.f32.gmra.mxu0 %v4219_v52  ;;  %911 = vmatmul.f32.gmra.mxu1 %v1445_v10 }
  0xe2   :  { %v4543_v3 = vpop.f32.mrf.mxu2  ;;  %1556 = vmatmul.f32.gmra.mxu3 %v1447_v57  ;;  %v4550_v7 = vpop.f32.mrf.mxu3 }
  0xe3   :  { %5544 = vst [vmem:[#allocation19_spill] sm:$0xff] %v4550_v7  ;;  %v1811_v7 = vld [vmem:[#allocation2 + $0xd9] sm:$0xff] }
  0xe5   :  { %v4548_v22 = vpop.f32.mrf.mxu1  ;;  %v4555_v52 = vpop.f32.mrf.mxu0 }
  0xe7   :  { %1192 = vmatmul.f32.gmra.mxu2 %v1089_v23  ;;  %v2935_v23 = vld [vmem:[#allocation8 + $0x3e0] sm:$0xff] }
  0xe8   :  { %2942 = vmatpush.msra.mxu3 %v2935_v23 }
  0xe9   :  { %1910 = vmatmul.f32.gmra.mxu0 %v4253_v18  ;;  %914 = vmatmul.f32.gmra.mxu1 %v1446_v1  ;;  %v2227_v18 = vld [vmem:[#allocation8 + $0x2e8] sm:$0xff]  ;;  %v1452_v1 = vld [vmem:[#allocation2 + $0x98] sm:$0xff] }
  0xea   :  { %v4552_v16 = vpop.f32.mrf.mxu2  ;;  %1559 = vmatmul.f32.gmra.mxu3 %v1448_v47  ;;  %v4559_v21 = vpop.f32.mrf.mxu3  ;;  %2232 = vmatpush.msra.mxu1 %v2227_v18  ;;  %v1095_v18 = vld [vmem:[#allocation2 + $0x6a] sm:$0xff] }
  0xeb   :  { %5545 = vst [vmem:[#allocation20_spill] sm:$0xff] %v4552_v16  ;;  %v3287_v16 = vld [vmem:[#allocation8 + $0x450] sm:$0xff] }
  0xec   :  { %5546 = vst [vmem:[#allocation21_spill] sm:$0xff] %v4559_v21 }
  0xed   :  { %v4557_v32 = vpop.f32.mrf.mxu1  ;;  %v4564_v62 = vpop.f32.mrf.mxu0 }
  0xef   :  { %1195 = vmatmul.f32.gmra.mxu2 %v1090_v25 }
  0xf1   :  { %1913 = vmatmul.f32.gmra.mxu0 %v4292_v39  ;;  %917 = vmatmul.f32.gmra.mxu1 %v1447_v57  ;;  %v1450_v39 = vld [vmem:[#allocation2 + $0x80] sm:$0xff] }
  0xf2   :  { %v4561_v31 = vpop.f32.mrf.mxu2  ;;  %1562 = vmatmul.f32.gmra.mxu3 %v1449_v0  ;;  %v4568_v63 = vpop.f32.mrf.mxu3  ;;  %v2581_v57 = vld [vmem:[#allocation8 + $0x360] sm:$0xff] }
  0xf3   :  { %5547 = vst [vmem:[#allocation22_spill] sm:$0xff] %v4561_v31  ;;  %2588 = vmatpush.msra.mxu2 %v2581_v57 }
  0xf4   :  { %5548 = vst [vmem:[#allocation23_spill] sm:$0xff] %v4568_v63 }
  0xf5   :  { %v4566_v59 = vpop.f32.mrf.mxu1 }
  0xf7   :  { %1198 = vmatmul.f32.gmra.mxu2 %v1091_v8  ;;  %v3289_v8 = vld [vmem:[#allocation8 + $0x460] sm:$0xff] }
  0xf8   :  { %3296 = vmatpush.msra.mxu0 %v3289_v8 }
  0xf9   :  { %1916 = vmatmul.f32.gmra.mxu0 %v4332_v5  ;;  %920 = vmatmul.f32.gmra.mxu1 %v1448_v47 }
  0xfa   :  { %v4570_v30 = vpop.f32.mrf.mxu2  ;;  %1565 = vmatmul.f32.gmra.mxu3 %v1450_v39  ;;  %v4577_v54 = vpop.f32.mrf.mxu3  ;;  %3297 = vmatpush.msra.mxu0 %v3288_v12 }
  0xfb   :  { %5549 = vst [vmem:[#allocation24_spill] sm:$0xff] %v4570_v30 }
  0xfc   :  { %5550 = vst [vmem:[#allocation25_spill] sm:$0xff] %v4577_v54  ;;  %v2934_v54 = vld [vmem:[#allocation8 + $0x3d8] sm:$0xff]  ;;  %3298 = vmatpush.msra.mxu0 %v3287_v16 }
  0xfd   :  { %v4575_v51 = vpop.f32.mrf.mxu1  ;;  %2943 = vmatpush.msra.mxu3 %v2934_v54  ;;  %v1458_v54 = vld [vmem:[#allocation2 + $0xe0] sm:$0xff] }
  0xfe   :  { %v4573_v33 = vpop.f32.mrf.mxu0 }
  0xff   :  { %1201 = vmatmul.f32.gmra.mxu2 %v1092_v20 }
 0x101   :  { %1919 = vmatmul.f32.gmra.mxu0 %v4368_v45  ;;  %923 = vmatmul.f32.gmra.mxu1 %v1449_v0 }
 0x102   :  { %v4579_v49 = vpop.f32.mrf.mxu2  ;;  %1568 = vmatmul.f32.gmra.mxu3 %v1451_v19 }
 0x103   :  { %5551 = vst [vmem:[#allocation26_spill] sm:$0xff] %v4579_v49  ;;  %v1103_v49 = vld [vmem:[#allocation2 + $0xca] sm:$0xff] }
 0x104   :  { %v4586_v13 = vpop.f32.mrf.mxu3 }
 0x105   :  { %v4584_v10 = vpop.f32.mrf.mxu1  ;;  %5552 = vst [vmem:[#allocation27_spill] sm:$0xff] %v4586_v13  ;;  %v1810_v13 = vld [vmem:[#allocation2 + $0xc9] sm:$0xff] }
 0x106   :  { %v4582_v5 = vpop.f32.mrf.mxu0 }
 0x107   :  { %1204 = vmatmul.f32.gmra.mxu2 %v1093_v24 }
 0x109   :  { %1922 = vmatmul.f32.gmra.mxu0 %v4408_v29  ;;  %926 = vmatmul.f32.gmra.mxu1 %v1450_v39  ;;  %v2226_v29 = vld [vmem:[#allocation8 + $0x2e0] sm:$0xff] }
 0x10a   :  { %v4588_v61 = vpop.f32.mrf.mxu2  ;;  %1571 = vmatmul.f32.gmra.mxu3 %v1452_v1  ;;  %2233 = vmatpush.msra.mxu1 %v2226_v29  ;;  %v1455_v29 = vld [vmem:[#allocation2 + $0xc0] sm:$0xff] }
 0x10b   :  { %5553 = vst [vmem:[#allocation28_spill] sm:$0xff] %v4588_v61 }
 0x10c   :  { %v4595_v25 = vpop.f32.mrf.mxu3 }
 0x10d   :  { %v4593_v47 = vpop.f32.mrf.mxu1  ;;  %5554 = vst [vmem:[#allocation29_spill] sm:$0xff] %v4595_v25  ;;  %v1098_v25 = vld [vmem:[#allocation2 + $0x92] sm:$0xff] }
 0x10e   :  { %v4591_v45 = vpop.f32.mrf.mxu0 }
 0x10f   :  { %1207 = vmatmul.f32.gmra.mxu2 %v1094_v26 }
 0x111   :  { %1925 = vmatmul.f32.gmra.mxu0 %v4440_v34  ;;  %929 = vmatmul.f32.gmra.mxu1 %v1451_v19  ;;  %v1454_v34 = vld [vmem:[#allocation2 + $0xb0] sm:$0xff]  ;;  %v1096_v19 = vld [vmem:[#allocation2 + $0x7a] sm:$0xff] }
 0x112   :  { %v4597_v36 = vpop.f32.mrf.mxu2  ;;  %1574 = vmatmul.f32.gmra.mxu3 %v1453_v58 }
 0x113   :  { %5555 = vst [vmem:[#allocation30_spill] sm:$0xff] %v4597_v36 }
 0x115   :  { %v4604_v39 = vpop.f32.mrf.mxu3 }
 0x116   :  { %v4600_v0 = vpop.f32.mrf.mxu0  ;;  %v4602_v15 = vpop.f32.mrf.mxu1  ;;  %5556 = vst [vmem:[#allocation31_spill] sm:$0xff] %v4604_v39 }
 0x117   :  { %1210 = vmatmul.f32.gmra.mxu2 %v1095_v18  ;;  %v1097_v18 = vld [vmem:[#allocation2 + $0x82] sm:$0xff] }
 0x119   :  { %1928 = vmatmul.f32.gmra.mxu0 %v4468_v9  ;;  %932 = vmatmul.f32.gmra.mxu1 %v1452_v1  ;;  %v1809_v1 = vld [vmem:[#allocation2 + $0xc1] sm:$0xff] }
 0x11a   :  { %v4606_v20 = vpop.f32.mrf.mxu2  ;;  %1577 = vmatmul.f32.gmra.mxu3 %v1454_v34 }
 0x11b   :  { %5557 = vst [vmem:[#allocation32_spill] sm:$0xff] %v4606_v20 }
 0x11d   :  { %v4613_v57 = vpop.f32.mrf.mxu3 }
 0x11e   :  { %v4609_v24 = vpop.f32.mrf.mxu0  ;;  %v4611_v26 = vpop.f32.mrf.mxu1  ;;  %5558 = vst [vmem:[#allocation33_spill] sm:$0xff] %v4613_v57  ;;  %v1456_v57 = vld [vmem:[#allocation2 + $0xc8] sm:$0xff] }
 0x11f   :  { %1213 = vmatmul.f32.gmra.mxu2 %v1096_v19 }
 0x121   :  { %1931 = vmatmul.f32.gmra.mxu0 %v4487_v28  ;;  %935 = vmatmul.f32.gmra.mxu1 %v1453_v58  ;;  %v2580_v58 = vld [vmem:[#allocation8 + $0x358] sm:$0xff] }
 0x122   :  { %v4615_v23 = vpop.f32.mrf.mxu2  ;;  %1580 = vmatmul.f32.gmra.mxu3 %v1455_v29  ;;  %2589 = vmatpush.msra.mxu2 %v2580_v58 }
 0x123   :  { %5559 = vst [vmem:[#allocation34_spill] sm:$0xff] %v4615_v23 }
 0x125   :  { %v4622_v19 = vpop.f32.mrf.mxu3 }
 0x126   :  { %v4618_v9 = vpop.f32.mrf.mxu0  ;;  %v4620_v8 = vpop.f32.mrf.mxu1  ;;  %5560 = vst [vmem:[#allocation35_spill] sm:$0xff] %v4622_v19  ;;  %v1099_v19 = vld [vmem:[#allocation2 + $0x9a] sm:$0xff] }
 0x127   :  { %1216 = vmatmul.f32.gmra.mxu2 %v1097_v18 }
 0x129   :  { %1934 = vmatmul.f32.gmra.mxu0 %v1809_v1  ;;  %938 = vmatmul.f32.gmra.mxu1 %v1454_v34  ;;  %v1457_v1 = vld [vmem:[#allocation2 + $0xd8] sm:$0xff] }
 0x12a   :  { %v4624_v39 = vpop.f32.mrf.mxu2  ;;  %1583 = vmatmul.f32.gmra.mxu3 %v1456_v57  ;;  %v2225_v34 = vld [vmem:[#allocation8 + $0x2d8] sm:$0xff] }
 0x12b   :  { %5561 = vst [vmem:[#allocation36_spill] sm:$0xff] %v4624_v39  ;;  %2234 = vmatpush.msra.mxu1 %v2225_v34  ;;  %v1102_v39 = vld [vmem:[#allocation2 + $0xc2] sm:$0xff] }
 0x12d   :  { %v4628_v63 = vpop.f32.mrf.mxu3 }
 0x12e   :  { %v4626_v28 = vpop.f32.mrf.mxu0  ;;  %v894_v18 = vpop.f32.mrf.mxu1  ;;  %5562 = vst [vmem:[#allocation37_spill] sm:$0xff] %v4628_v63  ;;  %v1100_v63 = vld [vmem:[#allocation2 + $0xaa] sm:$0xff] }
 0x12f   :  { %1219 = vmatmul.f32.gmra.mxu2 %v1098_v25  ;;  %v895_v20 = vadd.f32 %v894_v18, %v4497_v42 }
 0x131   :  { %1937 = vmatmul.f32.gmra.mxu0 %v1810_v13  ;;  %941 = vmatmul.f32.gmra.mxu1 %v1455_v29  ;;  %v1812_v29 = vld [vmem:[#allocation2 + $0xe1] sm:$0xff] }
 0x132   :  { %v4630_v21 = vpop.f32.mrf.mxu2  ;;  %1586 = vmatmul.f32.gmra.mxu3 %v1457_v1 }
 0x133   :  { %5563 = vst [vmem:[#allocation38_spill] sm:$0xff] %v4630_v21 }
 0x135   :  { %v1539_v58 = vpop.f32.mrf.mxu3 }
 0x136   :  { %v1893_v25 = vpop.f32.mrf.mxu0  ;;  %v897_v53 = vpop.f32.mrf.mxu1 }
 0x137   :  { %1222 = vmatmul.f32.gmra.mxu2 %v1099_v19  ;;  %v1459_v19 = vld [vmem:[#allocation2 + $0xf0] sm:$0xff]  ;;  %v898_v18 = vadd.f32 %v897_v53, %v4505_v17 }
 0x139   :  { %1940 = vmatmul.f32.gmra.mxu0 %v1811_v7  ;;  %944 = vmatmul.f32.gmra.mxu1 %v1456_v57 }
 0x13a   :  { %v4632_v6 = vpop.f32.mrf.mxu2  ;;  %1589 = vmatmul.f32.gmra.mxu3 %v1458_v54 }
 0x13b   :  { %5564 = vst [vmem:[#allocation39_spill] sm:$0xff] %v4632_v6  ;;  %v1813_v6 = vld [vmem:[#allocation2 + $0xf1] sm:$0xff] }
 0x13d   :  { %v1542_v34 = vpop.f32.mrf.mxu3 }
 0x13e   :  { %v1896_v13 = vpop.f32.mrf.mxu0  ;;  %v900_v55 = vpop.f32.mrf.mxu1 }
 0x13f   :  { %1225 = vmatmul.f32.gmra.mxu2 %v1100_v63  ;;  %v1460_v63 = vld [vmem:[#allocation2 + $0xf8] sm:$0xff]  ;;  %v901_v16 = vadd.f32 %v900_v55, %v4512_v41 }
 0x141   :  { %1943 = vmatmul.f32.gmra.mxu0 %v1812_v29  ;;  %947 = vmatmul.f32.gmra.mxu1 %v1457_v1  ;;  %v2579_v1 = vld [vmem:[#allocation8 + $0x350] sm:$0xff] }
 0x142   :  { %v4634_v11 = vpop.f32.mrf.mxu2  ;;  %1592 = vmatmul.f32.gmra.mxu3 %v1459_v19  ;;  %v1814_v29 = vld [vmem:[#allocation2 + $0xf9] sm:$0xff]  ;;  %2590 = vmatpush.msra.mxu2 %v2579_v1  ;;  %v1815_v1 = vld [vmem:[#allocation2 + $0x109] sm:$0xff] }
 0x143   :  { %5565 = vst [vmem:[#allocation40_spill] sm:$0xff] %v4634_v11 }
 0x145   :  { %v1545_v57 = vpop.f32.mrf.mxu3 }
 0x146   :  { %v1899_v12 = vpop.f32.mrf.mxu0  ;;  %v4636_v7 = vpop.f32.mrf.mxu1 }
 0x147   :  { %1228 = vmatmul.f32.gmra.mxu2 %v1101_v2  ;;  %v2933_v2 = vld [vmem:[#allocation8 + $0x3d0] sm:$0xff]  ;;  %v904_v41 = vadd.f32 %v4636_v7, %v4519_v37  ;;  %v2932_v37 = vld [vmem:[#allocation8 + $0x3c8] sm:$0xff] }
 0x148   :  { %2944 = vmatpush.msra.mxu3 %v2933_v2  ;;  %v1816_v2 = vld [vmem:[#allocation2 + $0x111] sm:$0xff] }
 0x149   :  { %1946 = vmatmul.f32.gmra.mxu0 %v1813_v6  ;;  %950 = vmatmul.f32.gmra.mxu1 %v1458_v54  ;;  %v1461_v54 = vld [vmem:[#allocation2 + $0x108] sm:$0xff] }
 0x14a   :  { %v4638_v21 = vpop.f32.mrf.mxu2  ;;  %1595 = vmatmul.f32.gmra.mxu3 %v1460_v63 }
 0x14b   :  { %5566 = vst [vmem:[#allocation41_spill] sm:$0xff] %v4638_v21  ;;  %v2224_v21 = vld [vmem:[#allocation8 + $0x2d0] sm:$0xff]  ;;  %2945 = vmatpush.msra.mxu3 %v2932_v37 }
 0x14c   :  { %2235 = vmatpush.msra.mxu1 %v2224_v21  ;;  %v1462_v21 = vld [vmem:[#allocation2 + $0x110] sm:$0xff] }
 0x14d   :  { %v1548_v36 = vpop.f32.mrf.mxu3 }
 0x14e   :  { %v4640_v11 = vpop.f32.mrf.mxu0  ;;  %v4642_v23 = vpop.f32.mrf.mxu1 }
 0x14f   :  { %1231 = vmatmul.f32.gmra.mxu2 %v1102_v39  ;;  %v907_v7 = vadd.f32 %v4642_v23, %v4528_v56  ;;  %v3286_v56 = vld [vmem:[#allocation8 + $0x448] sm:$0xff] }
 0x150   :  { %3299 = vmatpush.msra.mxu0 %v3286_v56 }
 0x151   :  { %1949 = vmatmul.f32.gmra.mxu0 %v1814_v29  ;;  %953 = vmatmul.f32.gmra.mxu1 %v1459_v19 }
 0x152   :  { %v1184_v61 = vpop.f32.mrf.mxu2  ;;  %1598 = vmatmul.f32.gmra.mxu3 %v1461_v54 }
 0x153   :  { %v1376_v6 = vadd.f32 %v1184_v61, %v895_v20 }
 0x155   :  { %v1731_v39 = vadd.f32 %v1539_v58, %v1376_v6  ;;  %v1551_v61 = vpop.f32.mrf.mxu3  ;;  %v1104_v58 = vld [vmem:[#allocation2 + $0xda] sm:$0xff] }
 0x156   :  { %v4647_v31 = vpop.f32.mrf.mxu0  ;;  %v4649_v42 = vpop.f32.mrf.mxu1 }
 0x157   :  { %v4645_v30 = vadd.f32 %v1893_v25, %v1731_v39  ;;  %1234 = vmatmul.f32.gmra.mxu2 %v1103_v49 }
 0x159   :  { %1952 = vmatmul.f32.gmra.mxu0 %v1815_v1  ;;  %956 = vmatmul.f32.gmra.mxu1 %v1460_v63  ;;  %v1463_v63 = vld [vmem:[#allocation2 + $0x120] sm:$0xff] }
 0x15a   :  { %v1187_v20 = vpop.f32.mrf.mxu2  ;;  %1601 = vmatmul.f32.gmra.mxu3 %v1462_v21  ;;  %v1105_v1 = vld [vmem:[#allocation2 + $0xe2] sm:$0xff] }
 0x15b   :  { %v1377_v19 = vadd.f32 %v1187_v20, %v898_v18  ;;  %v1817_v20 = vld [vmem:[#allocation2 + $0x121] sm:$0xff] }
 0x15d   :  { %v1732_v29 = vadd.f32 %v1542_v34, %v1377_v19  ;;  %v1554_v17 = vpop.f32.mrf.mxu3 }
 0x15e   :  { %v4654_v49 = vpop.f32.mrf.mxu0  ;;  %v4656_v6 = vpop.f32.mrf.mxu1 }
 0x15f   :  { %v4652_v25 = vadd.f32 %v1896_v13, %v1732_v29  ;;  %1237 = vmatmul.f32.gmra.mxu2 %v1104_v58 }
 0x161   :  { %1955 = vmatmul.f32.gmra.mxu0 %v1816_v2  ;;  %959 = vmatmul.f32.gmra.mxu1 %v1461_v54  ;;  %v1464_v54 = vld [vmem:[#allocation2 + $0x128] sm:$0xff]  ;;  %v1106_v2 = vld [vmem:[#allocation2 + $0xf2] sm:$0xff] }
 0x162   :  { %v1190_v53 = vpop.f32.mrf.mxu2  ;;  %1604 = vmatmul.f32.gmra.mxu3 %v1463_v63 }
 0x163   :  { %v1378_v39 = vadd.f32 %v1190_v53, %v901_v16  ;;  %v2578_v53 = vld [vmem:[#allocation8 + $0x348] sm:$0xff] }
 0x164   :  { %2591 = vmatpush.msra.mxu2 %v2578_v53 }
 0x165   :  { %v1733_v18 = vadd.f32 %v1545_v57, %v1378_v39  ;;  %v1557_v55 = vpop.f32.mrf.mxu3  ;;  %v1818_v39 = vld [vmem:[#allocation2 + $0x129] sm:$0xff] }
 0x166   :  { %v4661_v13 = vpop.f32.mrf.mxu0  ;;  %v4663_v19 = vpop.f32.mrf.mxu1 }
 0x167   :  { %v4659_v34 = vadd.f32 %v1899_v12, %v1733_v18  ;;  %1240 = vmatmul.f32.gmra.mxu2 %v1105_v1 }
 0x169   :  { %1958 = vmatmul.f32.gmra.mxu0 %v1817_v20  ;;  %962 = vmatmul.f32.gmra.mxu1 %v1462_v21  ;;  %v2223_v20 = vld [vmem:[#allocation8 + $0x2c8] sm:$0xff] }
 0x16a   :  { %v1193_v58 = vpop.f32.mrf.mxu2  ;;  %1607 = vmatmul.f32.gmra.mxu3 %v1464_v54  ;;  %2236 = vmatpush.msra.mxu1 %v2223_v20  ;;  %v1820_v20 = vld [vmem:[#allocation2 + $0x141] sm:$0xff] }
 0x16b   :  { %v1379_v29 = vadd.f32 %v1193_v58, %v904_v41  ;;  %v1107_v41 = vld [vmem:[#allocation2 + $0xfa] sm:$0xff] }
 0x16d   :  { %v1734_v57 = vadd.f32 %v1548_v36, %v1379_v29  ;;  %v1560_v21 = vpop.f32.mrf.mxu3 }
 0x16e   :  { %v4670_v16 = vpop.f32.mrf.mxu0  ;;  %v4672_v1 = vpop.f32.mrf.mxu1 }
 0x16f   :  { %v4668_v12 = vadd.f32 %v4640_v11, %v1734_v57  ;;  %1243 = vmatmul.f32.gmra.mxu2 %v1106_v2  ;;  %v1465_v11 = vld [vmem:[#allocation2 + $0x138] sm:$0xff] }
 0x170   :  { %v1819_v57 = vld [vmem:[#allocation2 + $0x139] sm:$0xff] }
 0x171   :  { %1961 = vmatmul.f32.gmra.mxu0 %v1818_v39  ;;  %965 = vmatmul.f32.gmra.mxu1 %v1463_v63  ;;  %v910_v63 = vadd.f32 %v4649_v42, %v4537_v35  ;;  %v913_v35 = vadd.f32 %v4656_v6, %v4546_v50  ;;  %v916_v50 = vadd.f32 %v4663_v19, %v4555_v52  ;;  %v2931_v52 = vld [vmem:[#allocation8 + $0x3c0] sm:$0xff] }
 0x172   :  { %v1196_v18 = vpop.f32.mrf.mxu2  ;;  %1610 = vmatmul.f32.gmra.mxu3 %v1465_v11  ;;  %v919_v19 = vadd.f32 %v4672_v1, %v4564_v62 }
 0x173   :  { %v1380_v36 = vadd.f32 %v1196_v18, %v907_v7  ;;  %v1108_v7 = vld [vmem:[#allocation2 + $0x10a] sm:$0xff]  ;;  %2946 = vmatpush.msra.mxu3 %v2931_v52  ;;  %v3285_v52 = vld [vmem:[#allocation8 + $0x440] sm:$0xff] }
 0x174   :  { %3300 = vmatpush.msra.mxu0 %v3285_v52 }
 0x175   :  { %v1735_v58 = vadd.f32 %v1551_v61, %v1380_v36  ;;  %v1563_v53 = vpop.f32.mrf.mxu3  ;;  %v1466_v61 = vld [vmem:[#allocation2 + $0x140] sm:$0xff] }
 0x176   :  { %v4679_v2 = vpop.f32.mrf.mxu0  ;;  %v4681_v23 = vpop.f32.mrf.mxu1 }
 0x177   :  { %v4677_v29 = vadd.f32 %v4647_v31, %v1735_v58  ;;  %1246 = vmatmul.f32.gmra.mxu2 %v1107_v41 }
 0x179   :  { %1964 = vmatmul.f32.gmra.mxu0 %v1819_v57  ;;  %968 = vmatmul.f32.gmra.mxu1 %v1464_v54  ;;  %v1109_v57 = vld [vmem:[#allocation2 + $0x112] sm:$0xff] }
 0x17a   :  { %v1199_v39 = vpop.f32.mrf.mxu2  ;;  %1613 = vmatmul.f32.gmra.mxu3 %v1466_v61 }
 0x17b   :  { %v1381_v37 = vadd.f32 %v1199_v39, %v910_v63  ;;  %v1821_v39 = vld [vmem:[#allocation2 + $0x151] sm:$0xff] }
 0x17d   :  { %v1736_v31 = vadd.f32 %v1554_v17, %v1381_v37  ;;  %v4694_v42 = vpop.f32.mrf.mxu3  ;;  %v1467_v17 = vld [vmem:[#allocation2 + $0x150] sm:$0xff] }
 0x17e   :  { %v4688_v36 = vpop.f32.mrf.mxu0  ;;  %v4690_v41 = vpop.f32.mrf.mxu1 }
 0x17f   :  { %v4686_v18 = vadd.f32 %v4654_v49, %v1736_v31  ;;  %1249 = vmatmul.f32.gmra.mxu2 %v1108_v7  ;;  %v1110_v31 = vld [vmem:[#allocation2 + $0x122] sm:$0xff] }
 0x181   :  { %1967 = vmatmul.f32.gmra.mxu0 %v1820_v20  ;;  %971 = vmatmul.f32.gmra.mxu1 %v1465_v11 }
 0x182   :  { %v1202_v58 = vpop.f32.mrf.mxu2  ;;  %1616 = vmatmul.f32.gmra.mxu3 %v1467_v17 }
 0x183   :  { %v1382_v54 = vadd.f32 %v1202_v58, %v913_v35  ;;  %v2577_v58 = vld [vmem:[#allocation8 + $0x340] sm:$0xff] }
 0x184   :  { %2592 = vmatpush.msra.mxu2 %v2577_v58  ;;  %v3780_v58 = vld [vmem:[%s5524_s2] ss:$0 sm:$0xff] }
 0x185   :  { %v1737_v56 = vadd.f32 %v1557_v55, %v1382_v54  ;;  %v4705_v6 = vpop.f32.mrf.mxu3  ;;  %v1468_v55 = vld [vmem:[#allocation2 + $0x158] sm:$0xff] }
 0x186   :  { %v4699_v63 = vpop.f32.mrf.mxu0  ;;  %v4701_v37 = vpop.f32.mrf.mxu1  ;;  %v1822_v54 = vld [vmem:[#allocation2 + $0x159] sm:$0xff] }
 0x187   :  { %v4697_v49 = vadd.f32 %v4661_v13, %v1737_v56  ;;  %1252 = vmatmul.f32.gmra.mxu2 %v1109_v57  ;;  %v208_v56 = vld [vmem:[#allocation3 + $0xf0] sm:$0xff] }
 0x189   :  { %5567 = vst [vmem:[#allocation42_spill] sm:$0xff] %v4697_v49  ;;  %1970 = vmatmul.f32.gmra.mxu0 %v1821_v39  ;;  %974 = vmatmul.f32.gmra.mxu1 %v1466_v61  ;;  %v1469_v39 = vld [vmem:[#allocation2 + $0x168] sm:$0xff] }
 0x18a   :  { %v1205_v7 = vpop.f32.mrf.mxu2  ;;  %1619 = vmatmul.f32.gmra.mxu3 %v1468_v55 }
 0x18b   :  { %v1383_v11 = vadd.f32 %v1205_v7, %v916_v50  ;;  %v2222_v50 = vld [vmem:[#allocation8 + $0x2c0] sm:$0xff]  ;;  %v3779_v7 = vld [vmem:[#allocation6] ss:$0 sm:$0xff] }
 0x18c   :  { %2237 = vmatpush.msra.mxu1 %v2222_v50  ;;  %v209_v50 = vld [vmem:[#allocation3 + $0xf8] sm:$0xff] }
 0x18d   :  { %v1738_v20 = vadd.f32 %v1560_v21, %v1383_v11  ;;  %v4716_v61 = vpop.f32.mrf.mxu3  ;;  %v276_v11 = vmul.f32 %v3779_v7, %v208_v56 }
 0x18e   :  { %v4710_v35 = vpop.f32.mrf.mxu0  ;;  %v4712_v57 = vpop.f32.mrf.mxu1 }
 0x18f   :  { %v4708_v13 = vadd.f32 %v4670_v16, %v1738_v20  ;;  %1255 = vmatmul.f32.gmra.mxu2 %v1110_v31  ;;  %v1111_v31 = vld [vmem:[#allocation2 + $0x12a] sm:$0xff]  ;;  %v344_v62 = vadd.f32 %v3780_v58, %v276_v11 }
 0x191   :  { %5568 = vst [vmem:[#allocation43_spill] sm:$0xff] %v4708_v13  ;;  %1973 = vmatmul.f32.gmra.mxu0 %v1822_v54  ;;  %977 = vmatmul.f32.gmra.mxu1 %v1467_v17  ;;  %v1823_v17 = vld [vmem:[#allocation2 + $0x169] sm:$0xff] }
 0x192   :  { %v1208_v21 = vpop.f32.mrf.mxu2  ;;  %1622 = vmatmul.f32.gmra.mxu3 %v1469_v39 }
 0x193   :  { %v1384_v16 = vadd.f32 %v1208_v21, %v919_v19  ;;  %v408_v19 = vmax.f32 %v344_v62, 0.0 }
 0x195   :  { %v1739_v20 = vadd.f32 %v1563_v53, %v1384_v16  ;;  %v922_v53 = vadd.f32 %v4681_v23, %v4573_v33  ;;  %v1575_v56 = vpop.f32.mrf.mxu3  ;;  %473 = vst [vmem:[#allocation2 + $0x181] sm:$0xff] %v408_v19  ;;  %v1824_v33 = vld [vmem:[#allocation2 + $0x171] sm:$0xff] }
 0x196   :  { %v4724_v54 = vpop.f32.mrf.mxu0  ;;  %v4726_v21 = vpop.f32.mrf.mxu1 }
 0x197   :  { %v4722_v1 = vadd.f32 %v4679_v2, %v1739_v20  ;;  %1258 = vmatmul.f32.gmra.mxu2 %v1111_v31  ;;  %v1470_v2 = vld [vmem:[#allocation2 + $0x170] sm:$0xff]  ;;  %v277_v31 = vmul.f32 %v3779_v7, %v209_v50  ;;  %v1112_v20 = vld [vmem:[#allocation2 + $0x13a] sm:$0xff] }
 0x199   :  { %5569 = vst [vmem:[#allocation44_spill] sm:$0xff] %v4722_v1  ;;  %1976 = vmatmul.f32.gmra.mxu0 %v1823_v17  ;;  %980 = vmatmul.f32.gmra.mxu1 %v1468_v55  ;;  %v345_v13 = vadd.f32 %v3780_v58, %v277_v31  ;;  %v925_v55 = vadd.f32 %v4690_v41, %v4582_v5  ;;  %v1114_v31 = vld [vmem:[#allocation2 + $0x152] sm:$0xff] }
 0x19a   :  { %v1211_v16 = vpop.f32.mrf.mxu2  ;;  %1625 = vmatmul.f32.gmra.mxu3 %v1470_v2  ;;  %v928_v5 = vadd.f32 %v4701_v37, %v4591_v45  ;;  %v931_v45 = vadd.f32 %v4712_v57, %v4600_v0  ;;  %v3284_v0 = vld [vmem:[#allocation8 + $0x438] sm:$0xff] }
 0x19b   :  { %v1385_v11 = vadd.f32 %v1211_v16, %v922_v53  ;;  %v409_v23 = vmax.f32 %v345_v13, 0.0  ;;  %v1113_v53 = vld [vmem:[#allocation2 + $0x142] sm:$0xff]  ;;  %3301 = vmatpush.msra.mxu0 %v3284_v0 }
 0x19c   :  { %v1471_v58 = vld [vmem:[#allocation2 + $0x180] sm:$0xff] }
 0x19d   :  { %v1740_v1 = vadd.f32 %v4694_v42, %v1385_v11  ;;  %v1578_v17 = vpop.f32.mrf.mxu3  ;;  %474 = vst [vmem:[#allocation2 + $0x189] sm:$0xff] %v409_v23 }
 0x19e   :  { %v4734_v52 = vpop.f32.mrf.mxu0  ;;  %v4736_v49 = vpop.f32.mrf.mxu1 }
 0x19f   :  { %v4732_v62 = vadd.f32 %v4688_v36, %v1740_v1  ;;  %1261 = vmatmul.f32.gmra.mxu2 %v1112_v20 }
 0x1a1   :  { %1979 = vmatmul.f32.gmra.mxu0 %v1824_v33  ;;  %983 = vmatmul.f32.gmra.mxu1 %v1469_v39  ;;  %v2576_v33 = vld [vmem:[#allocation8 + $0x338] sm:$0xff] }
 0x1a2   :  { %v1214_v7 = vpop.f32.mrf.mxu2  ;;  %1628 = vmatmul.f32.gmra.mxu3 %v1471_v58  ;;  %2593 = vmatpush.msra.mxu2 %v2576_v33 }
 0x1a3   :  { %v1386_v42 = vadd.f32 %v1214_v7, %v925_v55  ;;  %v2930_v55 = vld [vmem:[#allocation8 + $0x3b8] sm:$0xff] }
 0x1a4   :  { %v1472_v11 = vld [vmem:[#allocation2 + $0x188] sm:$0xff]  ;;  %2947 = vmatpush.msra.mxu3 %v2930_v55  ;;  %v1828_v55 = vld [vmem:[#allocation2 + $0x1d1] sm:$0xff] }
 0x1a5   :  { %v1741_v36 = vadd.f32 %v4705_v6, %v1386_v42  ;;  %v1581_v41 = vpop.f32.mrf.mxu3  ;;  %v1115_v42 = vld [vmem:[#allocation2 + $0x15a] sm:$0xff] }
 0x1a6   :  { %v4744_v13 = vpop.f32.mrf.mxu0  ;;  %v4746_v16 = vpop.f32.mrf.mxu1 }
 0x1a7   :  { %v4742_v1 = vadd.f32 %v4699_v63, %v1741_v36  ;;  %1264 = vmatmul.f32.gmra.mxu2 %v1113_v53 }
 0x1a9   :  { %1982 = vmatmul.f32.gmra.mxu0 %v408_v19  ;;  %986 = vmatmul.f32.gmra.mxu1 %v1470_v2  ;;  %v2221_v2 = vld [vmem:[#allocation8 + $0x2b8] sm:$0xff] }
 0x1aa   :  { %v1217_v50 = vpop.f32.mrf.mxu2  ;;  %1631 = vmatmul.f32.gmra.mxu3 %v1472_v11  ;;  %2238 = vmatpush.msra.mxu1 %v2221_v2 }
 0x1ab   :  { %v1387_v39 = vadd.f32 %v1217_v50, %v928_v5  ;;  %v1827_v5 = vld [vmem:[#allocation2 + $0x1c9] sm:$0xff] }
 0x1ad   :  { %v1742_v6 = vadd.f32 %v4716_v61, %v1387_v39  ;;  %v1584_v37 = vpop.f32.mrf.mxu3 }
 0x1ae   :  { %v4754_v20 = vpop.f32.mrf.mxu0  ;;  %v4756_v7 = vpop.f32.mrf.mxu1 }
 0x1af   :  { %v4752_v63 = vadd.f32 %v4710_v35, %v1742_v6  ;;  %1267 = vmatmul.f32.gmra.mxu2 %v1114_v31  ;;  %v1473_v35 = vld [vmem:[#allocation2 + $0x1c8] sm:$0xff] }
 0x1b1   :  { %1985 = vmatmul.f32.gmra.mxu0 %v409_v23  ;;  %989 = vmatmul.f32.gmra.mxu1 %v4493_v60  ;;  %v934_v23 = vadd.f32 %v4726_v21, %v4609_v24  ;;  %v937_v24 = vadd.f32 %v4736_v49, %v4618_v9  ;;  %v940_v9 = vadd.f32 %v4746_v16, %v4626_v28  ;;  %v2929_v28 = vld [vmem:[#allocation8 + $0x3b0] sm:$0xff] }
 0x1b2   :  { %v1220_v19 = vpop.f32.mrf.mxu2  ;;  %1634 = vmatmul.f32.gmra.mxu3 %v1473_v35  ;;  %v943_v16 = vadd.f32 %v4756_v7, %v4489_v43  ;;  %v3283_v43 = vld [vmem:[#allocation8 + $0x430] sm:$0xff] }
 0x1b3   :  { %v1388_v61 = vadd.f32 %v1220_v19, %v931_v45  ;;  %2948 = vmatpush.msra.mxu3 %v2929_v28  ;;  %3302 = vmatpush.msra.mxu0 %v3283_v43  ;;  %v1832_v28 = vld [vmem:[#allocation2 + $0x201] sm:$0xff] }
 0x1b5   :  { %v1743_v58 = vadd.f32 %v1575_v56, %v1388_v61  ;;  %v1587_v50 = vpop.f32.mrf.mxu3  ;;  %v1474_v56 = vld [vmem:[#allocation2 + $0x1d0] sm:$0xff]  ;;  %v1475_v61 = vld [vmem:[#allocation2 + $0x1e0] sm:$0xff] }
 0x1b6   :  { %v4764_v36 = vpop.f32.mrf.mxu0  ;;  %v4766_v57 = vpop.f32.mrf.mxu1 }
 0x1b7   :  { %v4762_v53 = vadd.f32 %v4724_v54, %v1743_v58  ;;  %1270 = vmatmul.f32.gmra.mxu2 %v1115_v42  ;;  %v1116_v54 = vld [vmem:[#allocation2 + $0x16a] sm:$0xff]  ;;  %v1829_v58 = vld [vmem:[#allocation2 + $0x1e1] sm:$0xff] }
 0x1b9   :  { %1988 = vmatmul.f32.gmra.mxu0 %v1827_v5  ;;  %992 = vmatmul.f32.gmra.mxu1 %v4493_v60 }
 0x1ba   :  { %v1223_v39 = vpop.f32.mrf.mxu2  ;;  %1637 = vmatmul.f32.gmra.mxu3 %v1474_v56 }
 0x1bb   :  { %v1389_v11 = vadd.f32 %v1223_v39, %v934_v23  ;;  %v1476_v23 = vld [vmem:[#allocation2 + $0x1e8] sm:$0xff] }
 0x1bd   :  { %v1744_v31 = vadd.f32 %v1578_v17, %v1389_v11  ;;  %v1590_v21 = vpop.f32.mrf.mxu3  ;;  %v1117_v17 = vld [vmem:[#allocation2 + $0x172] sm:$0xff] }
 0x1be   :  { %v4774_v33 = vpop.f32.mrf.mxu0  ;;  %v4776_v45 = vpop.f32.mrf.mxu1 }
 0x1bf   :  { %v4772_v6 = vadd.f32 %v4734_v52, %v1744_v31  ;;  %1273 = vmatmul.f32.gmra.mxu2 %v1116_v54  ;;  %v2575_v54 = vld [vmem:[#allocation8 + $0x330] sm:$0xff]  ;;  %v1830_v31 = vld [vmem:[#allocation2 + $0x1e9] sm:$0xff] }
 0x1c0   :  { %2594 = vmatpush.msra.mxu2 %v2575_v54 }
 0x1c1   :  { %1991 = vmatmul.f32.gmra.mxu0 %v1828_v55  ;;  %995 = vmatmul.f32.gmra.mxu1 %v1473_v35 }
 0x1c2   :  { %v1226_v19 = vpop.f32.mrf.mxu2  ;;  %1640 = vmatmul.f32.gmra.mxu3 %v1475_v61 }
 0x1c3   :  { %v1390_v60 = vadd.f32 %v1226_v19, %v937_v24  ;;  %v2220_v19 = vld [vmem:[#allocation8 + $0x2b0] sm:$0xff] }
 0x1c4   :  { %2239 = vmatpush.msra.mxu1 %v2220_v19 }
 0x1c5   :  { %v1745_v2 = vadd.f32 %v1581_v41, %v1390_v60  ;;  %v1593_v49 = vpop.f32.mrf.mxu3  ;;  %v1118_v41 = vld [vmem:[#allocation2 + $0x1b2] sm:$0xff]  ;;  %v1119_v60 = vld [vmem:[#allocation2 + $0x1ba] sm:$0xff] }
 0x1c6   :  { %v4783_v42 = vpop.f32.mrf.mxu0  ;;  %v4785_v5 = vpop.f32.mrf.mxu1 }
 0x1c7   :  { %v4781_v52 = vadd.f32 %v4744_v13, %v1745_v2  ;;  %1276 = vmatmul.f32.gmra.mxu2 %v1117_v17 }
 0x1c9   :  { %1994 = vmatmul.f32.gmra.mxu0 %v1829_v58  ;;  %998 = vmatmul.f32.gmra.mxu1 %v1474_v56 }
 0x1ca   :  { %v1229_v0 = vpop.f32.mrf.mxu2  ;;  %1643 = vmatmul.f32.gmra.mxu3 %v1476_v23 }
 0x1cb   :  { %v1391_v35 = vadd.f32 %v1229_v0, %v940_v9  ;;  %v1831_v9 = vld [vmem:[#allocation2 + $0x1f9] sm:$0xff] }
 0x1cd   :  { %v1746_v39 = vadd.f32 %v1584_v37, %v1391_v35  ;;  %v1596_v56 = vpop.f32.mrf.mxu3 }
 0x1ce   :  { %v4792_v11 = vpop.f32.mrf.mxu0  ;;  %v4794_v55 = vpop.f32.mrf.mxu1 }
 0x1cf   :  { %v4790_v13 = vadd.f32 %v4754_v20, %v1746_v39  ;;  %1279 = vmatmul.f32.gmra.mxu2 %v1118_v41  ;;  %v1477_v20 = vld [vmem:[#allocation2 + $0x1f8] sm:$0xff]  ;;  %v1120_v39 = vld [vmem:[#allocation2 + $0x1ca] sm:$0xff] }
 0x1d1   :  { %1997 = vmatmul.f32.gmra.mxu0 %v1830_v31  ;;  %1001 = vmatmul.f32.gmra.mxu1 %v1475_v61  ;;  %v946_v61 = vadd.f32 %v4766_v57, %v4501_v4  ;;  %v949_v4 = vadd.f32 %v4776_v45, %v4509_v14  ;;  %v952_v14 = vadd.f32 %v4785_v5, %v4516_v44  ;;  %v2928_v44 = vld [vmem:[#allocation8 + $0x3a8] sm:$0xff] }
 0x1d2   :  { %v1232_v24 = vpop.f32.mrf.mxu2  ;;  %1646 = vmatmul.f32.gmra.mxu3 %v1477_v20  ;;  %v955_v5 = vadd.f32 %v4794_v55, %v4523_v27  ;;  %v3282_v27 = vld [vmem:[#allocation8 + $0x428] sm:$0xff] }
 0x1d3   :  { %v1392_v37 = vadd.f32 %v1232_v24, %v943_v16  ;;  %2949 = vmatpush.msra.mxu3 %v2928_v44  ;;  %3303 = vmatpush.msra.mxu0 %v3282_v27  ;;  %v1836_v44 = vld [vmem:[#allocation2 + $0x231] sm:$0xff] }
 0x1d5   :  { %v1747_v17 = vadd.f32 %v1587_v50, %v1392_v37  ;;  %v1599_v0 = vpop.f32.mrf.mxu3  ;;  %v1478_v50 = vld [vmem:[#allocation2 + $0x200] sm:$0xff]  ;;  %v1479_v37 = vld [vmem:[#allocation2 + $0x210] sm:$0xff] }
 0x1d6   :  { %v4801_v58 = vpop.f32.mrf.mxu0  ;;  %v4803_v7 = vpop.f32.mrf.mxu1 }
 0x1d7   :  { %v4799_v2 = vadd.f32 %v4764_v36, %v1747_v17  ;;  %1282 = vmatmul.f32.gmra.mxu2 %v1119_v60  ;;  %v1833_v17 = vld [vmem:[#allocation2 + $0x211] sm:$0xff] }
 0x1d9   :  { %2000 = vmatmul.f32.gmra.mxu0 %v1831_v9  ;;  %1004 = vmatmul.f32.gmra.mxu1 %v1476_v23 }
 0x1da   :  { %v1235_v35 = vpop.f32.mrf.mxu2  ;;  %1649 = vmatmul.f32.gmra.mxu3 %v1478_v50 }
 0x1db   :  { %v1393_v41 = vadd.f32 %v1235_v35, %v946_v61  ;;  %v1480_v61 = vld [vmem:[#allocation2 + $0x218] sm:$0xff] }
 0x1dd   :  { %v1748_v36 = vadd.f32 %v1590_v21, %v1393_v41  ;;  %v1602_v57 = vpop.f32.mrf.mxu3  ;;  %v1121_v21 = vld [vmem:[#allocation2 + $0x1d2] sm:$0xff] }
 0x1de   :  { %v4810_v31 = vpop.f32.mrf.mxu0  ;;  %v4812_v16 = vpop.f32.mrf.mxu1 }
 0x1df   :  { %v4808_v54 = vadd.f32 %v4774_v33, %v1748_v36  ;;  %1285 = vmatmul.f32.gmra.mxu2 %v1120_v39  ;;  %v2574_v39 = vld [vmem:[#allocation8 + $0x328] sm:$0xff]  ;;  %v1834_v36 = vld [vmem:[#allocation2 + $0x219] sm:$0xff] }
 0x1e0   :  { %2595 = vmatpush.msra.mxu2 %v2574_v39 }
 0x1e1   :  { %2003 = vmatmul.f32.gmra.mxu0 %v1832_v28  ;;  %1007 = vmatmul.f32.gmra.mxu1 %v1477_v20 }
 0x1e2   :  { %v1238_v24 = vpop.f32.mrf.mxu2  ;;  %1652 = vmatmul.f32.gmra.mxu3 %v1479_v37 }
 0x1e3   :  { %v1394_v23 = vadd.f32 %v1238_v24, %v949_v4  ;;  %v2219_v24 = vld [vmem:[#allocation8 + $0x2a8] sm:$0xff] }
 0x1e4   :  { %2240 = vmatpush.msra.mxu1 %v2219_v24 }
 0x1e5   :  { %v1749_v19 = vadd.f32 %v1593_v49, %v1394_v23  ;;  %v1605_v45 = vpop.f32.mrf.mxu3  ;;  %v1122_v49 = vld [vmem:[#allocation2 + $0x1e2] sm:$0xff]  ;;  %v1123_v23 = vld [vmem:[#allocation2 + $0x1ea] sm:$0xff] }
 0x1e6   :  { %v4819_v60 = vpop.f32.mrf.mxu0  ;;  %v4821_v9 = vpop.f32.mrf.mxu1 }
 0x1e7   :  { %v4817_v33 = vadd.f32 %v4783_v42, %v1749_v19  ;;  %1288 = vmatmul.f32.gmra.mxu2 %v1121_v21 }
 0x1e9   :  { %2006 = vmatmul.f32.gmra.mxu0 %v1833_v17  ;;  %1010 = vmatmul.f32.gmra.mxu1 %v1478_v50 }
 0x1ea   :  { %v1241_v43 = vpop.f32.mrf.mxu2  ;;  %1655 = vmatmul.f32.gmra.mxu3 %v1480_v61 }
 0x1eb   :  { %v1395_v20 = vadd.f32 %v1241_v43, %v952_v14  ;;  %v1835_v14 = vld [vmem:[#allocation2 + $0x229] sm:$0xff] }
 0x1ed   :  { %v1750_v35 = vadd.f32 %v1596_v56, %v1395_v20  ;;  %v1608_v50 = vpop.f32.mrf.mxu3 }
 0x1ee   :  { %v4828_v41 = vpop.f32.mrf.mxu0  ;;  %v4830_v28 = vpop.f32.mrf.mxu1 }
 0x1ef   :  { %v4826_v42 = vadd.f32 %v4792_v11, %v1750_v35  ;;  %1291 = vmatmul.f32.gmra.mxu2 %v1122_v49  ;;  %v1481_v11 = vld [vmem:[#allocation2 + $0x228] sm:$0xff]  ;;  %v1124_v35 = vld [vmem:[#allocation2 + $0x1fa] sm:$0xff] }
 0x1f1   :  { %2009 = vmatmul.f32.gmra.mxu0 %v1834_v36  ;;  %1013 = vmatmul.f32.gmra.mxu1 %v1479_v37  ;;  %v958_v37 = vadd.f32 %v4803_v7, %v4532_v40  ;;  %v961_v40 = vadd.f32 %v4812_v16, %v4539_v38  ;;  %v964_v38 = vadd.f32 %v4821_v9, %v4548_v22  ;;  %v2927_v22 = vld [vmem:[#allocation8 + $0x3a0] sm:$0xff] }
 0x1f2   :  { %v1244_v4 = vpop.f32.mrf.mxu2  ;;  %1658 = vmatmul.f32.gmra.mxu3 %v1481_v11  ;;  %v967_v9 = vadd.f32 %v4830_v28, %v4557_v32  ;;  %v3281_v32 = vld [vmem:[#allocation8 + $0x420] sm:$0xff] }
 0x1f3   :  { %v1396_v56 = vadd.f32 %v1244_v4, %v955_v5  ;;  %2950 = vmatpush.msra.mxu3 %v2927_v22  ;;  %3304 = vmatpush.msra.mxu0 %v3281_v32  ;;  %v1840_v22 = vld [vmem:[#allocation2 + $0x261] sm:$0xff] }
 0x1f5   :  { %v1751_v21 = vadd.f32 %v1599_v0, %v1396_v56  ;;  %v1611_v43 = vpop.f32.mrf.mxu3  ;;  %v1482_v0 = vld [vmem:[#allocation2 + $0x230] sm:$0xff]  ;;  %v1483_v56 = vld [vmem:[#allocation2 + $0x240] sm:$0xff] }
 0x1f6   :  { %v4837_v17 = vpop.f32.mrf.mxu0  ;;  %v4839_v55 = vpop.f32.mrf.mxu1 }
 0x1f7   :  { %v4835_v19 = vadd.f32 %v4801_v58, %v1751_v21  ;;  %1294 = vmatmul.f32.gmra.mxu2 %v1123_v23  ;;  %v1837_v21 = vld [vmem:[#allocation2 + $0x241] sm:$0xff] }
 0x1f9   :  { %2012 = vmatmul.f32.gmra.mxu0 %v1835_v14  ;;  %1016 = vmatmul.f32.gmra.mxu1 %v1480_v61 }
 0x1fa   :  { %v1247_v20 = vpop.f32.mrf.mxu2  ;;  %1661 = vmatmul.f32.gmra.mxu3 %v1482_v0 }
 0x1fb   :  { %v1397_v49 = vadd.f32 %v1247_v20, %v958_v37  ;;  %v1484_v37 = vld [vmem:[#allocation2 + $0x248] sm:$0xff] }
 0x1fd   :  { %v1752_v58 = vadd.f32 %v1602_v57, %v1397_v49  ;;  %v1614_v7 = vpop.f32.mrf.mxu3  ;;  %v1125_v57 = vld [vmem:[#allocation2 + $0x202] sm:$0xff] }
 0x1fe   :  { %v4846_v36 = vpop.f32.mrf.mxu0  ;;  %v4848_v5 = vpop.f32.mrf.mxu1 }
 0x1ff   :  { %v4844_v39 = vadd.f32 %v4810_v31, %v1752_v58  ;;  %1297 = vmatmul.f32.gmra.mxu2 %v1124_v35  ;;  %v2573_v35 = vld [vmem:[#allocation8 + $0x320] sm:$0xff] }
 0x200   :  { %v1838_v58 = vld [vmem:[#allocation2 + $0x249] sm:$0xff]  ;;  %2596 = vmatpush.msra.mxu2 %v2573_v35 }
 0x201   :  { %2015 = vmatmul.f32.gmra.mxu0 %v1836_v44  ;;  %1019 = vmatmul.f32.gmra.mxu1 %v1481_v11 }
 0x202   :  { %v1250_v4 = vpop.f32.mrf.mxu2  ;;  %1664 = vmatmul.f32.gmra.mxu3 %v1483_v56 }
 0x203   :  { %v1398_v61 = vadd.f32 %v1250_v4, %v961_v40  ;;  %v2218_v4 = vld [vmem:[#allocation8 + $0x2a0] sm:$0xff] }
 0x204   :  { %2241 = vmatpush.msra.mxu1 %v2218_v4 }
 0x205   :  { %v1753_v24 = vadd.f32 %v1605_v45, %v1398_v61  ;;  %v1617_v16 = vpop.f32.mrf.mxu3  ;;  %v1126_v45 = vld [vmem:[#allocation2 + $0x212] sm:$0xff]  ;;  %v1127_v61 = vld [vmem:[#allocation2 + $0x21a] sm:$0xff] }
 0x206   :  { %v4855_v23 = vpop.f32.mrf.mxu0  ;;  %v4857_v14 = vpop.f32.mrf.mxu1 }
 0x207   :  { %v4853_v31 = vadd.f32 %v4819_v60, %v1753_v24  ;;  %1300 = vmatmul.f32.gmra.mxu2 %v1125_v57 }
 0x209   :  { %2018 = vmatmul.f32.gmra.mxu0 %v1837_v21  ;;  %1022 = vmatmul.f32.gmra.mxu1 %v1482_v0 }
 0x20a   :  { %v1253_v27 = vpop.f32.mrf.mxu2  ;;  %1667 = vmatmul.f32.gmra.mxu3 %v1484_v37 }
 0x20b   :  { %v1399_v11 = vadd.f32 %v1253_v27, %v964_v38  ;;  %v1839_v38 = vld [vmem:[#allocation2 + $0x259] sm:$0xff] }
 0x20d   :  { %v1754_v20 = vadd.f32 %v1608_v50, %v1399_v11  ;;  %v1620_v0 = vpop.f32.mrf.mxu3 }
 0x20e   :  { %v4864_v49 = vpop.f32.mrf.mxu0  ;;  %v4866_v44 = vpop.f32.mrf.mxu1 }
 0x20f   :  { %v4862_v60 = vadd.f32 %v4828_v41, %v1754_v20  ;;  %1303 = vmatmul.f32.gmra.mxu2 %v1126_v45  ;;  %v1485_v41 = vld [vmem:[#allocation2 + $0x258] sm:$0xff]  ;;  %v1128_v20 = vld [vmem:[#allocation2 + $0x22a] sm:$0xff] }
 0x211   :  { %2021 = vmatmul.f32.gmra.mxu0 %v1838_v58  ;;  %1025 = vmatmul.f32.gmra.mxu1 %v1483_v56  ;;  %v970_v56 = vadd.f32 %v4839_v55, %v4566_v59  ;;  %v973_v59 = vadd.f32 %v4848_v5, %v4575_v51  ;;  %v976_v51 = vadd.f32 %v4857_v14, %v4584_v10  ;;  %v2926_v10 = vld [vmem:[#allocation8 + $0x398] sm:$0xff] }
 0x212   :  { %v1256_v40 = vpop.f32.mrf.mxu2  ;;  %1670 = vmatmul.f32.gmra.mxu3 %v1485_v41  ;;  %v979_v14 = vadd.f32 %v4866_v44, %v4593_v47  ;;  %v3280_v47 = vld [vmem:[#allocation8 + $0x418] sm:$0xff] }
 0x213   :  { %v1400_v50 = vadd.f32 %v1256_v40, %v967_v9  ;;  %2951 = vmatpush.msra.mxu3 %v2926_v10  ;;  %3305 = vmatpush.msra.mxu0 %v3280_v47  ;;  %v1844_v10 = vld [vmem:[#allocation2 + $0x291] sm:$0xff] }
 0x215   :  { %v1755_v57 = vadd.f32 %v1611_v43, %v1400_v50  ;;  %v1623_v27 = vpop.f32.mrf.mxu3  ;;  %v1486_v43 = vld [vmem:[#allocation2 + $0x260] sm:$0xff]  ;;  %v1487_v50 = vld [vmem:[#allocation2 + $0x270] sm:$0xff] }
 0x216   :  { %v4873_v21 = vpop.f32.mrf.mxu0  ;;  %v4875_v28 = vpop.f32.mrf.mxu1 }
 0x217   :  { %v4871_v24 = vadd.f32 %v4837_v17, %v1755_v57  ;;  %1306 = vmatmul.f32.gmra.mxu2 %v1127_v61  ;;  %v1841_v57 = vld [vmem:[#allocation2 + $0x271] sm:$0xff] }
 0x219   :  { %2024 = vmatmul.f32.gmra.mxu0 %v1839_v38  ;;  %1028 = vmatmul.f32.gmra.mxu1 %v1484_v37 }
 0x21a   :  { %v1259_v11 = vpop.f32.mrf.mxu2  ;;  %1673 = vmatmul.f32.gmra.mxu3 %v1486_v43 }
 0x21b   :  { %v1401_v45 = vadd.f32 %v1259_v11, %v970_v56  ;;  %v1488_v56 = vld [vmem:[#allocation2 + $0x278] sm:$0xff] }
 0x21d   :  { %v1756_v17 = vadd.f32 %v1614_v7, %v1401_v45  ;;  %v1626_v55 = vpop.f32.mrf.mxu3  ;;  %v1129_v7 = vld [vmem:[#allocation2 + $0x232] sm:$0xff] }
 0x21e   :  { %v4882_v58 = vpop.f32.mrf.mxu0  ;;  %v4884_v9 = vpop.f32.mrf.mxu1 }
 0x21f   :  { %v4880_v35 = vadd.f32 %v4846_v36, %v1756_v17  ;;  %1309 = vmatmul.f32.gmra.mxu2 %v1128_v20  ;;  %v2572_v20 = vld [vmem:[#allocation8 + $0x318] sm:$0xff] }
 0x220   :  { %v1842_v17 = vld [vmem:[#allocation2 + $0x279] sm:$0xff]  ;;  %2597 = vmatpush.msra.mxu2 %v2572_v20 }
 0x221   :  { %2027 = vmatmul.f32.gmra.mxu0 %v1840_v22  ;;  %1031 = vmatmul.f32.gmra.mxu1 %v1485_v41 }
 0x222   :  { %v1262_v40 = vpop.f32.mrf.mxu2  ;;  %1676 = vmatmul.f32.gmra.mxu3 %v1487_v50 }
 0x223   :  { %v1402_v37 = vadd.f32 %v1262_v40, %v973_v59  ;;  %v2217_v40 = vld [vmem:[#allocation8 + $0x298] sm:$0xff] }
 0x224   :  { %2242 = vmatpush.msra.mxu1 %v2217_v40 }
 0x225   :  { %v1757_v4 = vadd.f32 %v1617_v16, %v1402_v37  ;;  %v1629_v5 = vpop.f32.mrf.mxu3  ;;  %v1130_v16 = vld [vmem:[#allocation2 + $0x242] sm:$0xff]  ;;  %v1131_v37 = vld [vmem:[#allocation2 + $0x24a] sm:$0xff] }
 0x226   :  { %v4891_v61 = vpop.f32.mrf.mxu0  ;;  %v4893_v38 = vpop.f32.mrf.mxu1 }
 0x227   :  { %v4889_v36 = vadd.f32 %v4855_v23, %v1757_v4  ;;  %1312 = vmatmul.f32.gmra.mxu2 %v1129_v7 }
 0x229   :  { %2030 = vmatmul.f32.gmra.mxu0 %v1841_v57  ;;  %1034 = vmatmul.f32.gmra.mxu1 %v1486_v43 }
 0x22a   :  { %v1265_v32 = vpop.f32.mrf.mxu2  ;;  %1679 = vmatmul.f32.gmra.mxu3 %v1488_v56 }
 0x22b   :  { %v1403_v41 = vadd.f32 %v1265_v32, %v976_v51  ;;  %v1843_v51 = vld [vmem:[#allocation2 + $0x289] sm:$0xff] }
 0x22d   :  { %v1758_v11 = vadd.f32 %v1620_v0, %v1403_v41  ;;  %v1632_v43 = vpop.f32.mrf.mxu3 }
 0x22e   :  { %v4900_v45 = vpop.f32.mrf.mxu0  ;;  %v4902_v22 = vpop.f32.mrf.mxu1 }
 0x22f   :  { %v4898_v23 = vadd.f32 %v4864_v49, %v1758_v11  ;;  %1315 = vmatmul.f32.gmra.mxu2 %v1130_v16  ;;  %v1489_v49 = vld [vmem:[#allocation2 + $0x288] sm:$0xff]  ;;  %v1132_v11 = vld [vmem:[#allocation2 + $0x25a] sm:$0xff] }
 0x231   :  { %2033 = vmatmul.f32.gmra.mxu0 %v1842_v17  ;;  %1037 = vmatmul.f32.gmra.mxu1 %v1487_v50  ;;  %v982_v50 = vadd.f32 %v4875_v28, %v4602_v15  ;;  %v985_v15 = vadd.f32 %v4884_v9, %v4611_v26  ;;  %v988_v26 = vadd.f32 %v4893_v38, %v4620_v8  ;;  %v2925_v8 = vld [vmem:[#allocation8 + $0x390] sm:$0xff] }
 0x232   :  { %v1268_v59 = vpop.f32.mrf.mxu2  ;;  %1682 = vmatmul.f32.gmra.mxu3 %v1489_v49  ;;  %v991_v38 = vadd.f32 %v4902_v22, %v4525_v48  ;;  %v3279_v48 = vld [vmem:[#allocation8 + $0x410] sm:$0xff] }
 0x233   :  { %v1404_v0 = vadd.f32 %v1268_v59, %v979_v14  ;;  %2952 = vmatpush.msra.mxu3 %v2925_v8  ;;  %3306 = vmatpush.msra.mxu0 %v3279_v48  ;;  %v1848_v8 = vld [vmem:[#allocation2 + $0x2c1] sm:$0xff] }
 0x234   :  { %v5571_v48 = vld [vmem:[#allocation20_spill] sm:$0xff] }
 0x235   :  { %v1759_v7 = vadd.f32 %v1623_v27, %v1404_v0  ;;  %v1635_v32 = vpop.f32.mrf.mxu3  ;;  %v1490_v27 = vld [vmem:[#allocation2 + $0x290] sm:$0xff]  ;;  %v1491_v0 = vld [vmem:[#allocation2 + $0x2a0] sm:$0xff] }
 0x236   :  { %v4909_v57 = vpop.f32.mrf.mxu0  ;;  %v4911_v44 = vpop.f32.mrf.mxu1 }
 0x237   :  { %v4907_v4 = vadd.f32 %v4873_v21, %v1759_v7  ;;  %1318 = vmatmul.f32.gmra.mxu2 %v1131_v37  ;;  %v1845_v7 = vld [vmem:[#allocation2 + $0x2a1] sm:$0xff] }
 0x239   :  { %2036 = vmatmul.f32.gmra.mxu0 %v1843_v51  ;;  %1040 = vmatmul.f32.gmra.mxu1 %v1488_v56 }
 0x23a   :  { %v1271_v41 = vpop.f32.mrf.mxu2  ;;  %1685 = vmatmul.f32.gmra.mxu3 %v1490_v27 }
 0x23b   :  { %v1405_v16 = vadd.f32 %v1271_v41, %v982_v50  ;;  %v1492_v50 = vld [vmem:[#allocation2 + $0x2a8] sm:$0xff] }
 0x23d   :  { %v1760_v21 = vadd.f32 %v1626_v55, %v1405_v16  ;;  %v1638_v28 = vpop.f32.mrf.mxu3  ;;  %v1133_v55 = vld [vmem:[#allocation2 + $0x262] sm:$0xff] }
 0x23e   :  { %v4918_v17 = vpop.f32.mrf.mxu0  ;;  %v4920_v14 = vpop.f32.mrf.mxu1 }
 0x23f   :  { %v4916_v20 = vadd.f32 %v4882_v58, %v1760_v21  ;;  %1321 = vmatmul.f32.gmra.mxu2 %v1132_v11  ;;  %v2571_v11 = vld [vmem:[#allocation8 + $0x310] sm:$0xff]  ;;  %v1846_v21 = vld [vmem:[#allocation2 + $0x2a9] sm:$0xff] }
 0x240   :  { %2598 = vmatpush.msra.mxu2 %v2571_v11 }
 0x241   :  { %2039 = vmatmul.f32.gmra.mxu0 %v1844_v10  ;;  %1043 = vmatmul.f32.gmra.mxu1 %v1489_v49 }
 0x242   :  { %v1274_v59 = vpop.f32.mrf.mxu2  ;;  %1688 = vmatmul.f32.gmra.mxu3 %v1491_v0 }
 0x243   :  { %v1406_v56 = vadd.f32 %v1274_v59, %v985_v15  ;;  %v2216_v59 = vld [vmem:[#allocation8 + $0x290] sm:$0xff] }
 0x244   :  { %2243 = vmatpush.msra.mxu1 %v2216_v59 }
 0x245   :  { %v1761_v40 = vadd.f32 %v1629_v5, %v1406_v56  ;;  %v1641_v9 = vpop.f32.mrf.mxu3  ;;  %v1134_v5 = vld [vmem:[#allocation2 + $0x272] sm:$0xff]  ;;  %v1135_v56 = vld [vmem:[#allocation2 + $0x27a] sm:$0xff] }
 0x246   :  { %v4927_v37 = vpop.f32.mrf.mxu0  ;;  %v4929_v51 = vpop.f32.mrf.mxu1 }
 0x247   :  { %v4925_v58 = vadd.f32 %v4891_v61, %v1761_v40  ;;  %1324 = vmatmul.f32.gmra.mxu2 %v1133_v55 }
 0x249   :  { %2042 = vmatmul.f32.gmra.mxu0 %v1845_v7  ;;  %1046 = vmatmul.f32.gmra.mxu1 %v1490_v27 }
 0x24a   :  { %v1277_v47 = vpop.f32.mrf.mxu2  ;;  %1691 = vmatmul.f32.gmra.mxu3 %v1492_v50 }
 0x24b   :  { %v1407_v49 = vadd.f32 %v1277_v47, %v988_v26  ;;  %v1847_v26 = vld [vmem:[#allocation2 + $0x2b9] sm:$0xff] }
 0x24d   :  { %v1762_v41 = vadd.f32 %v1632_v43, %v1407_v49  ;;  %v1644_v27 = vpop.f32.mrf.mxu3 }
 0x24e   :  { %v4936_v16 = vpop.f32.mrf.mxu0  ;;  %v4938_v10 = vpop.f32.mrf.mxu1 }
 0x24f   :  { %v4934_v61 = vadd.f32 %v4900_v45, %v1762_v41  ;;  %1327 = vmatmul.f32.gmra.mxu2 %v1134_v5  ;;  %v1493_v45 = vld [vmem:[#allocation2 + $0x2b8] sm:$0xff]  ;;  %v1136_v41 = vld [vmem:[#allocation2 + $0x28a] sm:$0xff] }
 0x251   :  { %2045 = vmatmul.f32.gmra.mxu0 %v1846_v21  ;;  %1049 = vmatmul.f32.gmra.mxu1 %v1491_v0  ;;  %v994_v0 = vadd.f32 %v4911_v44, %v4534_v46  ;;  %v997_v46 = vadd.f32 %v4920_v14, %v4543_v3  ;;  %v1000_v3 = vadd.f32 %v4929_v51, %v5571_v48  ;;  %v2924_v51 = vld [vmem:[#allocation8 + $0x388] sm:$0xff] }
 0x252   :  { %v1280_v15 = vpop.f32.mrf.mxu2  ;;  %1694 = vmatmul.f32.gmra.mxu3 %v1493_v45 }
 0x253   :  { %v1408_v43 = vadd.f32 %v1280_v15, %v991_v38  ;;  %2953 = vmatpush.msra.mxu3 %v2924_v51 }
 0x255   :  { %v1763_v55 = vadd.f32 %v1635_v32, %v1408_v43  ;;  %v1647_v47 = vpop.f32.mrf.mxu3  ;;  %v1494_v32 = vld [vmem:[#allocation2 + $0x2c0] sm:$0xff]  ;;  %v1495_v43 = vld [vmem:[#allocation2 + $0x2d0] sm:$0xff] }
 0x256   :  { %v4945_v7 = vpop.f32.mrf.mxu0  ;;  %v4947_v22 = vpop.f32.mrf.mxu1 }
 0x257   :  { %v4943_v40 = vadd.f32 %v4909_v57, %v1763_v55  ;;  %1330 = vmatmul.f32.gmra.mxu2 %v1135_v56  ;;  %v1849_v55 = vld [vmem:[#allocation2 + $0x2d1] sm:$0xff] }
 0x259   :  { %2048 = vmatmul.f32.gmra.mxu0 %v1847_v26  ;;  %1052 = vmatmul.f32.gmra.mxu1 %v1492_v50 }
 0x25a   :  { %v1283_v49 = vpop.f32.mrf.mxu2  ;;  %1697 = vmatmul.f32.gmra.mxu3 %v1494_v32 }
 0x25b   :  { %v1409_v5 = vadd.f32 %v1283_v49, %v994_v0  ;;  %v1496_v49 = vld [vmem:[#allocation2 + $0x2d8] sm:$0xff] }
 0x25d   :  { %v1764_v57 = vadd.f32 %v1638_v28, %v1409_v5  ;;  %v1650_v44 = vpop.f32.mrf.mxu3  ;;  %v1137_v28 = vld [vmem:[#allocation2 + $0x292] sm:$0xff] }
 0x25e   :  { %v4954_v21 = vpop.f32.mrf.mxu0  ;;  %v4956_v38 = vpop.f32.mrf.mxu1 }
 0x25f   :  { %v4952_v11 = vadd.f32 %v4918_v17, %v1764_v57  ;;  %1333 = vmatmul.f32.gmra.mxu2 %v1136_v41  ;;  %v2570_v57 = vld [vmem:[#allocation8 + $0x308] sm:$0xff] }
 0x260   :  { %2599 = vmatpush.msra.mxu2 %v2570_v57 }
 0x261   :  { %2051 = vmatmul.f32.gmra.mxu0 %v1848_v8  ;;  %1055 = vmatmul.f32.gmra.mxu1 %v1493_v45  ;;  %v1850_v8 = vld [vmem:[#allocation2 + $0x2d9] sm:$0xff] }
 0x262   :  { %v1286_v15 = vpop.f32.mrf.mxu2  ;;  %1700 = vmatmul.f32.gmra.mxu3 %v1495_v43 }
 0x263   :  { %v1410_v50 = vadd.f32 %v1286_v15, %v997_v46  ;;  %v5573_v15 = vld [vmem:[#allocation22_spill] sm:$0xff] }
 0x265   :  { %v1765_v59 = vadd.f32 %v1641_v9, %v1410_v50  ;;  %v1653_v14 = vpop.f32.mrf.mxu3  ;;  %v1138_v9 = vld [vmem:[#allocation2 + $0x2a2] sm:$0xff]  ;;  %v1003_v50 = vadd.f32 %v4938_v10, %v5573_v15  ;;  %v3278_v10 = vld [vmem:[#allocation8 + $0x408] sm:$0xff]  ;;  %v1140_v15 = vld [vmem:[#allocation2 + $0x2ba] sm:$0xff] }
 0x266   :  { %v4963_v56 = vpop.f32.mrf.mxu0  ;;  %v4965_v26 = vpop.f32.mrf.mxu1  ;;  %3307 = vmatpush.msra.mxu0 %v3278_v10  ;;  %v1141_v10 = vld [vmem:[#allocation2 + $0x2c2] sm:$0xff] }
 0x267   :  { %v4961_v17 = vadd.f32 %v4927_v37, %v1765_v59  ;;  %1336 = vmatmul.f32.gmra.mxu2 %v1137_v28  ;;  %v2215_v59 = vld [vmem:[#allocation8 + $0x288] sm:$0xff] }
 0x268   :  { %2244 = vmatpush.msra.mxu1 %v2215_v59 }
 0x269   :  { %5570 = vst [vmem:[#allocation45_spill] sm:$0xff] %v4961_v17  ;;  %2054 = vmatmul.f32.gmra.mxu0 %v1849_v55  ;;  %1058 = vmatmul.f32.gmra.mxu1 %v1494_v32  ;;  %v1139_v55 = vld [vmem:[#allocation2 + $0x2aa] sm:$0xff] }
 0x26a   :  { %v1289_v0 = vpop.f32.mrf.mxu2  ;;  %1703 = vmatmul.f32.gmra.mxu3 %v1496_v49  ;;  %v5584_v17 = vld [vmem:[#allocation34_spill] sm:$0xff] }
 0x26b   :  { %v1411_v45 = vadd.f32 %v1289_v0, %v1000_v3 }
 0x26d   :  { %v1766_v5 = vadd.f32 %v1644_v27, %v1411_v45  ;;  %v1656_v32 = vpop.f32.mrf.mxu3  ;;  %v1851_v45 = vld [vmem:[#allocation2 + $0x2e9] sm:$0xff] }
 0x26e   :  { %v4972_v41 = vpop.f32.mrf.mxu0  ;;  %v4974_v46 = vpop.f32.mrf.mxu1 }
 0x26f   :  { %v4970_v37 = vadd.f32 %v4936_v16, %v1766_v5  ;;  %1339 = vmatmul.f32.gmra.mxu2 %v1138_v9  ;;  %v1497_v16 = vld [vmem:[#allocation2 + $0x2e8] sm:$0xff]  ;;  %v5575_v5 = vld [vmem:[#allocation24_spill] sm:$0xff] }
 0x271   :  { %5572 = vst [vmem:[#allocation20_spill] sm:$0xff] %v4970_v37  ;;  %2057 = vmatmul.f32.gmra.mxu0 %v1850_v8  ;;  %1061 = vmatmul.f32.gmra.mxu1 %v1495_v43  ;;  %v1006_v43 = vadd.f32 %v4947_v22, %v5575_v5 }
 0x272   :  { %v1292_v28 = vpop.f32.mrf.mxu2  ;;  %1706 = vmatmul.f32.gmra.mxu3 %v1497_v16 }
 0x273   :  { %v1412_v27 = vadd.f32 %v1292_v28, %v1003_v50 }
 0x275   :  { %v1767_v48 = vadd.f32 %v1647_v47, %v1412_v27  ;;  %v1659_v57 = vpop.f32.mrf.mxu3  ;;  %v1498_v47 = vld [vmem:[#allocation2 + $0x2f0] sm:$0xff] }
 0x276   :  { %v4981_v0 = vpop.f32.mrf.mxu0  ;;  %v4983_v9 = vpop.f32.mrf.mxu1  ;;  %v1852_v27 = vld [vmem:[#allocation2 + $0x2f1] sm:$0xff] }
 0x277   :  { %v4979_v3 = vadd.f32 %v4945_v7, %v1767_v48  ;;  %1342 = vmatmul.f32.gmra.mxu2 %v1139_v55  ;;  %v5577_v55 = vld [vmem:[#allocation26_spill] sm:$0xff] }
 0x278   :  { %v1009_v22 = vadd.f32 %v4956_v38, %v5577_v55  ;;  %v5579_v38 = vld [vmem:[#allocation28_spill] sm:$0xff]  ;;  %v1142_v55 = vld [vmem:[#allocation2 + $0x2d2] sm:$0xff] }
 0x279   :  { %5574 = vst [vmem:[#allocation22_spill] sm:$0xff] %v4979_v3  ;;  %2060 = vmatmul.f32.gmra.mxu0 %v1851_v45  ;;  %1064 = vmatmul.f32.gmra.mxu1 %v1496_v49 }
 0x27a   :  { %v1295_v8 = vpop.f32.mrf.mxu2  ;;  %1709 = vmatmul.f32.gmra.mxu3 %v1498_v47 }
 0x27b   :  { %v1413_v51 = vadd.f32 %v1295_v8, %v1006_v43  ;;  %v1853_v8 = vld [vmem:[#allocation2 + $0x301] sm:$0xff] }
 0x27d   :  { %v1768_v7 = vadd.f32 %v1650_v44, %v1413_v51  ;;  %v4996_v48 = vpop.f32.mrf.mxu3  ;;  %v1499_v44 = vld [vmem:[#allocation2 + $0x300] sm:$0xff] }
 0x27e   :  { %v4990_v28 = vpop.f32.mrf.mxu0  ;;  %v4992_v59 = vpop.f32.mrf.mxu1 }
 0x27f   :  { %v4988_v50 = vadd.f32 %v4954_v21, %v1768_v7  ;;  %1345 = vmatmul.f32.gmra.mxu2 %v1140_v15  ;;  %v1012_v15 = vadd.f32 %v4965_v26, %v5579_v38  ;;  %v2923_v26 = vld [vmem:[#allocation8 + $0x380] sm:$0xff]  ;;  %v5581_v38 = vld [vmem:[#allocation30_spill] sm:$0xff] }
 0x280   :  { %2954 = vmatpush.msra.mxu3 %v2923_v26 }
 0x281   :  { %5576 = vst [vmem:[#allocation24_spill] sm:$0xff] %v4988_v50  ;;  %2063 = vmatmul.f32.gmra.mxu0 %v1852_v27  ;;  %1067 = vmatmul.f32.gmra.mxu1 %v1497_v16 }
 0x282   :  { %v1298_v45 = vpop.f32.mrf.mxu2  ;;  %1712 = vmatmul.f32.gmra.mxu3 %v1499_v44 }
 0x283   :  { %v1414_v49 = vadd.f32 %v1298_v45, %v1009_v22 }
 0x285   :  { %v1769_v5 = vadd.f32 %v1653_v14, %v1414_v49  ;;  %v5007_v7 = vpop.f32.mrf.mxu3  ;;  %v1500_v14 = vld [vmem:[#allocation2 + $0x308] sm:$0xff] }
 0x286   :  { %v5001_v43 = vpop.f32.mrf.mxu0  ;;  %v5003_v51 = vpop.f32.mrf.mxu1  ;;  %v2569_v49 = vld [vmem:[#allocation8 + $0x300] sm:$0xff] }
 0x287   :  { %v4999_v21 = vadd.f32 %v4963_v56, %v1769_v5  ;;  %1348 = vmatmul.f32.gmra.mxu2 %v1141_v10  ;;  %v1854_v10 = vld [vmem:[#allocation2 + $0x309] sm:$0xff] }
 0x288   :  { %2600 = vmatpush.msra.mxu2 %v2569_v49  ;;  %v3782_v49 = vld [vmem:[%s5524_s2] ss:$0 sm:$0xff] }
 0x289   :  { %5578 = vst [vmem:[#allocation26_spill] sm:$0xff] %v4999_v21  ;;  %2066 = vmatmul.f32.gmra.mxu0 %v1853_v8  ;;  %1070 = vmatmul.f32.gmra.mxu1 %v1498_v47  ;;  %v1015_v8 = vadd.f32 %v4974_v46, %v5581_v38  ;;  %v3277_v38 = vld [vmem:[#allocation8 + $0x400] sm:$0xff] }
 0x28a   :  { %v1301_v27 = vpop.f32.mrf.mxu2  ;;  %1715 = vmatmul.f32.gmra.mxu3 %v1500_v14  ;;  %3308 = vmatpush.msra.mxu0 %v3277_v38 }
 0x28b   :  { %v1415_v16 = vadd.f32 %v1301_v27, %v1012_v15  ;;  %v240_v15 = vld [vmem:[#allocation3 + $0x1f0] sm:$0xff]  ;;  %v1501_v27 = vld [vmem:[#allocation2 + $0x318] sm:$0xff] }
 0x28d   :  { %v1770_v22 = vadd.f32 %v1656_v32, %v1415_v16  ;;  %v5018_v47 = vpop.f32.mrf.mxu3  ;;  %v2214_v16 = vld [vmem:[#allocation8 + $0x280] sm:$0xff] }
 0x28e   :  { %v5012_v45 = vpop.f32.mrf.mxu0  ;;  %v5014_v5 = vpop.f32.mrf.mxu1  ;;  %2245 = vmatpush.msra.mxu1 %v2214_v16 }
 0x28f   :  { %v5010_v56 = vadd.f32 %v4972_v41, %v1770_v22  ;;  %1351 = vmatmul.f32.gmra.mxu2 %v1142_v55  ;;  %v3781_v55 = vld [vmem:[#allocation6] ss:$0 sm:$0xff] }
 0x290   :  { %v308_v22 = vmul.f32 %v3781_v55, %v240_v15  ;;  %v5583_v15 = vld [vmem:[#allocation32_spill] sm:$0xff] }
 0x291   :  { %5580 = vst [vmem:[#allocation28_spill] sm:$0xff] %v5010_v56  ;;  %2069 = vmatmul.f32.gmra.mxu0 %v1854_v10  ;;  %1073 = vmatmul.f32.gmra.mxu1 %v1499_v44  ;;  %v1143_v56 = vld [vmem:[#allocation2 + $0x2da] sm:$0xff] }
 0x292   :  { %v1304_v32 = vpop.f32.mrf.mxu2  ;;  %v376_v46 = vadd.f32 %v3782_v49, %v308_v22  ;;  %1718 = vmatmul.f32.gmra.mxu3 %v1501_v27  ;;  %v1855_v44 = vld [vmem:[#allocation2 + $0x319] sm:$0xff] }
 0x293   :  { %v1416_v41 = vadd.f32 %v1304_v32, %v1015_v8  ;;  %v241_v22 = vld [vmem:[#allocation3 + $0x1f8] sm:$0xff] }
 0x294   :  { %v440_v8 = vmax.f32 %v376_v46, 0.0 }
 0x295   :  { %v1771_v21 = vadd.f32 %v1659_v57, %v1416_v41  ;;  %v1018_v57 = vadd.f32 %v4983_v9, %v5583_v15  ;;  %v1671_v41 = vpop.f32.mrf.mxu3  ;;  %v1856_v9 = vld [vmem:[#allocation2 + $0x321] sm:$0xff] }
 0x296   :  { %v5026_v10 = vpop.f32.mrf.mxu0  ;;  %v5028_v32 = vpop.f32.mrf.mxu1  ;;  %505 = vst [vmem:[#allocation2 + $0x331] sm:$0xff] %v440_v8 }
 0x297   :  { %v5024_v26 = vadd.f32 %v4981_v0, %v1771_v21  ;;  %1354 = vmatmul.f32.gmra.mxu2 %v1143_v56  ;;  %v1502_v0 = vld [vmem:[#allocation2 + $0x320] sm:$0xff]  ;;  %v309_v21 = vmul.f32 %v3781_v55, %v241_v22  ;;  %v1144_v56 = vld [vmem:[#allocation2 + $0x2ea] sm:$0xff] }
 0x299   :  { %5582 = vst [vmem:[#allocation30_spill] sm:$0xff] %v5024_v26  ;;  %2072 = vmatmul.f32.gmra.mxu0 %v1855_v44  ;;  %1076 = vmatmul.f32.gmra.mxu1 %v1500_v14  ;;  %v377_v3 = vadd.f32 %v3782_v49, %v309_v21  ;;  %v1021_v44 = vadd.f32 %v4992_v59, %v5584_v17 }
 0x29a   :  { %v1307_v16 = vpop.f32.mrf.mxu2  ;;  %1721 = vmatmul.f32.gmra.mxu3 %v1502_v0 }
 0x29b   :  { %v1417_v50 = vadd.f32 %v1307_v16, %v1018_v57  ;;  %v441_v15 = vmax.f32 %v377_v3, 0.0  ;;  %v5585_v16 = vld [vmem:[#allocation36_spill] sm:$0xff] }
 0x29c   :  { %v1024_v17 = vadd.f32 %v5003_v51, %v5585_v16 }
 0x29d   :  { %v1772_v26 = vadd.f32 %v4996_v48, %v1417_v50  ;;  %v1674_v57 = vpop.f32.mrf.mxu3  ;;  %506 = vst [vmem:[#allocation2 + $0x339] sm:$0xff] %v441_v15  ;;  %v1503_v50 = vld [vmem:[#allocation2 + $0x330] sm:$0xff] }
 0x29e   :  { %v2028_v38 = vpop.f32.mrf.mxu0  ;;  %v1032_v37 = vpop.f32.mrf.mxu1  ;;  %v1145_v48 = vld [vmem:[#allocation2 + $0x2f2] sm:$0xff] }
 0x29f   :  { %v5034_v46 = vadd.f32 %v4990_v28, %v1772_v26  ;;  %1357 = vmatmul.f32.gmra.mxu2 %v1144_v56  ;;  %v1146_v56 = vld [vmem:[#allocation2 + $0x302] sm:$0xff] }
 0x2a1   :  { %2075 = vmatmul.f32.gmra.mxu0 %v1856_v9  ;;  %1079 = vmatmul.f32.gmra.mxu1 %v1501_v27 }
 0x2a2   :  { %v1310_v14 = vpop.f32.mrf.mxu2  ;;  %1724 = vmatmul.f32.gmra.mxu3 %v1503_v50 }
 0x2a3   :  { %v1418_v55 = vadd.f32 %v1310_v14, %v1021_v44  ;;  %v2149_v14 = vld [vmem:[#allocation2 + $0x1a] sm:$0xff] }
 0x2a4   :  { %v1504_v27 = vld [vmem:[#allocation2 + $0x338] sm:$0xff] }
 0x2a5   :  { %v1773_v49 = vadd.f32 %v5007_v7, %v1418_v55  ;;  %v1677_v59 = vpop.f32.mrf.mxu3  ;;  %v5586_v55 = vld [vmem:[#allocation38_spill] sm:$0xff] }
 0x2a6   :  { %v2031_v3 = vpop.f32.mrf.mxu0  ;;  %v1035_v26 = vpop.f32.mrf.mxu1  ;;  %v1027_v51 = vadd.f32 %v5014_v5, %v5586_v55  ;;  %v1148_v55 = vld [vmem:[#allocation2 + $0x31a] sm:$0xff] }
 0x2a7   :  { %v5040_v28 = vadd.f32 %v5001_v43, %v1773_v49  ;;  %1360 = vmatmul.f32.gmra.mxu2 %v1145_v48  ;;  %v2858_v48 = vld [vmem:[#allocation2 + $0x31] sm:$0xff] }
 0x2a8   :  { %v1147_v49 = vld [vmem:[#allocation2 + $0x30a] sm:$0xff] }
 0x2a9   :  { %2078 = vmatmul.f32.gmra.mxu0 %v440_v8  ;;  %1082 = vmatmul.f32.gmra.mxu1 %v1502_v0 }
 0x2aa   :  { %v1313_v22 = vpop.f32.mrf.mxu2  ;;  %1727 = vmatmul.f32.gmra.mxu3 %v1504_v27  ;;  %v5588_v27 = vld [vmem:[#allocation39_spill] sm:$0xff] }
 0x2ab   :  { %v1419_v21 = vadd.f32 %v1313_v22, %v1024_v17  ;;  %v3212_v17 = vld [vmem:[#allocation2 + $0x32] sm:$0xff]  ;;  %v1030_v5 = vadd.f32 %v5028_v32, %v5588_v27  ;;  %v2860_v27 = vld [vmem:[#allocation2 + $0x49] sm:$0xff] }
 0x2ad   :  { %v1774_v9 = vadd.f32 %v5018_v47, %v1419_v21  ;;  %v1680_v50 = vpop.f32.mrf.mxu3  ;;  %v2150_v21 = vld [vmem:[#allocation2 + $0x22] sm:$0xff] }
 0x2ae   :  { %v2034_v43 = vpop.f32.mrf.mxu0  ;;  %v5048_v44 = vpop.f32.mrf.mxu1 }
 0x2af   :  { %v5046_v7 = vadd.f32 %v5012_v45, %v1774_v9  ;;  %1363 = vmatmul.f32.gmra.mxu2 %v1146_v56 }
 0x2b1   :  { %2081 = vmatmul.f32.gmra.mxu0 %v441_v15  ;;  %2246 = vmatmul.f32.vlgmr.msra.gmra.mxu1 %v2149_v14  ;;  %v2859_v14 = vld [vmem:[#allocation2 + $0x39] sm:$0xff] }
 0x2b2   :  { %v1316_v8 = vpop.f32.mrf.mxu2  ;;  %2955 = vmatmul.f32.vlgmr.msra.gmra.mxu3 %v2858_v48  ;;  %v5590_v48 = vld [vmem:[#allocation40_spill] sm:$0xff] }
 0x2b3   :  { %v1420_v0 = vadd.f32 %v1316_v8, %v1027_v51  ;;  %v3213_v8 = vld [vmem:[#allocation2 + $0x3a] sm:$0xff] }
 0x2b5   :  { %v1775_v47 = vadd.f32 %v1671_v41, %v1420_v0  ;;  %v1683_v56 = vpop.f32.mrf.mxu3 }
 0x2b6   :  { %v2037_v16 = vpop.f32.mrf.mxu0  ;;  %v1041_v22 = vpop.f32.mrf.mxu1 }
 0x2b7   :  { %v5053_v45 = vadd.f32 %v5026_v10, %v1775_v47  ;;  %1366 = vmatmul.f32.gmra.mxu2 %v1147_v49  ;;  %v1033_v49 = vadd.f32 %v1032_v37, %v5590_v48  ;;  %v2861_v48 = vld [vmem:[#allocation2 + $0x51] sm:$0xff] }
 0x2b9   :  { %5587 = vst [vmem:[#allocation32_spill] sm:$0xff] %v5053_v45  ;;  %3309 = vmatmul.f32.vlgmr.msra.gmra.mxu0 %v3212_v17  ;;  %2249 = vmatmul.f32.gmra.mxu1 %v2150_v21 }
 0x2ba   :  { %v1319_v9 = vpop.f32.mrf.mxu2  ;;  %2958 = vmatmul.f32.gmra.mxu3 %v2859_v14  ;;  %v5592_v14 = vld [vmem:[#allocation41_spill] sm:$0xff] }
 0x2bb   :  { %v1421_v15 = vadd.f32 %v1319_v9, %v1030_v5  ;;  %v1149_v5 = vld [vmem:[#allocation2 + $0x322] sm:$0xff] }
 0x2bd   :  { %v1776_v41 = vadd.f32 %v1674_v57, %v1421_v15  ;;  %v1686_v47 = vpop.f32.mrf.mxu3  ;;  %v3214_v57 = vld [vmem:[#allocation2 + $0x4a] sm:$0xff] }
 0x2be   :  { %v2040_v10 = vpop.f32.mrf.mxu0  ;;  %v1044_v0 = vpop.f32.mrf.mxu1 }
 0x2bf   :  { %v5057_v51 = vadd.f32 %v2028_v38, %v1776_v41  ;;  %1369 = vmatmul.f32.gmra.mxu2 %v1148_v55  ;;  %v1036_v55 = vadd.f32 %v1035_v26, %v5592_v14 }
 0x2c1   :  { %5589 = vst [vmem:[#allocation34_spill] sm:$0xff] %v5057_v51  ;;  %3312 = vmatmul.f32.gmra.mxu0 %v3213_v8  ;;  %2252 = vmatmul.f32.gmra.mxu1 %v3212_v17 }
 0x2c2   :  { %v1322_v45 = vpop.f32.mrf.mxu2  ;;  %2961 = vmatmul.f32.gmra.mxu3 %v2860_v27  ;;  %v5594_v27 = vld [vmem:[#allocation13_spill] sm:$0xff] }
 0x2c3   :  { %v1422_v32 = vadd.f32 %v1322_v45, %v1033_v49  ;;  %v2504_v45 = vld [vmem:[#allocation2 + $0x30] sm:$0xff] }
 0x2c5   :  { %v1777_v21 = vadd.f32 %v1677_v59, %v1422_v32  ;;  %v1689_v41 = vpop.f32.mrf.mxu3  ;;  %v3215_v59 = vld [vmem:[#allocation2 + $0x52] sm:$0xff] }
 0x2c6   :  { %v2043_v38 = vpop.f32.mrf.mxu0  ;;  %v1047_v15 = vpop.f32.mrf.mxu1 }
 0x2c7   :  { %v5060_v9 = vadd.f32 %v2031_v3, %v1777_v21  ;;  %1372 = vmatmul.f32.gmra.mxu2 %v1149_v5  ;;  %v1039_v5 = vadd.f32 %v5048_v44, %v5594_v27  ;;  %v2863_v27 = vld [vmem:[#allocation2 + $0x69] sm:$0xff] }
 0x2c9   :  { %5591 = vst [vmem:[#allocation36_spill] sm:$0xff] %v5060_v9  ;;  %3315 = vmatmul.f32.gmra.mxu0 %v3214_v57  ;;  %2255 = vmatmul.f32.gmra.mxu1 %v3213_v8  ;;  %v2505_v8 = vld [vmem:[#allocation2 + $0x38] sm:$0xff] }
 0x2ca   :  { %v1325_v51 = vpop.f32.mrf.mxu2  ;;  %2964 = vmatmul.f32.gmra.mxu3 %v2861_v48 }
 0x2cb   :  { %v1423_v37 = vadd.f32 %v1325_v51, %v1036_v55  ;;  %v2862_v51 = vld [vmem:[#allocation2 + $0x61] sm:$0xff] }
 0x2cd   :  { %v1778_v17 = vadd.f32 %v1680_v50, %v1423_v37  ;;  %v1692_v21 = vpop.f32.mrf.mxu3  ;;  %v3216_v37 = vld [vmem:[#allocation2 + $0x62] sm:$0xff] }
 0x2ce   :  { %v2046_v3 = vpop.f32.mrf.mxu0  ;;  %v1050_v32 = vpop.f32.mrf.mxu1 }
 0x2cf   :  { %v5063_v49 = vadd.f32 %v2034_v43, %v1778_v17  ;;  %2601 = vmatmul.f32.vlgmr.msra.gmra.mxu2 %v2504_v45  ;;  %v5596_v45 = vld [vmem:[#allocation14_spill] sm:$0xff] }
 0x2d0   :  { %v1042_v17 = vadd.f32 %v1041_v22, %v5596_v45  ;;  %v2864_v45 = vld [vmem:[#allocation2 + $0x79] sm:$0xff] }
 0x2d1   :  { %5593 = vst [vmem:[#allocation38_spill] sm:$0xff] %v5063_v49  ;;  %3318 = vmatmul.f32.gmra.mxu0 %v3215_v59  ;;  %2258 = vmatmul.f32.gmra.mxu1 %v3214_v57 }
 0x2d2   :  { %v1328_v26 = vpop.f32.mrf.mxu2  ;;  %2967 = vmatmul.f32.gmra.mxu3 %v2862_v51  ;;  %v5598_v51 = vld [vmem:[#allocation15_spill] sm:$0xff] }
 0x2d3   :  { %v1424_v14 = vadd.f32 %v1328_v26, %v1039_v5  ;;  %v2506_v5 = vld [vmem:[#allocation2 + $0x48] sm:$0xff] }
 0x2d5   :  { %v1779_v55 = vadd.f32 %v1683_v56, %v1424_v14  ;;  %v1695_v49 = vpop.f32.mrf.mxu3  ;;  %v3217_v56 = vld [vmem:[#allocation2 + $0x6a] sm:$0xff] }
 0x2d6   :  { %v2049_v43 = vpop.f32.mrf.mxu0  ;;  %v1053_v48 = vpop.f32.mrf.mxu1 }
 0x2d7   :  { %v5067_v50 = vadd.f32 %v2037_v16, %v1779_v55  ;;  %2604 = vmatmul.f32.gmra.mxu2 %v2505_v8  ;;  %v1045_v8 = vadd.f32 %v1044_v0, %v5598_v51  ;;  %v2865_v51 = vld [vmem:[#allocation2 + $0x81] sm:$0xff] }
 0x2d9   :  { %5595 = vst [vmem:[#allocation39_spill] sm:$0xff] %v5067_v50  ;;  %3321 = vmatmul.f32.gmra.mxu0 %v3216_v37  ;;  %2261 = vmatmul.f32.gmra.mxu1 %v3215_v59 }
 0x2da   :  { %v1331_v9 = vpop.f32.mrf.mxu2  ;;  %2970 = vmatmul.f32.gmra.mxu3 %v2863_v27  ;;  %v5600_v27 = vld [vmem:[#allocation16_spill] sm:$0xff] }
 0x2db   :  { %v1425_v44 = vadd.f32 %v1331_v9, %v1042_v17  ;;  %v2507_v9 = vld [vmem:[#allocation2 + $0x50] sm:$0xff] }
 0x2dd   :  { %v1780_v57 = vadd.f32 %v1686_v47, %v1425_v44  ;;  %v1698_v55 = vpop.f32.mrf.mxu3  ;;  %v3218_v47 = vld [vmem:[#allocation2 + $0x7a] sm:$0xff] }
 0x2de   :  { %v2052_v16 = vpop.f32.mrf.mxu0  ;;  %v1056_v14 = vpop.f32.mrf.mxu1 }
 0x2df   :  { %v5070_v26 = vadd.f32 %v2040_v10, %v1780_v57  ;;  %2607 = vmatmul.f32.gmra.mxu2 %v2506_v5  ;;  %v1048_v5 = vadd.f32 %v1047_v15, %v5600_v27  ;;  %v2866_v27 = vld [vmem:[#allocation2 + $0x91] sm:$0xff] }
 0x2e1   :  { %5597 = vst [vmem:[#allocation40_spill] sm:$0xff] %v5070_v26  ;;  %3324 = vmatmul.f32.gmra.mxu0 %v3217_v56  ;;  %2264 = vmatmul.f32.gmra.mxu1 %v3216_v37 }
 0x2e2   :  { %v1334_v50 = vpop.f32.mrf.mxu2  ;;  %2973 = vmatmul.f32.gmra.mxu3 %v2864_v45  ;;  %v5602_v45 = vld [vmem:[#allocation17_spill] sm:$0xff] }
 0x2e3   :  { %v1426_v22 = vadd.f32 %v1334_v50, %v1045_v8  ;;  %v2508_v50 = vld [vmem:[#allocation2 + $0x60] sm:$0xff] }
 0x2e5   :  { %v1781_v59 = vadd.f32 %v1689_v41, %v1426_v22  ;;  %v1701_v57 = vpop.f32.mrf.mxu3  ;;  %v3219_v41 = vld [vmem:[#allocation2 + $0x82] sm:$0xff] }
 0x2e6   :  { %v2055_v10 = vpop.f32.mrf.mxu0  ;;  %v1059_v44 = vpop.f32.mrf.mxu1 }
 0x2e7   :  { %v5073_v17 = vadd.f32 %v2043_v38, %v1781_v59  ;;  %2610 = vmatmul.f32.gmra.mxu2 %v2507_v9  ;;  %v1051_v9 = vadd.f32 %v1050_v32, %v5602_v45  ;;  %v2867_v45 = vld [vmem:[#allocation2 + $0x99] sm:$0xff] }
 0x2e9   :  { %5599 = vst [vmem:[#allocation41_spill] sm:$0xff] %v5073_v17  ;;  %3327 = vmatmul.f32.gmra.mxu0 %v3218_v47  ;;  %2267 = vmatmul.f32.gmra.mxu1 %v3217_v56 }
 0x2ea   :  { %v1337_v26 = vpop.f32.mrf.mxu2  ;;  %2976 = vmatmul.f32.gmra.mxu3 %v2865_v51  ;;  %v5604_v51 = vld [vmem:[#allocation18_spill] sm:$0xff] }
 0x2eb   :  { %v1427_v0 = vadd.f32 %v1337_v26, %v1048_v5  ;;  %v2509_v26 = vld [vmem:[#allocation2 + $0x68] sm:$0xff] }
 0x2ed   :  { %v1782_v37 = vadd.f32 %v1692_v21, %v1427_v0  ;;  %v1704_v59 = vpop.f32.mrf.mxu3  ;;  %v3220_v21 = vld [vmem:[#allocation2 + $0x92] sm:$0xff] }
 0x2ee   :  { %v2058_v38 = vpop.f32.mrf.mxu0  ;;  %v1062_v22 = vpop.f32.mrf.mxu1 }
 0x2ef   :  { %v5076_v8 = vadd.f32 %v2046_v3, %v1782_v37  ;;  %2613 = vmatmul.f32.gmra.mxu2 %v2508_v50  ;;  %v1054_v50 = vadd.f32 %v1053_v48, %v5604_v51  ;;  %v2868_v51 = vld [vmem:[#allocation2 + $0xa9] sm:$0xff] }
 0x2f1   :  { %5601 = vst [vmem:[#allocation13_spill] sm:$0xff] %v5076_v8  ;;  %3330 = vmatmul.f32.gmra.mxu0 %v3219_v41  ;;  %2270 = vmatmul.f32.gmra.mxu1 %v3218_v47 }
 0x2f2   :  { %v1340_v17 = vpop.f32.mrf.mxu2  ;;  %2979 = vmatmul.f32.gmra.mxu3 %v2866_v27  ;;  %v5606_v27 = vld [vmem:[#allocation19_spill] sm:$0xff] }
 0x2f3   :  { %v1428_v15 = vadd.f32 %v1340_v17, %v1051_v9  ;;  %v2510_v17 = vld [vmem:[#allocation2 + $0x78] sm:$0xff] }
 0x2f5   :  { %v1783_v56 = vadd.f32 %v1695_v49, %v1428_v15  ;;  %v1707_v37 = vpop.f32.mrf.mxu3 }
 0x2f6   :  { %v2061_v3 = vpop.f32.mrf.mxu0  ;;  %v1065_v0 = vpop.f32.mrf.mxu1 }
 0x2f7   :  { %v5079_v5 = vadd.f32 %v2049_v43, %v1783_v56  ;;  %2616 = vmatmul.f32.gmra.mxu2 %v2509_v26  ;;  %v3221_v43 = vld [vmem:[#allocation2 + $0x9a] sm:$0xff]  ;;  %v1057_v26 = vadd.f32 %v1056_v14, %v5606_v27  ;;  %v2869_v27 = vld [vmem:[#allocation2 + $0xb1] sm:$0xff] }
 0x2f9   :  { %5603 = vst [vmem:[#allocation14_spill] sm:$0xff] %v5079_v5  ;;  %3333 = vmatmul.f32.gmra.mxu0 %v3220_v21  ;;  %2273 = vmatmul.f32.gmra.mxu1 %v3219_v41 }
 0x2fa   :  { %v1343_v8 = vpop.f32.mrf.mxu2  ;;  %2982 = vmatmul.f32.gmra.mxu3 %v2867_v45  ;;  %v5608_v45 = vld [vmem:[#allocation21_spill] sm:$0xff] }
 0x2fb   :  { %v1429_v32 = vadd.f32 %v1343_v8, %v1054_v50  ;;  %v2511_v8 = vld [vmem:[#allocation2 + $0x80] sm:$0xff] }
 0x2fd   :  { %v1784_v47 = vadd.f32 %v1698_v55, %v1429_v32  ;;  %v1710_v56 = vpop.f32.mrf.mxu3  ;;  %v3222_v55 = vld [vmem:[#allocation2 + $0xaa] sm:$0xff] }
 0x2fe   :  { %v2064_v49 = vpop.f32.mrf.mxu0  ;;  %v1068_v15 = vpop.f32.mrf.mxu1 }
 0x2ff   :  { %v5082_v9 = vadd.f32 %v2052_v16, %v1784_v47  ;;  %2619 = vmatmul.f32.gmra.mxu2 %v2510_v17  ;;  %v1060_v17 = vadd.f32 %v1059_v44, %v5608_v45  ;;  %v2870_v45 = vld [vmem:[#allocation2 + $0xc1] sm:$0xff] }
 0x301   :  { %5605 = vst [vmem:[#allocation15_spill] sm:$0xff] %v5082_v9  ;;  %3336 = vmatmul.f32.gmra.mxu0 %v3221_v43  ;;  %2276 = vmatmul.f32.gmra.mxu1 %v3220_v21 }
 0x302   :  { %v1346_v5 = vpop.f32.mrf.mxu2  ;;  %2985 = vmatmul.f32.gmra.mxu3 %v2868_v51  ;;  %v5610_v51 = vld [vmem:[#allocation23_spill] sm:$0xff] }
 0x303   :  { %v1430_v48 = vadd.f32 %v1346_v5, %v1057_v26  ;;  %v2512_v5 = vld [vmem:[#allocation2 + $0x90] sm:$0xff] }
 0x305   :  { %v1785_v41 = vadd.f32 %v1701_v57, %v1430_v48  ;;  %v1713_v47 = vpop.f32.mrf.mxu3  ;;  %v3223_v57 = vld [vmem:[#allocation2 + $0xb2] sm:$0xff] }
 0x306   :  { %v2067_v16 = vpop.f32.mrf.mxu0  ;;  %v1071_v32 = vpop.f32.mrf.mxu1 }
 0x307   :  { %v5085_v50 = vadd.f32 %v2055_v10, %v1785_v41  ;;  %2622 = vmatmul.f32.gmra.mxu2 %v2511_v8  ;;  %v1063_v8 = vadd.f32 %v1062_v22, %v5610_v51  ;;  %v2871_v51 = vld [vmem:[#allocation2 + $0xc9] sm:$0xff] }
 0x309   :  { %5607 = vst [vmem:[#allocation16_spill] sm:$0xff] %v5085_v50  ;;  %3339 = vmatmul.f32.gmra.mxu0 %v3222_v55  ;;  %2279 = vmatmul.f32.gmra.mxu1 %v3221_v43 }
 0x30a   :  { %v1349_v9 = vpop.f32.mrf.mxu2  ;;  %2988 = vmatmul.f32.gmra.mxu3 %v2869_v27  ;;  %v5612_v27 = vld [vmem:[#allocation25_spill] sm:$0xff] }
 0x30b   :  { %v1431_v14 = vadd.f32 %v1349_v9, %v1060_v17  ;;  %v2513_v9 = vld [vmem:[#allocation2 + $0x98] sm:$0xff] }
 0x30d   :  { %v1786_v21 = vadd.f32 %v1704_v59, %v1431_v14  ;;  %v1716_v41 = vpop.f32.mrf.mxu3  ;;  %v3224_v59 = vld [vmem:[#allocation2 + $0xc2] sm:$0xff] }
 0x30e   :  { %v2070_v10 = vpop.f32.mrf.mxu0  ;;  %v1074_v48 = vpop.f32.mrf.mxu1 }
 0x30f   :  { %v5088_v26 = vadd.f32 %v2058_v38, %v1786_v21  ;;  %2625 = vmatmul.f32.gmra.mxu2 %v2512_v5  ;;  %v1066_v5 = vadd.f32 %v1065_v0, %v5612_v27  ;;  %v2872_v27 = vld [vmem:[#allocation2 + $0xd9] sm:$0xff] }
 0x311   :  { %5609 = vst [vmem:[#allocation17_spill] sm:$0xff] %v5088_v26  ;;  %3342 = vmatmul.f32.gmra.mxu0 %v3223_v57  ;;  %2282 = vmatmul.f32.gmra.mxu1 %v3222_v55 }
 0x312   :  { %v1352_v50 = vpop.f32.mrf.mxu2  ;;  %2991 = vmatmul.f32.gmra.mxu3 %v2870_v45  ;;  %v5614_v45 = vld [vmem:[#allocation27_spill] sm:$0xff] }
 0x313   :  { %v1432_v44 = vadd.f32 %v1352_v50, %v1063_v8  ;;  %v2514_v50 = vld [vmem:[#allocation2 + $0xa8] sm:$0xff] }
 0x315   :  { %v1787_v43 = vadd.f32 %v1707_v37, %v1432_v44  ;;  %v1719_v21 = vpop.f32.mrf.mxu3  ;;  %v3225_v37 = vld [vmem:[#allocation2 + $0xca] sm:$0xff] }
 0x316   :  { %v2073_v38 = vpop.f32.mrf.mxu0  ;;  %v1077_v14 = vpop.f32.mrf.mxu1 }
 0x317   :  { %v5091_v17 = vadd.f32 %v2061_v3, %v1787_v43  ;;  %2628 = vmatmul.f32.gmra.mxu2 %v2513_v9  ;;  %v1069_v9 = vadd.f32 %v1068_v15, %v5614_v45  ;;  %v2873_v45 = vld [vmem:[#allocation2 + $0xe1] sm:$0xff] }
 0x319   :  { %5611 = vst [vmem:[#allocation18_spill] sm:$0xff] %v5091_v17  ;;  %3345 = vmatmul.f32.gmra.mxu0 %v3224_v59  ;;  %2285 = vmatmul.f32.gmra.mxu1 %v3223_v57 }
 0x31a   :  { %v1355_v26 = vpop.f32.mrf.mxu2  ;;  %2994 = vmatmul.f32.gmra.mxu3 %v2871_v51  ;;  %v5616_v51 = vld [vmem:[#allocation29_spill] sm:$0xff] }
 0x31b   :  { %v1433_v22 = vadd.f32 %v1355_v26, %v1066_v5  ;;  %v2515_v26 = vld [vmem:[#allocation2 + $0xb0] sm:$0xff] }
 0x31d   :  { %v1788_v55 = vadd.f32 %v1710_v56, %v1433_v22  ;;  %v1722_v43 = vpop.f32.mrf.mxu3  ;;  %v3226_v56 = vld [vmem:[#allocation2 + $0xda] sm:$0xff] }
 0x31e   :  { %v2076_v3 = vpop.f32.mrf.mxu0  ;;  %v1080_v44 = vpop.f32.mrf.mxu1 }
 0x31f   :  { %v5094_v8 = vadd.f32 %v2064_v49, %v1788_v55  ;;  %2631 = vmatmul.f32.gmra.mxu2 %v2514_v50  ;;  %v1072_v50 = vadd.f32 %v1071_v32, %v5616_v51  ;;  %v2874_v51 = vld [vmem:[#allocation2 + $0xf1] sm:$0xff] }
 0x321   :  { %5613 = vst [vmem:[#allocation19_spill] sm:$0xff] %v5094_v8  ;;  %3348 = vmatmul.f32.gmra.mxu0 %v3225_v37  ;;  %2288 = vmatmul.f32.gmra.mxu1 %v3224_v59 }
 0x322   :  { %v1358_v17 = vpop.f32.mrf.mxu2  ;;  %2997 = vmatmul.f32.gmra.mxu3 %v2872_v27  ;;  %v5617_v27 = vld [vmem:[#allocation31_spill] sm:$0xff] }
 0x323   :  { %v1434_v0 = vadd.f32 %v1358_v17, %v1069_v9  ;;  %v2516_v17 = vld [vmem:[#allocation2 + $0xc0] sm:$0xff] }
 0x325   :  { %v1789_v57 = vadd.f32 %v1713_v47, %v1434_v0  ;;  %v1725_v55 = vpop.f32.mrf.mxu3  ;;  %v3227_v47 = vld [vmem:[#allocation2 + $0xe2] sm:$0xff] }
 0x326   :  { %v2079_v49 = vpop.f32.mrf.mxu0  ;;  %v1083_v22 = vpop.f32.mrf.mxu1 }
 0x327   :  { %v5097_v5 = vadd.f32 %v2067_v16, %v1789_v57  ;;  %2634 = vmatmul.f32.gmra.mxu2 %v2515_v26  ;;  %v1075_v26 = vadd.f32 %v1074_v48, %v5617_v27 }
 0x329   :  { %5615 = vst [vmem:[#allocation21_spill] sm:$0xff] %v5097_v5  ;;  %3351 = vmatmul.f32.gmra.mxu0 %v3226_v56  ;;  %2291 = vmatmul.f32.gmra.mxu1 %v3225_v37 }
 0x32a   :  { %v1361_v8 = vpop.f32.mrf.mxu2  ;;  %3000 = vmatmul.f32.gmra.mxu3 %v2873_v45  ;;  %v5619_v45 = vld [vmem:[#allocation33_spill] sm:$0xff] }
 0x32b   :  { %v1435_v15 = vadd.f32 %v1361_v8, %v1072_v50  ;;  %v2517_v8 = vld [vmem:[#allocation2 + $0xc8] sm:$0xff] }
 0x32d   :  { %v1790_v59 = vadd.f32 %v1716_v41, %v1435_v15  ;;  %v1728_v57 = vpop.f32.mrf.mxu3  ;;  %v3228_v15 = vld [vmem:[#allocation2 + $0xf2] sm:$0xff] }
 0x32e   :  { %v2082_v16 = vpop.f32.mrf.mxu0  ;;  %v2247_v0 = vpop.f32.mrf.mxu1 }
 0x32f   :  { %v5100_v9 = vadd.f32 %v2070_v10, %v1790_v59  ;;  %2637 = vmatmul.f32.gmra.mxu2 %v2516_v17  ;;  %v1078_v17 = vadd.f32 %v1077_v14, %v5619_v45 }
 0x331   :  { %3354 = vmatmul.f32.gmra.mxu0 %v3227_v47  ;;  %2294 = vmatmul.f32.gmra.mxu1 %v3226_v56  ;;  %v2518_v56 = vld [vmem:[#allocation2 + $0xd8] sm:$0xff] }
 0x332   :  { %v1364_v5 = vpop.f32.mrf.mxu2  ;;  %3003 = vmatmul.f32.gmra.mxu3 %v2874_v51  ;;  %v3229_v51 = vld [vmem:[#allocation2 + $0xfa] sm:$0xff] }
 0x333   :  { %v1436_v32 = vadd.f32 %v1364_v5, %v1075_v26  ;;  %v2875_v5 = vld [vmem:[#allocation2 + $0xf9] sm:$0xff] }
 0x335   :  { %v1791_v37 = vadd.f32 %v1719_v21, %v1436_v32  ;;  %v2956_v59 = vpop.f32.mrf.mxu3 }
 0x336   :  { %v3310_v10 = vpop.f32.mrf.mxu0  ;;  %v5105_v41 = vpop.f32.mrf.mxu1 }
 0x337   :  { %v5103_v50 = vadd.f32 %v2073_v38, %v1791_v37  ;;  %2640 = vmatmul.f32.gmra.mxu2 %v2517_v8  ;;  %v5621_v8 = vld [vmem:[#allocation35_spill] sm:$0xff] }
 0x338   :  { %v1081_v37 = vadd.f32 %v1080_v44, %v5621_v8 }
 0x339   :  { %5618 = vst [vmem:[#allocation23_spill] sm:$0xff] %v5103_v50  ;;  %3357 = vmatmul.f32.gmra.mxu0 %v3228_v15  ;;  %2297 = vmatmul.f32.gmra.mxu1 %v3227_v47  ;;  %v2519_v47 = vld [vmem:[#allocation2 + $0xe0] sm:$0xff] }
 0x33a   :  { %v1367_v48 = vpop.f32.mrf.mxu2  ;;  %3006 = vmatmul.f32.gmra.mxu3 %v2875_v5  ;;  %v3230_v5 = vld [vmem:[#allocation2 + $0x10a] sm:$0xff] }
 0x33b   :  { %v1437_v27 = vadd.f32 %v1367_v48, %v1078_v17  ;;  %v2876_v17 = vld [vmem:[#allocation2 + $0x109] sm:$0xff] }
 0x33d   :  { %v1792_v26 = vadd.f32 %v1722_v43, %v1437_v27  ;;  %v2959_v50 = vpop.f32.mrf.mxu3 }
 0x33e   :  { %v3313_v38 = vpop.f32.mrf.mxu0  ;;  %v5110_v32 = vpop.f32.mrf.mxu1 }
 0x33f   :  { %v5108_v21 = vadd.f32 %v2076_v3, %v1792_v26  ;;  %2643 = vmatmul.f32.gmra.mxu2 %v2518_v56  ;;  %v5622_v56 = vld [vmem:[#allocation37_spill] sm:$0xff] }
 0x340   :  { %v1084_v26 = vadd.f32 %v1083_v22, %v5622_v56 }
 0x341   :  { %5620 = vst [vmem:[#allocation25_spill] sm:$0xff] %v5108_v21  ;;  %3360 = vmatmul.f32.gmra.mxu0 %v3229_v51  ;;  %2300 = vmatmul.f32.gmra.mxu1 %v3228_v15  ;;  %v2877_v15 = vld [vmem:[#allocation2 + $0x111] sm:$0xff] }
 0x342   :  { %v1370_v14 = vpop.f32.mrf.mxu2  ;;  %3009 = vmatmul.f32.gmra.mxu3 %v2876_v17  ;;  %v3231_v17 = vld [vmem:[#allocation2 + $0x112] sm:$0xff] }
 0x343   :  { %v1438_v45 = vadd.f32 %v1370_v14, %v1081_v37  ;;  %v2520_v37 = vld [vmem:[#allocation2 + $0xf0] sm:$0xff] }
 0x345   :  { %v1793_v48 = vadd.f32 %v1725_v55, %v1438_v45  ;;  %v2962_v44 = vpop.f32.mrf.mxu3 }
 0x346   :  { %v5115_v3 = vpop.f32.mrf.mxu0  ;;  %v5117_v27 = vpop.f32.mrf.mxu1 }
 0x347   :  { %v5113_v43 = vadd.f32 %v2079_v49, %v1793_v48  ;;  %2646 = vmatmul.f32.gmra.mxu2 %v2519_v47  ;;  %v2439_v47 = vadd.f32 %v2247_v0, %v4645_v30  ;;  %v3232_v30 = vld [vmem:[#allocation2 + $0x122] sm:$0xff]  ;;  %v2440_v0 = vadd.f32 %v5105_v41, %v4652_v25  ;;  %v2441_v25 = vadd.f32 %v5110_v32, %v4659_v34  ;;  %v3234_v34 = vld [vmem:[#allocation2 + $0x13a] sm:$0xff] }
 0x348   :  { %v2442_v32 = vadd.f32 %v5117_v27, %v4668_v12  ;;  %v3235_v12 = vld [vmem:[#allocation2 + $0x142] sm:$0xff] }
 0x349   :  { %3363 = vmatmul.f32.gmra.mxu0 %v3230_v5  ;;  %2303 = vmatmul.f32.gmra.mxu1 %v3229_v51  ;;  %v2878_v51 = vld [vmem:[#allocation2 + $0x121] sm:$0xff] }
 0x34a   :  { %v1373_v8 = vpop.f32.mrf.mxu2  ;;  %3012 = vmatmul.f32.gmra.mxu3 %v2877_v15 }
 0x34b   :  { %v1439_v21 = vadd.f32 %v1373_v8, %v1084_v26  ;;  %v2521_v26 = vld [vmem:[#allocation2 + $0xf8] sm:$0xff] }
 0x34d   :  { %v1794_v14 = vadd.f32 %v1728_v57, %v1439_v21  ;;  %v2965_v22 = vpop.f32.mrf.mxu3 }
 0x34e   :  { %v5122_v49 = vpop.f32.mrf.mxu0  ;;  %v5124_v45 = vpop.f32.mrf.mxu1 }
 0x34f   :  { %v5120_v55 = vadd.f32 %v2082_v16, %v1794_v14  ;;  %2649 = vmatmul.f32.gmra.mxu2 %v2520_v37  ;;  %v5130_v16 = vld [vmem:[%s5526_s4] ss:$0 sm:$0xff]  ;;  %v2443_v27 = vadd.f32 %v5124_v45, %v4677_v29  ;;  %v3236_v29 = vld [vmem:[#allocation2 + $0x152] sm:$0xff] }
 0x351   :  { %3366 = vmatmul.f32.gmra.mxu0 %v3231_v17  ;;  %2306 = vmatmul.f32.gmra.mxu1 %v3230_v5 }
 0x352   :  { %v2602_v48 = vpop.f32.mrf.mxu2  ;;  %3015 = vmatmul.f32.gmra.mxu3 %v2878_v51 }
 0x353   :  { %v2794_v56 = vadd.f32 %v2602_v48, %v2439_v47  ;;  %v2879_v47 = vld [vmem:[#allocation2 + $0x129] sm:$0xff] }
 0x354   :  { %v2522_v48 = vld [vmem:[#allocation2 + $0x108] sm:$0xff] }
 0x355   :  { %v3148_v8 = vadd.f32 %v2956_v59, %v2794_v56  ;;  %v2968_v37 = vpop.f32.mrf.mxu3 }
 0x356   :  { %v5132_v21 = vpop.f32.mrf.mxu0  ;;  %v5134_v15 = vpop.f32.mrf.mxu1 }
 0x357   :  { %v3502_v57 = vadd.f32 %v3310_v10, %v3148_v8  ;;  %2652 = vmatmul.f32.gmra.mxu2 %v2521_v26  ;;  %v3233_v8 = vld [vmem:[#allocation2 + $0x12a] sm:$0xff]  ;;  %v2444_v45 = vadd.f32 %v5134_v15, %v4686_v18  ;;  %v3237_v18 = vld [vmem:[#allocation2 + $0x15a] sm:$0xff] }
 0x358   :  { %v5623_v15 = vld [vmem:[#allocation42_spill] sm:$0xff] }
 0x359   :  { %v3570_v5 = vadd.f32 %v5130_v16, %v3502_v57  ;;  %3369 = vmatmul.f32.gmra.mxu0 %v3232_v30  ;;  %2309 = vmatmul.f32.gmra.mxu1 %v3231_v17 }
 0x35a   :  { %v2605_v59 = vpop.f32.mrf.mxu2  ;;  %3018 = vmatmul.f32.gmra.mxu3 %v2879_v47 }
 0x35b   :  { %3634 = vst [vmem:[#allocation9] sm:$0xff] %v3570_v5  ;;  %v2795_v14 = vadd.f32 %v2605_v59, %v2440_v0  ;;  %v2523_v0 = vld [vmem:[#allocation2 + $0x110] sm:$0xff] }
 0x35d   :  { %v3149_v10 = vadd.f32 %v2959_v50, %v2795_v14  ;;  %v2971_v57 = vpop.f32.mrf.mxu3  ;;  %v2880_v50 = vld [vmem:[#allocation2 + $0x139] sm:$0xff] }
 0x35e   :  { %v5139_v51 = vpop.f32.mrf.mxu0  ;;  %v5141_v26 = vpop.f32.mrf.mxu1 }
 0x35f   :  { %v3503_v56 = vadd.f32 %v3313_v38, %v3149_v10  ;;  %2655 = vmatmul.f32.gmra.mxu2 %v2522_v48 }
 0x361   :  { %v3571_v41 = vadd.f32 %v5130_v16, %v3503_v56  ;;  %3372 = vmatmul.f32.gmra.mxu0 %v3233_v8  ;;  %2312 = vmatmul.f32.gmra.mxu1 %v3232_v30 }
 0x362   :  { %v2608_v5 = vpop.f32.mrf.mxu2  ;;  %3021 = vmatmul.f32.gmra.mxu3 %v2880_v50 }
 0x363   :  { %3635 = vst [vmem:[#allocation9 + $0x8] sm:$0xff] %v3571_v41  ;;  %v2796_v17 = vadd.f32 %v2608_v5, %v2441_v25  ;;  %v2524_v25 = vld [vmem:[#allocation2 + $0x120] sm:$0xff] }
 0x365   :  { %v3150_v38 = vadd.f32 %v2962_v44, %v2796_v17  ;;  %v2974_v10 = vpop.f32.mrf.mxu3  ;;  %v2881_v44 = vld [vmem:[#allocation2 + $0x141] sm:$0xff] }
 0x366   :  { %v5147_v14 = vpop.f32.mrf.mxu0  ;;  %v5149_v47 = vpop.f32.mrf.mxu1 }
 0x367   :  { %v3504_v59 = vadd.f32 %v5115_v3, %v3150_v38  ;;  %2658 = vmatmul.f32.gmra.mxu2 %v2523_v0 }
 0x369   :  { %v3572_v48 = vadd.f32 %v5130_v16, %v3504_v59  ;;  %3375 = vmatmul.f32.gmra.mxu0 %v3234_v34  ;;  %2315 = vmatmul.f32.gmra.mxu1 %v3233_v8  ;;  %v2525_v59 = vld [vmem:[#allocation2 + $0x128] sm:$0xff] }
 0x36a   :  { %v2611_v56 = vpop.f32.mrf.mxu2  ;;  %3024 = vmatmul.f32.gmra.mxu3 %v2881_v44 }
 0x36b   :  { %3636 = vst [vmem:[#allocation9 + $0x10] sm:$0xff] %v3572_v48  ;;  %v2797_v30 = vadd.f32 %v2611_v56, %v2442_v32 }
 0x36d   :  { %v3151_v3 = vadd.f32 %v2965_v22, %v2797_v30  ;;  %v2977_v0 = vpop.f32.mrf.mxu3  ;;  %v2882_v22 = vld [vmem:[#allocation2 + $0x151] sm:$0xff] }
 0x36e   :  { %v5155_v5 = vpop.f32.mrf.mxu0  ;;  %v5157_v17 = vpop.f32.mrf.mxu1 }
 0x36f   :  { %v3505_v41 = vadd.f32 %v5122_v49, %v3151_v3  ;;  %2661 = vmatmul.f32.gmra.mxu2 %v2524_v25  ;;  %v2526_v3 = vld [vmem:[#allocation2 + $0x138] sm:$0xff] }
 0x371   :  { %v3573_v50 = vadd.f32 %v5130_v16, %v3505_v41  ;;  %3378 = vmatmul.f32.gmra.mxu0 %v3235_v12  ;;  %2318 = vmatmul.f32.gmra.mxu1 %v3234_v34 }
 0x372   :  { %v2614_v38 = vpop.f32.mrf.mxu2  ;;  %3027 = vmatmul.f32.gmra.mxu3 %v2882_v22 }
 0x373   :  { %3637 = vst [vmem:[#allocation9 + $0x18] sm:$0xff] %v3573_v50  ;;  %v2798_v8 = vadd.f32 %v2614_v38, %v2443_v27  ;;  %v2445_v38 = vadd.f32 %v5141_v26, %v5623_v15  ;;  %v3238_v26 = vld [vmem:[#allocation2 + $0x16a] sm:$0xff] }
 0x375   :  { %v3152_v49 = vadd.f32 %v2968_v37, %v2798_v8  ;;  %v2980_v44 = vpop.f32.mrf.mxu3  ;;  %v2883_v37 = vld [vmem:[#allocation2 + $0x159] sm:$0xff] }
 0x376   :  { %v5163_v48 = vpop.f32.mrf.mxu0  ;;  %v5165_v56 = vpop.f32.mrf.mxu1 }
 0x377   :  { %v3506_v32 = vadd.f32 %v5132_v21, %v3152_v49  ;;  %2664 = vmatmul.f32.gmra.mxu2 %v2525_v59  ;;  %v2527_v49 = vld [vmem:[#allocation2 + $0x140] sm:$0xff] }
 0x379   :  { %v3574_v30 = vadd.f32 %v5130_v16, %v3506_v32  ;;  %3381 = vmatmul.f32.gmra.mxu0 %v3236_v29  ;;  %2321 = vmatmul.f32.gmra.mxu1 %v3235_v12 }
 0x37a   :  { %v2617_v25 = vpop.f32.mrf.mxu2  ;;  %3030 = vmatmul.f32.gmra.mxu3 %v2883_v37 }
 0x37b   :  { %3638 = vst [vmem:[#allocation9 + $0x20] sm:$0xff] %v3574_v30  ;;  %v2799_v34 = vadd.f32 %v2617_v25, %v2444_v45  ;;  %v5624_v25 = vld [vmem:[#allocation43_spill] sm:$0xff] }
 0x37d   :  { %v3153_v21 = vadd.f32 %v2971_v57, %v2799_v34  ;;  %v2983_v22 = vpop.f32.mrf.mxu3  ;;  %v2884_v57 = vld [vmem:[#allocation2 + $0x169] sm:$0xff]  ;;  %v2446_v34 = vadd.f32 %v5149_v47, %v5624_v25  ;;  %v3239_v47 = vld [vmem:[#allocation2 + $0x172] sm:$0xff] }
 0x37e   :  { %v5171_v27 = vpop.f32.mrf.mxu0  ;;  %v5173_v50 = vpop.f32.mrf.mxu1 }
 0x37f   :  { %v3507_v41 = vadd.f32 %v5139_v51, %v3153_v21  ;;  %2667 = vmatmul.f32.gmra.mxu2 %v2526_v3 }
 0x381   :  { %v3575_v8 = vadd.f32 %v5130_v16, %v3507_v41  ;;  %3384 = vmatmul.f32.gmra.mxu0 %v3237_v18  ;;  %2324 = vmatmul.f32.gmra.mxu1 %v3236_v29  ;;  %v2528_v41 = vld [vmem:[#allocation2 + $0x150] sm:$0xff] }
 0x382   :  { %v2620_v59 = vpop.f32.mrf.mxu2  ;;  %3033 = vmatmul.f32.gmra.mxu3 %v2884_v57 }
 0x383   :  { %3639 = vst [vmem:[#allocation9 + $0x28] sm:$0xff] %v3575_v8  ;;  %v2800_v12 = vadd.f32 %v2620_v59, %v2445_v38  ;;  %v5625_v59 = vld [vmem:[#allocation44_spill] sm:$0xff] }
 0x385   :  { %v3154_v51 = vadd.f32 %v2974_v10, %v2800_v12  ;;  %v2986_v3 = vpop.f32.mrf.mxu3  ;;  %v2885_v10 = vld [vmem:[#allocation2 + $0x171] sm:$0xff]  ;;  %v2447_v12 = vadd.f32 %v5157_v17, %v5625_v59  ;;  %v3240_v17 = vld [vmem:[#allocation2 + $0x182] sm:$0xff] }
 0x386   :  { %v5179_v45 = vpop.f32.mrf.mxu0  ;;  %v5181_v30 = vpop.f32.mrf.mxu1 }
 0x387   :  { %v3508_v32 = vadd.f32 %v5147_v14, %v3154_v51  ;;  %2670 = vmatmul.f32.gmra.mxu2 %v2527_v49 }
 0x389   :  { %v3576_v37 = vadd.f32 %v5130_v16, %v3508_v32  ;;  %3387 = vmatmul.f32.gmra.mxu0 %v3238_v26  ;;  %2327 = vmatmul.f32.gmra.mxu1 %v3237_v18  ;;  %v2529_v32 = vld [vmem:[#allocation2 + $0x158] sm:$0xff] }
 0x38a   :  { %v2623_v21 = vpop.f32.mrf.mxu2  ;;  %3036 = vmatmul.f32.gmra.mxu3 %v2885_v10 }
 0x38b   :  { %3640 = vst [vmem:[#allocation9 + $0x30] sm:$0xff] %v3576_v37  ;;  %v2801_v29 = vadd.f32 %v2623_v21, %v2446_v34  ;;  %v2448_v21 = vadd.f32 %v5165_v56, %v4732_v62  ;;  %v3241_v62 = vld [vmem:[#allocation2 + $0x18a] sm:$0xff]  ;;  %v2449_v56 = vadd.f32 %v5173_v50, %v4742_v1  ;;  %v3242_v1 = vld [vmem:[#allocation2 + $0x19a] sm:$0xff]  ;;  %v2450_v50 = vadd.f32 %v5181_v30, %v4752_v63  ;;  %v3243_v30 = vld [vmem:[#allocation2 + $0x1a2] sm:$0xff] }
 0x38c   :  { %v2181_v63 = vld [vmem:[#allocation2 + $0x1ca] sm:$0xff] }
 0x38d   :  { %v3155_v14 = vadd.f32 %v2977_v0, %v2801_v29  ;;  %v2989_v49 = vpop.f32.mrf.mxu3  ;;  %v2886_v0 = vld [vmem:[#allocation2 + $0x181] sm:$0xff] }
 0x38e   :  { %v5187_v38 = vpop.f32.mrf.mxu0  ;;  %v5189_v8 = vpop.f32.mrf.mxu1 }
 0x38f   :  { %v3509_v15 = vadd.f32 %v5155_v5, %v3155_v14  ;;  %2673 = vmatmul.f32.gmra.mxu2 %v2528_v41  ;;  %v2530_v14 = vld [vmem:[#allocation2 + $0x168] sm:$0xff] }
 0x391   :  { %v3577_v57 = vadd.f32 %v5130_v16, %v3509_v15  ;;  %3390 = vmatmul.f32.gmra.mxu0 %v3239_v47  ;;  %2330 = vmatmul.f32.gmra.mxu1 %v3238_v26 }
 0x392   :  { %v2626_v51 = vpop.f32.mrf.mxu2  ;;  %3039 = vmatmul.f32.gmra.mxu3 %v2886_v0  ;;  %v2531_v0 = vld [vmem:[#allocation2 + $0x170] sm:$0xff] }
 0x393   :  { %3641 = vst [vmem:[#allocation9 + $0x38] sm:$0xff] %v3577_v57  ;;  %v2802_v18 = vadd.f32 %v2626_v51, %v2447_v12 }
 0x395   :  { %v3156_v5 = vadd.f32 %v2980_v44, %v2802_v18  ;;  %v2992_v10 = vpop.f32.mrf.mxu3  ;;  %v2887_v44 = vld [vmem:[#allocation2 + $0x189] sm:$0xff] }
 0x396   :  { %v5195_v34 = vpop.f32.mrf.mxu0  ;;  %v5197_v37 = vpop.f32.mrf.mxu1 }
 0x397   :  { %v3510_v25 = vadd.f32 %v5163_v48, %v3156_v5  ;;  %2676 = vmatmul.f32.gmra.mxu2 %v2529_v32 }
 0x399   :  { %v3578_v29 = vadd.f32 %v5130_v16, %v3510_v25  ;;  %3393 = vmatmul.f32.gmra.mxu0 %v3240_v17  ;;  %2333 = vmatmul.f32.gmra.mxu1 %v3239_v47 }
 0x39a   :  { %v2629_v41 = vpop.f32.mrf.mxu2  ;;  %3042 = vmatmul.f32.gmra.mxu3 %v2887_v44 }
 0x39b   :  { %3642 = vst [vmem:[#allocation9 + $0x40] sm:$0xff] %v3578_v29  ;;  %v2803_v26 = vadd.f32 %v2629_v41, %v2448_v21 }
 0x39d   :  { %v3157_v48 = vadd.f32 %v2983_v22, %v2803_v26  ;;  %v2995_v51 = vpop.f32.mrf.mxu3  ;;  %v2888_v22 = vld [vmem:[#allocation2 + $0x199] sm:$0xff] }
 0x39e   :  { %v5203_v59 = vpop.f32.mrf.mxu0  ;;  %v5205_v12 = vpop.f32.mrf.mxu1  ;;  %v2532_v26 = vld [vmem:[#allocation2 + $0x180] sm:$0xff] }
 0x39f   :  { %v3511_v15 = vadd.f32 %v5171_v27, %v3157_v48  ;;  %2679 = vmatmul.f32.gmra.mxu2 %v2530_v14 }
 0x3a1   :  { %v3579_v57 = vadd.f32 %v5130_v16, %v3511_v15  ;;  %3396 = vmatmul.f32.gmra.mxu0 %v3241_v62  ;;  %2336 = vmatmul.f32.gmra.mxu1 %v3240_v17  ;;  %v2451_v15 = vadd.f32 %v5189_v8, %v4762_v53  ;;  %v2182_v53 = vld [vmem:[#allocation2 + $0x1d2] sm:$0xff]  ;;  %v3244_v8 = vld [vmem:[#allocation2 + $0x1e2] sm:$0xff] }
 0x3a2   :  { %v2632_v18 = vpop.f32.mrf.mxu2  ;;  %3045 = vmatmul.f32.gmra.mxu3 %v2888_v22 }
 0x3a3   :  { %3643 = vst [vmem:[#allocation9 + $0x48] sm:$0xff] %v3579_v57  ;;  %v2804_v47 = vadd.f32 %v2632_v18, %v2449_v56  ;;  %v2890_v18 = vld [vmem:[#allocation2 + $0x1e1] sm:$0xff] }
 0x3a5   :  { %v3158_v27 = vadd.f32 %v2986_v3, %v2804_v47  ;;  %v2998_v29 = vpop.f32.mrf.mxu3  ;;  %v2889_v3 = vld [vmem:[#allocation2 + $0x1a1] sm:$0xff] }
 0x3a6   :  { %v5211_v5 = vpop.f32.mrf.mxu0  ;;  %v5213_v25 = vpop.f32.mrf.mxu1 }
 0x3a7   :  { %v3512_v32 = vadd.f32 %v5179_v45, %v3158_v27  ;;  %2682 = vmatmul.f32.gmra.mxu2 %v2531_v0 }
 0x3a9   :  { %v3580_v21 = vadd.f32 %v5130_v16, %v3512_v32  ;;  %3399 = vmatmul.f32.gmra.mxu0 %v3242_v1  ;;  %2339 = vmatmul.f32.gmra.mxu1 %v3241_v62  ;;  %v2452_v32 = vadd.f32 %v5197_v37, %v4772_v6  ;;  %v3245_v6 = vld [vmem:[#allocation2 + $0x1ea] sm:$0xff]  ;;  %v2453_v37 = vadd.f32 %v5205_v12, %v4781_v52 }
 0x3aa   :  { %v2635_v41 = vpop.f32.mrf.mxu2  ;;  %3048 = vmatmul.f32.gmra.mxu3 %v2889_v3  ;;  %v3783_v3 = vld [vmem:[#allocation2] sm:$0xff]  ;;  %v2454_v52 = vadd.f32 %v5213_v25, %v4790_v13 }
 0x3ab   :  { %3644 = vst [vmem:[#allocation9 + $0x50] sm:$0xff] %v3580_v21  ;;  %v2805_v17 = vadd.f32 %v2635_v41, %v2450_v50  ;;  %v2891_v41 = vld [vmem:[#allocation2 + $0x1e9] sm:$0xff] }
 0x3ac   :  { %v3247_v13 = vld [vmem:[#allocation2 + $0x202] sm:$0xff] }
 0x3ad   :  { %v3159_v45 = vadd.f32 %v2989_v49, %v2805_v17  ;;  %v3001_v57 = vpop.f32.mrf.mxu3 }
 0x3ae   :  { %v5219_v14 = vpop.f32.mrf.mxu0  ;;  %v5221_v48 = vpop.f32.mrf.mxu1 }
 0x3af   :  { %v3513_v44 = vadd.f32 %v5187_v38, %v3159_v45  ;;  %2685 = vmatmul.f32.gmra.mxu2 %v2532_v26  ;;  %v2533_v38 = vld [vmem:[#allocation2 + $0x188] sm:$0xff]  ;;  %v2455_v25 = vadd.f32 %v5221_v48, %v4799_v2  ;;  %v3248_v2 = vld [vmem:[#allocation2 + $0x212] sm:$0xff] }
 0x3b1   :  { %v3581_v56 = vadd.f32 %v5130_v16, %v3513_v44  ;;  %3402 = vmatmul.f32.gmra.mxu0 %v3243_v30  ;;  %2342 = vmatmul.f32.gmra.mxu1 %v2181_v63 }
 0x3b2   :  { %v2638_v62 = vpop.f32.mrf.mxu2  ;;  %3051 = vmatmul.f32.gmra.mxu3 %v2890_v18  ;;  %v3246_v18 = vld [vmem:[#allocation2 + $0x1fa] sm:$0xff] }
 0x3b3   :  { %3645 = vst [vmem:[#allocation9 + $0x58] sm:$0xff] %v3581_v56  ;;  %v2806_v49 = vadd.f32 %v2638_v62, %v2451_v15  ;;  %v2892_v15 = vld [vmem:[#allocation2 + $0x1f9] sm:$0xff] }
 0x3b5   :  { %v3160_v47 = vadd.f32 %v2992_v10, %v2806_v49  ;;  %v3004_v50 = vpop.f32.mrf.mxu3 }
 0x3b6   :  { %v5227_v0 = vpop.f32.mrf.mxu0  ;;  %v5229_v27 = vpop.f32.mrf.mxu1 }
 0x3b7   :  { %v3514_v22 = vadd.f32 %v5195_v34, %v3160_v47  ;;  %2688 = vmatmul.f32.gmra.mxu2 %v2533_v38  ;;  %v2456_v48 = vadd.f32 %v5229_v27, %v4808_v54  ;;  %v3249_v54 = vld [vmem:[#allocation2 + $0x21a] sm:$0xff] }
 0x3b9   :  { %v3582_v1 = vadd.f32 %v5130_v16, %v3514_v22  ;;  %3405 = vmatmul.f32.gmra.mxu0 %v3244_v8  ;;  %2345 = vmatmul.f32.gmra.mxu1 %v2182_v53  ;;  %v2536_v53 = vld [vmem:[#allocation2 + $0x1e0] sm:$0xff] }
 0x3ba   :  { %v2641_v21 = vpop.f32.mrf.mxu2  ;;  %3054 = vmatmul.f32.gmra.mxu3 %v2891_v41 }
 0x3bb   :  { %3646 = vst [vmem:[#allocation9 + $0x60] sm:$0xff] %v3582_v1  ;;  %v2807_v10 = vadd.f32 %v2641_v21, %v2452_v32 }
 0x3bd   :  { %v3161_v34 = vadd.f32 %v2995_v51, %v2807_v10  ;;  %v3007_v63 = vpop.f32.mrf.mxu3 }
 0x3be   :  { %v5235_v26 = vpop.f32.mrf.mxu0  ;;  %v5237_v45 = vpop.f32.mrf.mxu1 }
 0x3bf   :  { %v3515_v17 = vadd.f32 %v5203_v59, %v3161_v34  ;;  %2691 = vmatmul.f32.gmra.mxu2 %v3783_v3  ;;  %v2457_v27 = vadd.f32 %v5237_v45, %v4817_v33  ;;  %v3250_v33 = vld [vmem:[#allocation2 + $0x22a] sm:$0xff] }
 0x3c1   :  { %v3583_v44 = vadd.f32 %v5130_v16, %v3515_v17  ;;  %3408 = vmatmul.f32.gmra.mxu0 %v3245_v6  ;;  %2348 = vmatmul.f32.gmra.mxu1 %v3244_v8  ;;  %v2537_v17 = vld [vmem:[#allocation2 + $0x1e8] sm:$0xff] }
 0x3c2   :  { %v2644_v30 = vpop.f32.mrf.mxu2  ;;  %3057 = vmatmul.f32.gmra.mxu3 %v2892_v15 }
 0x3c3   :  { %3647 = vst [vmem:[#allocation9 + $0x68] sm:$0xff] %v3583_v44  ;;  %v2808_v51 = vadd.f32 %v2644_v30, %v2453_v37 }
 0x3c5   :  { %v3162_v59 = vadd.f32 %v2998_v29, %v2808_v51  ;;  %v3010_v38 = vpop.f32.mrf.mxu3  ;;  %v2893_v29 = vld [vmem:[#allocation2 + $0x201] sm:$0xff] }
 0x3c6   :  { %v5243_v62 = vpop.f32.mrf.mxu0  ;;  %v5245_v49 = vpop.f32.mrf.mxu1 }
 0x3c7   :  { %v3516_v56 = vadd.f32 %v5211_v5, %v3162_v59  ;;  %2694 = vmatmul.f32.gmra.mxu2 %v3783_v3  ;;  %v2538_v59 = vld [vmem:[#allocation2 + $0x1f8] sm:$0xff]  ;;  %v2458_v45 = vadd.f32 %v5245_v49, %v4826_v42 }
 0x3c8   :  { %v3251_v42 = vld [vmem:[#allocation2 + $0x232] sm:$0xff] }
 0x3c9   :  { %v3584_v12 = vadd.f32 %v5130_v16, %v3516_v56  ;;  %3411 = vmatmul.f32.gmra.mxu0 %v3246_v18  ;;  %2351 = vmatmul.f32.gmra.mxu1 %v3245_v6 }
 0x3ca   :  { %v2647_v47 = vpop.f32.mrf.mxu2  ;;  %3060 = vmatmul.f32.gmra.mxu3 %v2893_v29 }
 0x3cb   :  { %3648 = vst [vmem:[#allocation9 + $0x70] sm:$0xff] %v3584_v12  ;;  %v2809_v22 = vadd.f32 %v2647_v47, %v2454_v52 }
 0x3cd   :  { %v3163_v5 = vadd.f32 %v3001_v57, %v2809_v22  ;;  %v3013_v10 = vpop.f32.mrf.mxu3  ;;  %v2894_v57 = vld [vmem:[#allocation2 + $0x211] sm:$0xff] }
 0x3ce   :  { %v5251_v32 = vpop.f32.mrf.mxu0  ;;  %v5253_v1 = vpop.f32.mrf.mxu1 }
 0x3cf   :  { %v3517_v8 = vadd.f32 %v5219_v14, %v3163_v5  ;;  %2697 = vmatmul.f32.gmra.mxu2 %v2536_v53  ;;  %v2539_v53 = vld [vmem:[#allocation2 + $0x200] sm:$0xff]  ;;  %v2459_v49 = vadd.f32 %v5253_v1, %v4835_v19 }
 0x3d0   :  { %v3252_v19 = vld [vmem:[#allocation2 + $0x242] sm:$0xff] }
 0x3d1   :  { %v3585_v21 = vadd.f32 %v5130_v16, %v3517_v8  ;;  %3414 = vmatmul.f32.gmra.mxu0 %v3247_v13  ;;  %2354 = vmatmul.f32.gmra.mxu1 %v3246_v18 }
 0x3d2   :  { %v2650_v41 = vpop.f32.mrf.mxu2  ;;  %3063 = vmatmul.f32.gmra.mxu3 %v2894_v57  ;;  %v2540_v57 = vld [vmem:[#allocation2 + $0x210] sm:$0xff] }
 0x3d3   :  { %3649 = vst [vmem:[#allocation9 + $0x78] sm:$0xff] %v3585_v21  ;;  %v2810_v34 = vadd.f32 %v2650_v41, %v2455_v25 }
 0x3d5   :  { %v3164_v14 = vadd.f32 %v3004_v50, %v2810_v34  ;;  %v3016_v30 = vpop.f32.mrf.mxu3  ;;  %v2895_v50 = vld [vmem:[#allocation2 + $0x219] sm:$0xff] }
 0x3d6   :  { %v5259_v6 = vpop.f32.mrf.mxu0  ;;  %v5261_v37 = vpop.f32.mrf.mxu1 }
 0x3d7   :  { %v3518_v3 = vadd.f32 %v5227_v0, %v3164_v14  ;;  %2700 = vmatmul.f32.gmra.mxu2 %v2537_v17  ;;  %v2460_v1 = vadd.f32 %v5261_v37, %v4844_v39  ;;  %v3253_v39 = vld [vmem:[#allocation2 + $0x24a] sm:$0xff] }
 0x3d9   :  { %v3586_v44 = vadd.f32 %v5130_v16, %v3518_v3  ;;  %3417 = vmatmul.f32.gmra.mxu0 %v3248_v2  ;;  %2357 = vmatmul.f32.gmra.mxu1 %v3247_v13 }
 0x3da   :  { %v2653_v51 = vpop.f32.mrf.mxu2  ;;  %3066 = vmatmul.f32.gmra.mxu3 %v2895_v50 }
 0x3db   :  { %3650 = vst [vmem:[#allocation9 + $0x80] sm:$0xff] %v3586_v44  ;;  %v2811_v15 = vadd.f32 %v2653_v51, %v2456_v48 }
 0x3dd   :  { %v3165_v0 = vadd.f32 %v3007_v63, %v2811_v15  ;;  %v3019_v47 = vpop.f32.mrf.mxu3  ;;  %v2896_v63 = vld [vmem:[#allocation2 + $0x229] sm:$0xff]  ;;  %v2541_v15 = vld [vmem:[#allocation2 + $0x218] sm:$0xff] }
 0x3de   :  { %v5267_v18 = vpop.f32.mrf.mxu0  ;;  %v5269_v52 = vpop.f32.mrf.mxu1 }
 0x3df   :  { %v3519_v56 = vadd.f32 %v5235_v26, %v3165_v0  ;;  %2703 = vmatmul.f32.gmra.mxu2 %v2538_v59  ;;  %v2461_v37 = vadd.f32 %v5269_v52, %v4853_v31  ;;  %v3254_v31 = vld [vmem:[#allocation2 + $0x25a] sm:$0xff] }
 0x3e1   :  { %v3587_v12 = vadd.f32 %v5130_v16, %v3519_v56  ;;  %3420 = vmatmul.f32.gmra.mxu0 %v3249_v54  ;;  %2360 = vmatmul.f32.gmra.mxu1 %v3248_v2 }
 0x3e2   :  { %v2656_v22 = vpop.f32.mrf.mxu2  ;;  %3069 = vmatmul.f32.gmra.mxu3 %v2896_v63 }
 0x3e3   :  { %3651 = vst [vmem:[#allocation9 + $0x88] sm:$0xff] %v3587_v12  ;;  %v2812_v29 = vadd.f32 %v2656_v22, %v2457_v27  ;;  %v2542_v22 = vld [vmem:[#allocation2 + $0x228] sm:$0xff] }
 0x3e5   :  { %v3166_v26 = vadd.f32 %v3010_v38, %v2812_v29  ;;  %v3022_v21 = vpop.f32.mrf.mxu3  ;;  %v2897_v38 = vld [vmem:[#allocation2 + $0x231] sm:$0xff] }
 0x3e6   :  { %v5275_v8 = vpop.f32.mrf.mxu0  ;;  %v5277_v13 = vpop.f32.mrf.mxu1 }
 0x3e7   :  { %v3520_v5 = vadd.f32 %v5243_v62, %v3166_v26  ;;  %2706 = vmatmul.f32.gmra.mxu2 %v2539_v53  ;;  %v2462_v52 = vadd.f32 %v5277_v13, %v4862_v60  ;;  %v3255_v60 = vld [vmem:[#allocation2 + $0x262] sm:$0xff] }
 0x3e9   :  { %v3588_v25 = vadd.f32 %v5130_v16, %v3520_v5  ;;  %3423 = vmatmul.f32.gmra.mxu0 %v3250_v33  ;;  %2363 = vmatmul.f32.gmra.mxu1 %v3249_v54 }
 0x3ea   :  { %v2659_v41 = vpop.f32.mrf.mxu2  ;;  %3072 = vmatmul.f32.gmra.mxu3 %v2897_v38 }
 0x3eb   :  { %3652 = vst [vmem:[#allocation9 + $0x90] sm:$0xff] %v3588_v25  ;;  %v2813_v34 = vadd.f32 %v2659_v41, %v2458_v45  ;;  %v2543_v25 = vld [vmem:[#allocation2 + $0x230] sm:$0xff] }
 0x3ed   :  { %v3167_v62 = vadd.f32 %v3013_v10, %v2813_v34  ;;  %v3025_v48 = vpop.f32.mrf.mxu3  ;;  %v2898_v10 = vld [vmem:[#allocation2 + $0x241] sm:$0xff] }
 0x3ee   :  { %v5283_v14 = vpop.f32.mrf.mxu0  ;;  %v5285_v3 = vpop.f32.mrf.mxu1 }
 0x3ef   :  { %v3521_v17 = vadd.f32 %v5251_v32, %v3167_v62  ;;  %2709 = vmatmul.f32.gmra.mxu2 %v2540_v57  ;;  %v2463_v13 = vadd.f32 %v5285_v3, %v4871_v24  ;;  %v3256_v24 = vld [vmem:[#allocation2 + $0x272] sm:$0xff] }
 0x3f1   :  { %v3589_v2 = vadd.f32 %v5130_v16, %v3521_v17  ;;  %3426 = vmatmul.f32.gmra.mxu0 %v3251_v42  ;;  %2366 = vmatmul.f32.gmra.mxu1 %v3250_v33 }
 0x3f2   :  { %v2662_v44 = vpop.f32.mrf.mxu2  ;;  %3075 = vmatmul.f32.gmra.mxu3 %v2898_v10 }
 0x3f3   :  { %3653 = vst [vmem:[#allocation9 + $0x98] sm:$0xff] %v3589_v2  ;;  %v2814_v51 = vadd.f32 %v2662_v44, %v2459_v49  ;;  %v2544_v49 = vld [vmem:[#allocation2 + $0x240] sm:$0xff] }
 0x3f5   :  { %v3168_v32 = vadd.f32 %v3016_v30, %v2814_v51  ;;  %v3028_v54 = vpop.f32.mrf.mxu3  ;;  %v2899_v30 = vld [vmem:[#allocation2 + $0x249] sm:$0xff] }
 0x3f6   :  { %v5291_v59 = vpop.f32.mrf.mxu0  ;;  %v5293_v0 = vpop.f32.mrf.mxu1 }
 0x3f7   :  { %v3522_v50 = vadd.f32 %v5259_v6, %v3168_v32  ;;  %2712 = vmatmul.f32.gmra.mxu2 %v2541_v15  ;;  %v2464_v3 = vadd.f32 %v5293_v0, %v4880_v35  ;;  %v3257_v35 = vld [vmem:[#allocation2 + $0x27a] sm:$0xff] }
 0x3f9   :  { %v3590_v56 = vadd.f32 %v5130_v16, %v3522_v50  ;;  %3429 = vmatmul.f32.gmra.mxu0 %v3252_v19  ;;  %2369 = vmatmul.f32.gmra.mxu1 %v3251_v42 }
 0x3fa   :  { %v2665_v27 = vpop.f32.mrf.mxu2  ;;  %3078 = vmatmul.f32.gmra.mxu3 %v2899_v30 }
 0x3fb   :  { %3654 = vst [vmem:[#allocation9 + $0xa0] sm:$0xff] %v3590_v56  ;;  %v2815_v12 = vadd.f32 %v2665_v27, %v2460_v1 }
 0x3fd   :  { %v3169_v6 = vadd.f32 %v3019_v47, %v2815_v12  ;;  %v3031_v5 = vpop.f32.mrf.mxu3  ;;  %v2900_v47 = vld [vmem:[#allocation2 + $0x259] sm:$0xff] }
 0x3fe   :  { %v5299_v63 = vpop.f32.mrf.mxu0  ;;  %v5301_v53 = vpop.f32.mrf.mxu1 }
 0x3ff   :  { %v3523_v29 = vadd.f32 %v5267_v18, %v3169_v6  ;;  %2715 = vmatmul.f32.gmra.mxu2 %v2542_v22  ;;  %v2465_v0 = vadd.f32 %v5301_v53, %v4889_v36  ;;  %v3258_v36 = vld [vmem:[#allocation2 + $0x28a] sm:$0xff] }
 0x401   :  { %v3591_v26 = vadd.f32 %v5130_v16, %v3523_v29  ;;  %3432 = vmatmul.f32.gmra.mxu0 %v3253_v39  ;;  %2372 = vmatmul.f32.gmra.mxu1 %v3252_v19  ;;  %v2545_v19 = vld [vmem:[#allocation2 + $0x248] sm:$0xff]  ;;  %v2546_v29 = vld [vmem:[#allocation2 + $0x258] sm:$0xff] }
 0x402   :  { %v2668_v33 = vpop.f32.mrf.mxu2  ;;  %3081 = vmatmul.f32.gmra.mxu3 %v2900_v47 }
 0x403   :  { %3655 = vst [vmem:[#allocation9 + $0xa8] sm:$0xff] %v3591_v26  ;;  %v2816_v45 = vadd.f32 %v2668_v33, %v2461_v37 }
 0x405   :  { %v3170_v18 = vadd.f32 %v3022_v21, %v2816_v45  ;;  %v3034_v62 = vpop.f32.mrf.mxu3  ;;  %v2901_v21 = vld [vmem:[#allocation2 + $0x261] sm:$0xff] }
 0x406   :  { %v5307_v34 = vpop.f32.mrf.mxu0  ;;  %v5309_v38 = vpop.f32.mrf.mxu1 }
 0x407   :  { %v3524_v41 = vadd.f32 %v5275_v8, %v3170_v18  ;;  %2718 = vmatmul.f32.gmra.mxu2 %v2543_v25  ;;  %v2547_v18 = vld [vmem:[#allocation2 + $0x260] sm:$0xff]  ;;  %v2466_v53 = vadd.f32 %v5309_v38, %v4898_v23  ;;  %v3259_v23 = vld [vmem:[#allocation2 + $0x292] sm:$0xff] }
 0x409   :  { %v3592_v57 = vadd.f32 %v5130_v16, %v3524_v41  ;;  %3435 = vmatmul.f32.gmra.mxu0 %v3254_v31  ;;  %2375 = vmatmul.f32.gmra.mxu1 %v3253_v39 }
 0x40a   :  { %v2671_v17 = vpop.f32.mrf.mxu2  ;;  %3084 = vmatmul.f32.gmra.mxu3 %v2901_v21 }
 0x40b   :  { %3656 = vst [vmem:[#allocation9 + $0xb0] sm:$0xff] %v3592_v57  ;;  %v2817_v42 = vadd.f32 %v2671_v17, %v2462_v52 }
 0x40d   :  { %v3171_v8 = vadd.f32 %v3025_v48, %v2817_v42  ;;  %v3037_v15 = vpop.f32.mrf.mxu3  ;;  %v2902_v48 = vld [vmem:[#allocation2 + $0x271] sm:$0xff] }
 0x40e   :  { %v5315_v44 = vpop.f32.mrf.mxu0  ;;  %v5317_v51 = vpop.f32.mrf.mxu1 }
 0x40f   :  { %v3525_v2 = vadd.f32 %v5283_v14, %v3171_v8  ;;  %2721 = vmatmul.f32.gmra.mxu2 %v2544_v49  ;;  %v2548_v49 = vld [vmem:[#allocation2 + $0x270] sm:$0xff]  ;;  %v2467_v38 = vadd.f32 %v5317_v51, %v4907_v4  ;;  %v3260_v4 = vld [vmem:[#allocation2 + $0x2a2] sm:$0xff] }
 0x411   :  { %v3593_v10 = vadd.f32 %v5130_v16, %v3525_v2  ;;  %3438 = vmatmul.f32.gmra.mxu0 %v3255_v60  ;;  %2378 = vmatmul.f32.gmra.mxu1 %v3254_v31 }
 0x412   :  { %v2674_v32 = vpop.f32.mrf.mxu2  ;;  %3087 = vmatmul.f32.gmra.mxu3 %v2902_v48  ;;  %v2549_v48 = vld [vmem:[#allocation2 + $0x278] sm:$0xff] }
 0x413   :  { %3657 = vst [vmem:[#allocation9 + $0xb8] sm:$0xff] %v3593_v10  ;;  %v2818_v50 = vadd.f32 %v2674_v32, %v2463_v13 }
 0x415   :  { %v3172_v14 = vadd.f32 %v3028_v54, %v2818_v50  ;;  %v3040_v30 = vpop.f32.mrf.mxu3  ;;  %v2903_v54 = vld [vmem:[#allocation2 + $0x279] sm:$0xff] }
 0x416   :  { %v5323_v56 = vpop.f32.mrf.mxu0  ;;  %v5325_v27 = vpop.f32.mrf.mxu1 }
 0x417   :  { %v3526_v1 = vadd.f32 %v5291_v59, %v3172_v14  ;;  %2724 = vmatmul.f32.gmra.mxu2 %v2545_v19  ;;  %v2468_v51 = vadd.f32 %v5325_v27, %v4916_v20  ;;  %v3261_v20 = vld [vmem:[#allocation2 + $0x2aa] sm:$0xff] }
 0x419   :  { %v3594_v12 = vadd.f32 %v5130_v16, %v3526_v1  ;;  %3441 = vmatmul.f32.gmra.mxu0 %v3256_v24  ;;  %2381 = vmatmul.f32.gmra.mxu1 %v3255_v60 }
 0x41a   :  { %v2677_v22 = vpop.f32.mrf.mxu2  ;;  %3090 = vmatmul.f32.gmra.mxu3 %v2903_v54 }
 0x41b   :  { %3658 = vst [vmem:[#allocation9 + $0xc0] sm:$0xff] %v3594_v12  ;;  %v2819_v6 = vadd.f32 %v2677_v22, %v2464_v3 }
 0x41d   :  { %v3173_v59 = vadd.f32 %v3031_v5, %v2819_v6  ;;  %v3043_v45 = vpop.f32.mrf.mxu3  ;;  %v2904_v5 = vld [vmem:[#allocation2 + $0x289] sm:$0xff] }
 0x41e   :  { %v5331_v37 = vpop.f32.mrf.mxu0  ;;  %v5333_v26 = vpop.f32.mrf.mxu1  ;;  %v2550_v6 = vld [vmem:[#allocation2 + $0x288] sm:$0xff] }
 0x41f   :  { %v3527_v39 = vadd.f32 %v5299_v63, %v3173_v59  ;;  %2727 = vmatmul.f32.gmra.mxu2 %v2546_v29  ;;  %v2469_v27 = vadd.f32 %v5333_v26, %v4925_v58  ;;  %v3262_v58 = vld [vmem:[#allocation2 + $0x2ba] sm:$0xff] }
 0x420   :  { %v5380_v26 = vld [vmem:[%s5526_s4] ss:$0 sm:$0xff]  ;;  %s3894_s4 = smov [#allocation9]  }
 0x421   :  { %v3595_v33 = vadd.f32 %v5130_v16, %v3527_v39  ;;  %3444 = vmatmul.f32.gmra.mxu0 %v3257_v35  ;;  %2384 = vmatmul.f32.gmra.mxu1 %v3256_v24  ;;  %s3702_s18 = sshll.u32 %s3894_s4, 4  ;;  %s3703_s18 = int_to_ptr.vmem [resolvable:$true] %s3702_s18 }
 0x422   :  { %v2680_v47 = vpop.f32.mrf.mxu2  ;;  %3093 = vmatmul.f32.gmra.mxu3 %v2904_v5 }
 0x423   :  { %3659 = vst [vmem:[#allocation9 + $0xc8] sm:$0xff] %v3595_v33  ;;  %v2820_v25 = vadd.f32 %v2680_v47, %v2465_v0  ;;  %v2551_v47 = vld [vmem:[#allocation2 + $0x290] sm:$0xff] }
 0x425   :  { %v3174_v63 = vadd.f32 %v3034_v62, %v2820_v25  ;;  %v3046_v17 = vpop.f32.mrf.mxu3  ;;  %v2905_v62 = vld [vmem:[#allocation2 + $0x291] sm:$0xff] }
 0x426   :  { %v5339_v31 = vpop.f32.mrf.mxu0  ;;  %v5341_v52 = vpop.f32.mrf.mxu1 }
 0x427   :  { %v3528_v41 = vadd.f32 %v5307_v34, %v3174_v63  ;;  %2730 = vmatmul.f32.gmra.mxu2 %v2547_v18 }
 0x429   :  { %v3596_v57 = vadd.f32 %v5130_v16, %v3528_v41  ;;  %3447 = vmatmul.f32.gmra.mxu0 %v3258_v36  ;;  %2387 = vmatmul.f32.gmra.mxu1 %v3257_v35 }
 0x42a   :  { %v2683_v42 = vpop.f32.mrf.mxu2  ;;  %3096 = vmatmul.f32.gmra.mxu3 %v2905_v62 }
 0x42b   :  { %3660 = vst [vmem:[#allocation9 + $0xd0] sm:$0xff] %v3596_v57  ;;  %v2821_v21 = vadd.f32 %v2683_v42, %v2466_v53  ;;  %v2909_v53 = vld [vmem:[#allocation2 + $0x2c1] sm:$0xff] }
 0x42c   :  { %v2552_v57 = vld [vmem:[#allocation2 + $0x2a0] sm:$0xff] }
 0x42d   :  { %v3175_v34 = vadd.f32 %v3037_v15, %v2821_v21  ;;  %v3049_v10 = vpop.f32.mrf.mxu3  ;;  %v2906_v15 = vld [vmem:[#allocation2 + $0x2a1] sm:$0xff] }
 0x42e   :  { %v5347_v2 = vpop.f32.mrf.mxu0  ;;  %v5349_v60 = vpop.f32.mrf.mxu1  ;;  %v3263_v21 = vld [vmem:[#allocation2 + $0x2c2] sm:$0xff] }
 0x42f   :  { %v3529_v8 = vadd.f32 %v5315_v44, %v3175_v34  ;;  %2733 = vmatmul.f32.gmra.mxu2 %v2548_v49  ;;  %v2471_v62 = vadd.f32 %v5349_v60, %v4943_v40  ;;  %v3264_v40 = vld [vmem:[#allocation2 + $0x2d2] sm:$0xff] }
 0x431   :  { %v3597_v13 = vadd.f32 %v5130_v16, %v3529_v8  ;;  %3450 = vmatmul.f32.gmra.mxu0 %v3259_v23  ;;  %2390 = vmatmul.f32.gmra.mxu1 %v3258_v36 }
 0x432   :  { %v2686_v32 = vpop.f32.mrf.mxu2  ;;  %3099 = vmatmul.f32.gmra.mxu3 %v2906_v15 }
 0x433   :  { %3661 = vst [vmem:[#allocation9 + $0xd8] sm:$0xff] %v3597_v13  ;;  %v2822_v50 = vadd.f32 %v2686_v32, %v2467_v38  ;;  %v2910_v38 = vld [vmem:[#allocation2 + $0x2d1] sm:$0xff]  ;;  %v2553_v13 = vld [vmem:[#allocation2 + $0x2a8] sm:$0xff] }
 0x435   :  { %v3176_v44 = vadd.f32 %v3040_v30, %v2822_v50  ;;  %v3052_v3 = vpop.f32.mrf.mxu3  ;;  %v2907_v30 = vld [vmem:[#allocation2 + $0x2a9] sm:$0xff] }
 0x436   :  { %v5355_v14 = vpop.f32.mrf.mxu0  ;;  %v5357_v1 = vpop.f32.mrf.mxu1 }
 0x437   :  { %v3530_v19 = vadd.f32 %v5323_v56, %v3176_v44  ;;  %2736 = vmatmul.f32.gmra.mxu2 %v2549_v48  ;;  %v2472_v60 = vadd.f32 %v5357_v1, %v4952_v11  ;;  %v3265_v11 = vld [vmem:[#allocation2 + $0x2da] sm:$0xff]  ;;  %v5626_v1 = vld [vmem:[#allocation45_spill] sm:$0xff] }
 0x439   :  { %v3598_v24 = vadd.f32 %v5130_v16, %v3530_v19  ;;  %3453 = vmatmul.f32.gmra.mxu0 %v3260_v4  ;;  %2393 = vmatmul.f32.gmra.mxu1 %v3259_v23 }
 0x43a   :  { %v2689_v12 = vpop.f32.mrf.mxu2  ;;  %3102 = vmatmul.f32.gmra.mxu3 %v2907_v30 }
 0x43b   :  { %3662 = vst [vmem:[#allocation9 + $0xe0] sm:$0xff] %v3598_v24  ;;  %v2823_v22 = vadd.f32 %v2689_v12, %v2468_v51  ;;  %v2554_v51 = vld [vmem:[#allocation2 + $0x2b8] sm:$0xff] }
 0x43d   :  { %v3177_v56 = vadd.f32 %v3043_v45, %v2823_v22  ;;  %v3055_v35 = vpop.f32.mrf.mxu3  ;;  %v2908_v45 = vld [vmem:[#allocation2 + $0x2b9] sm:$0xff] }
 0x43e   :  { %v5363_v29 = vpop.f32.mrf.mxu0  ;;  %v5365_v59 = vpop.f32.mrf.mxu1 }
 0x43f   :  { %v3531_v54 = vadd.f32 %v5331_v37, %v3177_v56  ;;  %2739 = vmatmul.f32.gmra.mxu2 %v2550_v6  ;;  %v2473_v22 = vadd.f32 %v5365_v59, %v5626_v1  ;;  %v3266_v59 = vld [vmem:[#allocation2 + $0x2ea] sm:$0xff] }
 0x441   :  { %v3599_v39 = vadd.f32 %v5130_v16, %v3531_v54  ;;  %3456 = vmatmul.f32.gmra.mxu0 %v3261_v20  ;;  %2396 = vmatmul.f32.gmra.mxu1 %v3260_v4  ;;  %v2470_v16 = vadd.f32 %v5341_v52, %v4934_v61  ;;  %v2911_v4 = vld [vmem:[#allocation2 + $0x2d9] sm:$0xff] }
 0x442   :  { %v2692_v0 = vpop.f32.mrf.mxu2  ;;  %3105 = vmatmul.f32.gmra.mxu3 %v2908_v45 }
 0x443   :  { %3663 = vst [vmem:[#allocation9 + $0xe8] sm:$0xff] %v3599_v39  ;;  %v2824_v33 = vadd.f32 %v2692_v0, %v2469_v27  ;;  %v2555_v27 = vld [vmem:[#allocation2 + $0x2c0] sm:$0xff] }
 0x445   :  { %v3178_v37 = vadd.f32 %v3046_v17, %v2824_v33  ;;  %v3058_v41 = vpop.f32.mrf.mxu3  ;;  %v5627_v33 = vld [vmem:[#allocation20_spill] sm:$0xff] }
 0x446   :  { %v5371_v5 = vpop.f32.mrf.mxu0  ;;  %v5373_v18 = vpop.f32.mrf.mxu1 }
 0x447   :  { %v3532_v25 = vadd.f32 %v5339_v31, %v3178_v37  ;;  %2742 = vmatmul.f32.gmra.mxu2 %v2551_v47  ;;  %v2474_v45 = vadd.f32 %v5373_v18, %v5627_v33  ;;  %v3267_v18 = vld [vmem:[#allocation2 + $0x2f2] sm:$0xff] }
 0x449   :  { %v3600_v63 = vadd.f32 %v5380_v26, %v3532_v25  ;;  %3459 = vmatmul.f32.gmra.mxu0 %v3262_v58  ;;  %2399 = vmatmul.f32.gmra.mxu1 %v3261_v20  ;;  %v2912_v20 = vld [vmem:[#allocation2 + $0x2e9] sm:$0xff] }
 0x44a   :  { %v2695_v36 = vpop.f32.mrf.mxu2  ;;  %3108 = vmatmul.f32.gmra.mxu3 %v2909_v53  ;;  %v5628_v53 = vld [vmem:[#allocation22_spill] sm:$0xff] }
 0x44b   :  { %3664 = vst [vmem:[#allocation9 + $0xf0] sm:$0xff] %v3600_v63  ;;  %v2825_v31 = vadd.f32 %v2695_v36, %v2470_v16  ;;  %v2913_v16 = vld [vmem:[#allocation2 + $0x2f1] sm:$0xff] }
 0x44c   :  { %v2556_v63 = vld [vmem:[#allocation2 + $0x2d0] sm:$0xff] }
 0x44d   :  { %v3179_v17 = vadd.f32 %v3049_v10, %v2825_v31  ;;  %v3061_v34 = vpop.f32.mrf.mxu3 }
 0x44e   :  { %v5384_v61 = vpop.f32.mrf.mxu0  ;;  %v5386_v52 = vpop.f32.mrf.mxu1 }
 0x44f   :  { %v3533_v42 = vadd.f32 %v5347_v2, %v3179_v17  ;;  %2745 = vmatmul.f32.gmra.mxu2 %v2552_v57  ;;  %v2475_v57 = vadd.f32 %v5386_v52, %v5628_v53  ;;  %v3268_v52 = vld [vmem:[#allocation2 + $0x302] sm:$0xff] }
 0x451   :  { %v3601_v49 = vadd.f32 %v5380_v26, %v3533_v42  ;;  %3462 = vmatmul.f32.gmra.mxu0 %v3263_v21  ;;  %2402 = vmatmul.f32.gmra.mxu1 %v3262_v58 }
 0x452   :  { %v2698_v8 = vpop.f32.mrf.mxu2  ;;  %3111 = vmatmul.f32.gmra.mxu3 %v2910_v38 }
 0x453   :  { %3665 = vst [vmem:[#allocation9 + $0xf8] sm:$0xff] %v3601_v49  ;;  %v2826_v23 = vadd.f32 %v2698_v8, %v2471_v62  ;;  %v2914_v49 = vld [vmem:[#allocation2 + $0x301] sm:$0xff] }
 0x455   :  { %v3180_v2 = vadd.f32 %v3052_v3, %v2826_v23  ;;  %v3064_v48 = vpop.f32.mrf.mxu3 }
 0x456   :  { %v5392_v32 = vpop.f32.mrf.mxu0  ;;  %v5394_v50 = vpop.f32.mrf.mxu1 }
 0x457   :  { %v3534_v10 = vadd.f32 %v5355_v14, %v3180_v2  ;;  %2748 = vmatmul.f32.gmra.mxu2 %v2553_v13  ;;  %v5629_v13 = vld [vmem:[#allocation24_spill] sm:$0xff] }
 0x458   :  { %v2476_v2 = vadd.f32 %v5394_v50, %v5629_v13  ;;  %v3269_v50 = vld [vmem:[#allocation2 + $0x30a] sm:$0xff] }
 0x459   :  { %v3602_v15 = vadd.f32 %v5380_v26, %v3534_v10  ;;  %3465 = vmatmul.f32.gmra.mxu0 %v3264_v40  ;;  %2405 = vmatmul.f32.gmra.mxu1 %v3263_v21 }
 0x45a   :  { %v2701_v44 = vpop.f32.mrf.mxu2  ;;  %3114 = vmatmul.f32.gmra.mxu3 %v2911_v4 }
 0x45b   :  { %3666 = vst [vmem:[#allocation9 + $0x100] sm:$0xff] %v3602_v15  ;;  %v2827_v19 = vadd.f32 %v2701_v44, %v2472_v60  ;;  %v2558_v44 = vld [vmem:[#allocation2 + $0x2e8] sm:$0xff] }
 0x45d   :  { %v3181_v14 = vadd.f32 %v3055_v35, %v2827_v19  ;;  %v3067_v6 = vpop.f32.mrf.mxu3 }
 0x45e   :  { %v5400_v3 = vpop.f32.mrf.mxu0  ;;  %v5402_v12 = vpop.f32.mrf.mxu1 }
 0x45f   :  { %v3535_v24 = vadd.f32 %v5363_v29, %v3181_v14  ;;  %2751 = vmatmul.f32.gmra.mxu2 %v2554_v51  ;;  %v5630_v14 = vld [vmem:[#allocation26_spill] sm:$0xff] }
 0x461   :  { %v3603_v30 = vadd.f32 %v5380_v26, %v3535_v24  ;;  %3468 = vmatmul.f32.gmra.mxu0 %v3265_v11  ;;  %2408 = vmatmul.f32.gmra.mxu1 %v3264_v40  ;;  %v2477_v24 = vadd.f32 %v5402_v12, %v5630_v14  ;;  %v3270_v12 = vld [vmem:[#allocation2 + $0x31a] sm:$0xff]  ;;  %v2920_v14 = vld [vmem:[#allocation2 + $0x349] sm:$0xff] }
 0x462   :  { %v2704_v56 = vpop.f32.mrf.mxu2  ;;  %3117 = vmatmul.f32.gmra.mxu3 %v2912_v20 }
 0x463   :  { %3667 = vst [vmem:[#allocation9 + $0x108] sm:$0xff] %v3603_v30  ;;  %v2828_v54 = vadd.f32 %v2704_v56, %v2473_v22  ;;  %v2559_v56 = vld [vmem:[#allocation2 + $0x2f0] sm:$0xff] }
 0x465   :  { %v3182_v29 = vadd.f32 %v3058_v41, %v2828_v54  ;;  %v3070_v37 = vpop.f32.mrf.mxu3 }
 0x466   :  { %v5408_v35 = vpop.f32.mrf.mxu0  ;;  %v5410_v0 = vpop.f32.mrf.mxu1 }
 0x467   :  { %v3536_v39 = vadd.f32 %v5371_v5, %v3182_v29  ;;  %2754 = vmatmul.f32.gmra.mxu2 %v2555_v27  ;;  %v5631_v29 = vld [vmem:[#allocation28_spill] sm:$0xff] }
 0x469   :  { %v3604_v47 = vadd.f32 %v5380_v26, %v3536_v39  ;;  %3471 = vmatmul.f32.gmra.mxu0 %v3266_v59  ;;  %2411 = vmatmul.f32.gmra.mxu1 %v3265_v11  ;;  %v2478_v39 = vadd.f32 %v5410_v0, %v5631_v29  ;;  %v3271_v0 = vld [vmem:[#allocation2 + $0x322] sm:$0xff] }
 0x46a   :  { %v2707_v25 = vpop.f32.mrf.mxu2  ;;  %3120 = vmatmul.f32.gmra.mxu3 %v2913_v16 }
 0x46b   :  { %3668 = vst [vmem:[#allocation9 + $0x110] sm:$0xff] %v3604_v47  ;;  %v2829_v58 = vadd.f32 %v2707_v25, %v2474_v45  ;;  %v2560_v25 = vld [vmem:[#allocation2 + $0x300] sm:$0xff] }
 0x46d   :  { %v3183_v5 = vadd.f32 %v3061_v34, %v2829_v58  ;;  %v3073_v42 = vpop.f32.mrf.mxu3  ;;  %v2557_v34 = vld [vmem:[#allocation2 + $0x2d8] sm:$0xff] }
 0x46e   :  { %v5416_v36 = vpop.f32.mrf.mxu0  ;;  %v5418_v31 = vpop.f32.mrf.mxu1 }
 0x46f   :  { %v3537_v41 = vadd.f32 %v5384_v61, %v3183_v5  ;;  %2757 = vmatmul.f32.gmra.mxu2 %v2556_v63  ;;  %v5632_v5 = vld [vmem:[#allocation30_spill] sm:$0xff] }
 0x471   :  { %v3605_v17 = vadd.f32 %v5380_v26, %v3537_v41  ;;  %3474 = vmatmul.f32.gmra.mxu0 %v3267_v18  ;;  %2414 = vmatmul.f32.gmra.mxu1 %v3266_v59  ;;  %v2479_v41 = vadd.f32 %v5418_v31, %v5632_v5  ;;  %v3272_v31 = vld [vmem:[#allocation2 + $0x332] sm:$0xff]  ;;  %v5634_v5 = vld [vmem:[#allocation34_spill] sm:$0xff] }
 0x472   :  { %v2710_v21 = vpop.f32.mrf.mxu2  ;;  %3123 = vmatmul.f32.gmra.mxu3 %v2914_v49 }
 0x473   :  { %3669 = vst [vmem:[#allocation9 + $0x118] sm:$0xff] %v3605_v17  ;;  %v2830_v62 = vadd.f32 %v2710_v21, %v2475_v57  ;;  %v2561_v21 = vld [vmem:[#allocation2 + $0x308] sm:$0xff] }
 0x475   :  { %v3184_v61 = vadd.f32 %v3064_v48, %v2830_v62  ;;  %v3076_v40 = vpop.f32.mrf.mxu3  ;;  %v2915_v48 = vld [vmem:[#allocation2 + $0x309] sm:$0xff] }
 0x476   :  { %v5424_v23 = vpop.f32.mrf.mxu0  ;;  %v5426_v38 = vpop.f32.mrf.mxu1 }
 0x477   :  { %v3538_v8 = vadd.f32 %v5392_v32, %v3184_v61  ;;  %2760 = vmatmul.f32.gmra.mxu2 %v2557_v34  ;;  %v2480_v61 = vadd.f32 %v5426_v38, %v5034_v46 }
 0x479   :  { %v3606_v10 = vadd.f32 %v5380_v26, %v3538_v8  ;;  %3477 = vmatmul.f32.gmra.mxu0 %v3268_v52  ;;  %2417 = vmatmul.f32.gmra.mxu1 %v3267_v18 }
 0x47a   :  { %v2713_v60 = vpop.f32.mrf.mxu2  ;;  %3126 = vmatmul.f32.gmra.mxu3 %v2915_v48 }
 0x47b   :  { %3670 = vst [vmem:[#allocation9 + $0x120] sm:$0xff] %v3606_v10  ;;  %v2831_v15 = vadd.f32 %v2713_v60, %v2476_v2  ;;  %v2919_v10 = vld [vmem:[#allocation2 + $0x339] sm:$0xff] }
 0x47d   :  { %v3185_v32 = vadd.f32 %v3067_v6, %v2831_v15  ;;  %v3079_v1 = vpop.f32.mrf.mxu3  ;;  %v2916_v6 = vld [vmem:[#allocation2 + $0x319] sm:$0xff] }
 0x47e   :  { %v5432_v4 = vpop.f32.mrf.mxu0  ;;  %v5434_v51 = vpop.f32.mrf.mxu1 }
 0x47f   :  { %v3539_v19 = vadd.f32 %v5400_v3, %v3185_v32  ;;  %2763 = vmatmul.f32.gmra.mxu2 %v2558_v44  ;;  %v3273_v44 = vld [vmem:[#allocation2 + $0x33a] sm:$0xff]  ;;  %v2481_v46 = vadd.f32 %v5434_v51, %v5040_v28 }
 0x481   :  { %v3607_v11 = vadd.f32 %v5380_v26, %v3539_v19  ;;  %3480 = vmatmul.f32.gmra.mxu0 %v3269_v50  ;;  %2420 = vmatmul.f32.gmra.mxu1 %v3268_v52 }
 0x482   :  { %v2716_v22 = vpop.f32.mrf.mxu2  ;;  %3129 = vmatmul.f32.gmra.mxu3 %v2916_v6 }
 0x483   :  { %3671 = vst [vmem:[#allocation9 + $0x128] sm:$0xff] %v3607_v11  ;;  %v2832_v30 = vadd.f32 %v2716_v22, %v2477_v24  ;;  %v2563_v24 = vld [vmem:[#allocation2 + $0x320] sm:$0xff] }
 0x485   :  { %v3186_v3 = vadd.f32 %v3070_v37, %v2832_v30  ;;  %v3082_v33 = vpop.f32.mrf.mxu3  ;;  %v2917_v37 = vld [vmem:[#allocation2 + $0x321] sm:$0xff]  ;;  %v3274_v30 = vld [vmem:[#allocation2 + $0x34a] sm:$0xff] }
 0x486   :  { %v5440_v20 = vpop.f32.mrf.mxu0  ;;  %v5442_v27 = vpop.f32.mrf.mxu1 }
 0x487   :  { %v3540_v54 = vadd.f32 %v5408_v35, %v3186_v3  ;;  %2766 = vmatmul.f32.gmra.mxu2 %v2559_v56  ;;  %v2482_v28 = vadd.f32 %v5442_v27, %v5046_v7 }
 0x489   :  { %v3608_v59 = vadd.f32 %v5380_v26, %v3540_v54  ;;  %3483 = vmatmul.f32.gmra.mxu0 %v3270_v12  ;;  %2423 = vmatmul.f32.gmra.mxu1 %v3269_v50  ;;  %v2921_v54 = vld [vmem:[#allocation2 + $0x351] sm:$0xff] }
 0x48a   :  { %v2719_v45 = vpop.f32.mrf.mxu2  ;;  %3132 = vmatmul.f32.gmra.mxu3 %v2917_v37 }
 0x48b   :  { %3672 = vst [vmem:[#allocation9 + $0x130] sm:$0xff] %v3608_v59  ;;  %v2833_v47 = vadd.f32 %v2719_v45, %v2478_v39  ;;  %v5633_v45 = vld [vmem:[#allocation32_spill] sm:$0xff] }
 0x48d   :  { %v3187_v35 = vadd.f32 %v3073_v42, %v2833_v47  ;;  %v3085_v53 = vpop.f32.mrf.mxu3  ;;  %v2918_v42 = vld [vmem:[#allocation2 + $0x331] sm:$0xff] }
 0x48e   :  { %v5448_v16 = vpop.f32.mrf.mxu0  ;;  %v5450_v63 = vpop.f32.mrf.mxu1 }
 0x48f   :  { %v3541_v58 = vadd.f32 %v5416_v36, %v3187_v35  ;;  %2769 = vmatmul.f32.gmra.mxu2 %v2560_v25  ;;  %v2483_v7 = vadd.f32 %v5450_v63, %v5633_v45  ;;  %v2565_v35 = vld [vmem:[#allocation2 + $0x338] sm:$0xff] }
 0x491   :  { %v3609_v18 = vadd.f32 %v5380_v26, %v3541_v58  ;;  %3486 = vmatmul.f32.gmra.mxu0 %v3271_v0  ;;  %2426 = vmatmul.f32.gmra.mxu1 %v3270_v12  ;;  %v2564_v12 = vld [vmem:[#allocation2 + $0x330] sm:$0xff] }
 0x492   :  { %v2722_v57 = vpop.f32.mrf.mxu2  ;;  %3135 = vmatmul.f32.gmra.mxu3 %v2918_v42 }
 0x493   :  { %3673 = vst [vmem:[#allocation9 + $0x138] sm:$0xff] %v3609_v18  ;;  %v2834_v17 = vadd.f32 %v2722_v57, %v2479_v41 }
 0x495   :  { %v3188_v36 = vadd.f32 %v3076_v40, %v2834_v17  ;;  %v3088_v52 = vpop.f32.mrf.mxu3  ;;  %v2562_v40 = vld [vmem:[#allocation2 + $0x318] sm:$0xff] }
 0x496   :  { %v5456_v49 = vpop.f32.mrf.mxu0  ;;  %v5458_v34 = vpop.f32.mrf.mxu1 }
 0x497   :  { %v3542_v62 = vadd.f32 %v5424_v23, %v3188_v36  ;;  %2772 = vmatmul.f32.gmra.mxu2 %v2561_v21  ;;  %v2484_v41 = vadd.f32 %v5458_v34, %v5634_v5  ;;  %v3785_v36 = vld [vmem:[#allocation2] sm:$0xff] }
 0x499   :  { %v3610_v8 = vadd.f32 %v5380_v26, %v3542_v62  ;;  %3489 = vmatmul.f32.gmra.mxu0 %v3272_v31  ;;  %2429 = vmatmul.f32.gmra.mxu1 %v3271_v0 }
 0x49a   :  { %v2725_v13 = vpop.f32.mrf.mxu2  ;;  %3138 = vmatmul.f32.gmra.mxu3 %v2919_v10 }
 0x49b   :  { %3674 = vst [vmem:[#allocation9 + $0x140] sm:$0xff] %v3610_v8  ;;  %v2835_v2 = vadd.f32 %v2725_v13, %v2480_v61 }
 0x49d   :  { %v3189_v23 = vadd.f32 %v3079_v1, %v2835_v2  ;;  %v3091_v32 = vpop.f32.mrf.mxu3 }
 0x49e   :  { %v3445_v15 = vpop.f32.mrf.mxu0  ;;  %v2385_v48 = vpop.f32.mrf.mxu1 }
 0x49f   :  { %v3543_v60 = vadd.f32 %v5432_v4, %v3189_v23  ;;  %2775 = vmatmul.f32.gmra.mxu2 %v2562_v40  ;;  %v5636_v40 = vld [vmem:[#allocation38_spill] sm:$0xff] }
 0x4a1   :  { %v3611_v38 = vadd.f32 %v5380_v26, %v3543_v60  ;;  %3492 = vmatmul.f32.gmra.mxu0 %v3273_v44  ;;  %2432 = vmatmul.f32.gmra.mxu1 %v3272_v31  ;;  %v5635_v31 = vld [vmem:[#allocation36_spill] sm:$0xff] }
 0x4a2   :  { %v2728_v19 = vpop.f32.mrf.mxu2  ;;  %3141 = vmatmul.f32.gmra.mxu3 %v2920_v14  ;;  %v2485_v61 = vadd.f32 %v2385_v48, %v5635_v31 }
 0x4a3   :  { %3675 = vst [vmem:[#allocation9 + $0x148] sm:$0xff] %v3611_v38  ;;  %v2836_v50 = vadd.f32 %v2728_v19, %v2481_v46 }
 0x4a5   :  { %v3190_v11 = vadd.f32 %v3082_v33, %v2836_v50  ;;  %v3094_v6 = vpop.f32.mrf.mxu3  ;;  %v3275_v33 = vld [vmem:[#allocation2 + $0x352] sm:$0xff] }
 0x4a6   :  { %v3448_v1 = vpop.f32.mrf.mxu0  ;;  %v2388_v22 = vpop.f32.mrf.mxu1  ;;  %v5637_v50 = vld [vmem:[#allocation39_spill] sm:$0xff] }
 0x4a7   :  { %v3544_v4 = vadd.f32 %v5440_v20, %v3190_v11  ;;  %2778 = vmatmul.f32.gmra.mxu2 %v2563_v24  ;;  %v2486_v23 = vadd.f32 %v2388_v22, %v5636_v40 }
 0x4a9   :  { %v3612_v51 = vadd.f32 %v5380_v26, %v3544_v4  ;;  %3495 = vmatmul.f32.gmra.mxu0 %v3274_v30  ;;  %2435 = vmatmul.f32.gmra.mxu1 %v3273_v44 }
 0x4aa   :  { %v2731_v56 = vpop.f32.mrf.mxu2  ;;  %3144 = vmatmul.f32.gmra.mxu3 %v2921_v54 }
 0x4ab   :  { %3676 = vst [vmem:[#allocation9 + $0x150] sm:$0xff] %v3612_v51  ;;  %v2837_v3 = vadd.f32 %v2731_v56, %v2482_v28 }
 0x4ad   :  { %v3191_v29 = vadd.f32 %v3085_v53, %v2837_v3  ;;  %v3097_v47 = vpop.f32.mrf.mxu3 }
 0x4ae   :  { %v3451_v39 = vpop.f32.mrf.mxu0  ;;  %v2391_v59 = vpop.f32.mrf.mxu1 }
 0x4af   :  { %v3545_v20 = vadd.f32 %v5448_v16, %v3191_v29  ;;  %2781 = vmatmul.f32.gmra.mxu2 %v2564_v12  ;;  %v2487_v14 = vadd.f32 %v2391_v59, %v5637_v50 }
 0x4b1   :  { %v3613_v27 = vadd.f32 %v5380_v26, %v3545_v20  ;;  %3498 = vmatmul.f32.gmra.mxu0 %v3275_v33  ;;  %v5639_v33 = vld [vmem:[#allocation41_spill] sm:$0xff] }
 0x4b2   :  { %v2734_v37 = vpop.f32.mrf.mxu2 }
 0x4b3   :  { %3677 = vst [vmem:[#allocation9 + $0x158] sm:$0xff] %v3613_v27  ;;  %v2838_v25 = vadd.f32 %v2734_v37, %v2483_v7 }
 0x4b5   :  { %v3192_v58 = vadd.f32 %v3088_v52, %v2838_v25  ;;  %v3100_v53 = vpop.f32.mrf.mxu3 }
 0x4b6   :  { %v3454_v16 = vpop.f32.mrf.mxu0  ;;  %v2394_v57 = vpop.f32.mrf.mxu1 }
 0x4b7   :  { %v3546_v0 = vadd.f32 %v5456_v49, %v3192_v58  ;;  %2784 = vmatmul.f32.gmra.mxu2 %v2565_v35 }
 0x4b9   :  { %v3614_v18 = vadd.f32 %v5380_v26, %v3546_v0 }
 0x4ba   :  { %v2737_v63 = vpop.f32.mrf.mxu2 }
 0x4bb   :  { %3678 = vst [vmem:[#allocation9 + $0x160] sm:$0xff] %v3614_v18  ;;  %v2839_v17 = vadd.f32 %v2737_v63, %v2484_v41 }
 0x4bd   :  { %v3193_v42 = vadd.f32 %v3091_v32, %v2839_v17  ;;  %v3103_v8 = vpop.f32.mrf.mxu3 }
 0x4be   :  { %v3457_v62 = vpop.f32.mrf.mxu0  ;;  %v2397_v13 = vpop.f32.mrf.mxu1 }
 0x4bf   :  { %v3547_v21 = vadd.f32 %v3445_v15, %v3193_v42  ;;  %2787 = vmatmul.f32.gmra.mxu2 %v3785_v36  ;;  %v2489_v45 = vadd.f32 %v2397_v13, %v5639_v33  ;;  %v5642_v13 = vld [vmem:[#allocation15_spill] sm:$0xff] }
 0x4c1   :  { %v3615_v49 = vadd.f32 %v5380_v26, %v3547_v21  ;;  %v5641_v21 = vld [vmem:[#allocation14_spill] sm:$0xff] }
 0x4c2   :  { %v2740_v52 = vpop.f32.mrf.mxu2 }
 0x4c3   :  { %3679 = vst [vmem:[#allocation9 + $0x168] sm:$0xff] %v3615_v49  ;;  %v2840_v34 = vadd.f32 %v2740_v52, %v2485_v61 }
 0x4c5   :  { %v3194_v2 = vadd.f32 %v3094_v6, %v2840_v34  ;;  %v3106_v15 = vpop.f32.mrf.mxu3  ;;  %v5638_v6 = vld [vmem:[#allocation40_spill] sm:$0xff] }
 0x4c6   :  { %v3460_v46 = vpop.f32.mrf.mxu0  ;;  %v2400_v32 = vpop.f32.mrf.mxu1  ;;  %v2488_v56 = vadd.f32 %v2394_v57, %v5638_v6 }
 0x4c7   :  { %v3548_v10 = vadd.f32 %v3448_v1, %v3194_v2  ;;  %2790 = vmatmul.f32.gmra.mxu2 %v3785_v36 }
 0x4c9   :  { %v3616_v60 = vadd.f32 %v5380_v26, %v3548_v10 }
 0x4ca   :  { %v2743_v44 = vpop.f32.mrf.mxu2 }
 0x4cb   :  { %3680 = vst [vmem:[#allocation9 + $0x170] sm:$0xff] %v3616_v60  ;;  %v2841_v38 = vadd.f32 %v2743_v44, %v2486_v23 }
 0x4cd   :  { %v3195_v48 = vadd.f32 %v3097_v47, %v2841_v38  ;;  %v3109_v4 = vpop.f32.mrf.mxu3 }
 0x4ce   :  { %v3463_v30 = vpop.f32.mrf.mxu0  ;;  %v2403_v51 = vpop.f32.mrf.mxu1 }
 0x4cf   :  { %v3549_v19 = vadd.f32 %v3451_v39, %v3195_v48  ;;  %v2491_v36 = vadd.f32 %v2403_v51, %v5641_v21  ;;  %v5643_v48 = vld [vmem:[#allocation16_spill] sm:$0xff] }
 0x4d1   :  { %v3617_v24 = vadd.f32 %v5380_v26, %v3549_v19 }
 0x4d2   :  { %v2746_v11 = vpop.f32.mrf.mxu2 }
 0x4d3   :  { %3681 = vst [vmem:[#allocation9 + $0x178] sm:$0xff] %v3617_v24  ;;  %v2842_v1 = vadd.f32 %v2746_v11, %v2487_v14 }
 0x4d5   :  { %v3196_v22 = vadd.f32 %v3100_v53, %v2842_v1  ;;  %v3112_v29 = vpop.f32.mrf.mxu3 }
 0x4d6   :  { %v3466_v39 = vpop.f32.mrf.mxu0  ;;  %v2406_v47 = vpop.f32.mrf.mxu1 }
 0x4d7   :  { %v3550_v28 = vadd.f32 %v3454_v16, %v3196_v22  ;;  %v5640_v16 = vld [vmem:[#allocation13_spill] sm:$0xff]  ;;  %v2492_v2 = vadd.f32 %v2406_v47, %v5642_v13 }
 0x4d8   :  { %v2490_v5 = vadd.f32 %v2400_v32, %v5640_v16 }
 0x4d9   :  { %v3618_v3 = vadd.f32 %v5380_v26, %v3550_v28 }
 0x4da   :  { %v2749_v54 = vpop.f32.mrf.mxu2 }
 0x4db   :  { %3682 = vst [vmem:[#allocation9 + $0x180] sm:$0xff] %v3618_v3  ;;  %v2843_v12 = vadd.f32 %v2749_v54, %v2488_v56 }
 0x4dd   :  { %v3197_v20 = vadd.f32 %v3103_v8, %v2843_v12  ;;  %v3115_v35 = vpop.f32.mrf.mxu3 }
 0x4de   :  { %v3469_v0 = vpop.f32.mrf.mxu0  ;;  %v2409_v63 = vpop.f32.mrf.mxu1 }
 0x4df   :  { %v3551_v59 = vadd.f32 %v3457_v62, %v3197_v20  ;;  %v2493_v32 = vadd.f32 %v2409_v63, %v5643_v48  ;;  %v5645_v20 = vld [vmem:[#allocation18_spill] sm:$0xff]  ;;  %v5647_v63 = vld [vmem:[#allocation21_spill] sm:$0xff] }
 0x4e1   :  { %v3619_v7 = vadd.f32 %v5380_v26, %v3551_v59 }
 0x4e2   :  { %v2752_v27 = vpop.f32.mrf.mxu2 }
 0x4e3   :  { %3683 = vst [vmem:[#allocation9 + $0x188] sm:$0xff] %v3619_v7  ;;  %v2844_v37 = vadd.f32 %v2752_v27, %v2489_v45 }
 0x4e5   :  { %v3198_v25 = vadd.f32 %v3106_v15, %v2844_v37  ;;  %v3118_v42 = vpop.f32.mrf.mxu3 }
 0x4e6   :  { %v3472_v61 = vpop.f32.mrf.mxu0  ;;  %v2412_v52 = vpop.f32.mrf.mxu1 }
 0x4e7   :  { %v3552_v58 = vadd.f32 %v3460_v46, %v3198_v25  ;;  %v5646_v25 = vld [vmem:[#allocation19_spill] sm:$0xff] }
 0x4e9   :  { %v3620_v41 = vadd.f32 %v5380_v26, %v3552_v58 }
 0x4ea   :  { %v2755_v18 = vpop.f32.mrf.mxu2 }
 0x4eb   :  { %3684 = vst [vmem:[#allocation9 + $0x190] sm:$0xff] %v3620_v41  ;;  %v2845_v53 = vadd.f32 %v2755_v18, %v2490_v5 }
 0x4ed   :  { %v3199_v57 = vadd.f32 %v3109_v4, %v2845_v53  ;;  %v3121_v23 = vpop.f32.mrf.mxu3 }
 0x4ee   :  { %v3475_v15 = vpop.f32.mrf.mxu0  ;;  %v2415_v38 = vpop.f32.mrf.mxu1 }
 0x4ef   :  { %v3553_v17 = vadd.f32 %v3463_v30, %v3199_v57  ;;  %v5644_v30 = vld [vmem:[#allocation17_spill] sm:$0xff] }
 0x4f0   :  { %v2494_v22 = vadd.f32 %v2412_v52, %v5644_v30 }
 0x4f1   :  { %v3621_v62 = vadd.f32 %v5380_v26, %v3553_v17 }
 0x4f2   :  { %v2758_v31 = vpop.f32.mrf.mxu2 }
 0x4f3   :  { %3685 = vst [vmem:[#allocation9 + $0x198] sm:$0xff] %v3621_v62  ;;  %v2846_v49 = vadd.f32 %v2758_v31, %v2491_v36 }
 0x4f5   :  { %v3200_v8 = vadd.f32 %v3112_v29, %v2846_v49  ;;  %v3124_v24 = vpop.f32.mrf.mxu3 }
 0x4f6   :  { %v3478_v4 = vpop.f32.mrf.mxu0  ;;  %v2418_v6 = vpop.f32.mrf.mxu1 }
 0x4f7   :  { %v3554_v34 = vadd.f32 %v3466_v39, %v3200_v8  ;;  %v2495_v39 = vadd.f32 %v2415_v38, %v5645_v20 }
 0x4f9   :  { %v3622_v10 = vadd.f32 %v5380_v26, %v3554_v34 }
 0x4fa   :  { %v2761_v40 = vpop.f32.mrf.mxu2 }
 0x4fb   :  { %3686 = vst [vmem:[#allocation9 + $0x1a0] sm:$0xff] %v3622_v10  ;;  %v2847_v60 = vadd.f32 %v2761_v40, %v2492_v2 }
 0x4fd   :  { %v3201_v44 = vadd.f32 %v3115_v35, %v2847_v60  ;;  %v3127_v54 = vpop.f32.mrf.mxu3  ;;  %v2496_v35 = vadd.f32 %v2418_v6, %v5646_v25  ;;  %v5648_v60 = vld [vmem:[#allocation23_spill] sm:$0xff] }
 0x4fe   :  { %v3481_v29 = vpop.f32.mrf.mxu0  ;;  %v2421_v7 = vpop.f32.mrf.mxu1 }
 0x4ff   :  { %v3555_v46 = vadd.f32 %v3469_v0, %v3201_v44  ;;  %v2497_v57 = vadd.f32 %v2421_v7, %v5647_v63 }
 0x501   :  { %v3623_v19 = vadd.f32 %v5380_v26, %v3555_v46 }
 0x502   :  { %v2764_v50 = vpop.f32.mrf.mxu2 }
 0x503   :  { %3687 = vst [vmem:[#allocation9 + $0x1a8] sm:$0xff] %v3623_v19  ;;  %v2848_v14 = vadd.f32 %v2764_v50, %v2493_v32 }
 0x505   :  { %v3202_v11 = vadd.f32 %v3118_v42, %v2848_v14  ;;  %v3130_v37 = vpop.f32.mrf.mxu3  ;;  %v5649_v14 = vld [vmem:[#allocation25_spill] sm:$0xff] }
 0x506   :  { %v3484_v16 = vpop.f32.mrf.mxu0  ;;  %v2424_v18 = vpop.f32.mrf.mxu1 }
 0x507   :  { %v3556_v1 = vadd.f32 %v3472_v61, %v3202_v11  ;;  %v2498_v8 = vadd.f32 %v2424_v18, %v5100_v9 }
 0x509   :  { %v3624_v28 = vadd.f32 %v5380_v26, %v3556_v1 }
 0x50a   :  { %v2767_v51 = vpop.f32.mrf.mxu2 }
 0x50b   :  { %3688 = vst [vmem:[#allocation9 + $0x1b0] sm:$0xff] %v3624_v28  ;;  %v2849_v56 = vadd.f32 %v2767_v51, %v2494_v22 }
 0x50d   :  { %v3203_v3 = vadd.f32 %v3121_v23, %v2849_v56  ;;  %v3133_v21 = vpop.f32.mrf.mxu3 }
 0x50e   :  { %v3487_v62 = vpop.f32.mrf.mxu0  ;;  %v2427_v49 = vpop.f32.mrf.mxu1 }
 0x50f   :  { %v3557_v12 = vadd.f32 %v3475_v15, %v3203_v3  ;;  %v2499_v15 = vadd.f32 %v2427_v49, %v5648_v60 }
 0x511   :  { %v3625_v59 = vadd.f32 %v5380_v26, %v3557_v12 }
 0x512   :  { %v2770_v33 = vpop.f32.mrf.mxu2 }
 0x513   :  { %3689 = vst [vmem:[#allocation9 + $0x1b8] sm:$0xff] %v3625_v59  ;;  %v2850_v45 = vadd.f32 %v2770_v33, %v2495_v39 }
 0x515   :  { %v3204_v27 = vadd.f32 %v3124_v24, %v2850_v45  ;;  %v3136_v2 = vpop.f32.mrf.mxu3 }
 0x516   :  { %v3490_v40 = vpop.f32.mrf.mxu0  ;;  %v2430_v38 = vpop.f32.mrf.mxu1 }
 0x517   :  { %v3558_v47 = vadd.f32 %v3478_v4, %v3204_v27  ;;  %v2500_v24 = vadd.f32 %v2430_v38, %v5649_v14 }
 0x519   :  { %v3626_v58 = vadd.f32 %v5380_v26, %v3558_v47 }
 0x51a   :  { %v2773_v0 = vpop.f32.mrf.mxu2 }
 0x51b   :  { %3690 = vst [vmem:[#allocation9 + $0x1c0] sm:$0xff] %v3626_v58  ;;  %v2851_v5 = vadd.f32 %v2773_v0, %v2496_v35 }
 0x51d   :  { %v3205_v41 = vadd.f32 %v3127_v54, %v2851_v5  ;;  %v3139_v19 = vpop.f32.mrf.mxu3 }
 0x51e   :  { %v3493_v50 = vpop.f32.mrf.mxu0  ;;  %v2433_v30 = vpop.f32.mrf.mxu1 }
 0x51f   :  { %v3559_v53 = vadd.f32 %v3481_v29, %v3205_v41  ;;  %v2501_v6 = vadd.f32 %v2433_v30, %v5113_v43 }
 0x521   :  { %v3627_v17 = vadd.f32 %v5380_v26, %v3559_v53 }
 0x522   :  { %v2776_v42 = vpop.f32.mrf.mxu2 }
 0x523   :  { %3691 = vst [vmem:[#allocation9 + $0x1c8] sm:$0xff] %v3627_v17  ;;  %v2852_v36 = vadd.f32 %v2776_v42, %v2497_v57 }
 0x525   :  { %v3206_v31 = vadd.f32 %v3130_v37, %v2852_v36  ;;  %v3142_v51 = vpop.f32.mrf.mxu3 }
 0x526   :  { %v3496_v54 = vpop.f32.mrf.mxu0  ;;  %v2436_v20 = vpop.f32.mrf.mxu1 }
 0x527   :  { %v3560_v61 = vadd.f32 %v3484_v16, %v3206_v31  ;;  %v2502_v59 = vadd.f32 %v2436_v20, %v5120_v55 }
 0x529   :  { %v3628_v52 = vadd.f32 %v5380_v26, %v3560_v61 }
 0x52a   :  { %v2779_v34 = vpop.f32.mrf.mxu2 }
 0x52b   :  { %3692 = vst [vmem:[#allocation9 + $0x1d0] sm:$0xff] %v3628_v52  ;;  %v2853_v13 = vadd.f32 %v2779_v34, %v2498_v8 }
 0x52d   :  { %v3207_v10 = vadd.f32 %v3133_v21, %v2853_v13  ;;  %v3145_v7 = vpop.f32.mrf.mxu3 }
 0x52e   :  { %v3499_v47 = vpop.f32.mrf.mxu0 }
 0x52f   :  { %v3561_v23 = vadd.f32 %v3487_v62, %v3207_v10 }
 0x531   :  { %v3629_v44 = vadd.f32 %v5380_v26, %v3561_v23 }
 0x532   :  { %v2782_v46 = vpop.f32.mrf.mxu2 }
 0x533   :  { %3693 = vst [vmem:[#allocation9 + $0x1d8] sm:$0xff] %v3629_v44  ;;  %v2854_v48 = vadd.f32 %v2782_v46, %v2499_v15 }
 0x535   :  { %v3208_v32 = vadd.f32 %v3136_v2, %v2854_v48 }
 0x537   :  { %v3562_v9 = vadd.f32 %v3490_v40, %v3208_v32 }
 0x539   :  { %v3630_v11 = vadd.f32 %v5380_v26, %v3562_v9 }
 0x53a   :  { %v2785_v4 = vpop.f32.mrf.mxu2 }
 0x53b   :  { %3694 = vst [vmem:[#allocation9 + $0x1e0] sm:$0xff] %v3630_v11  ;;  %v2855_v1 = vadd.f32 %v2785_v4, %v2500_v24 }
 0x53d   :  { %v3209_v22 = vadd.f32 %v3139_v19, %v2855_v1 }
 0x53f   :  { %v3563_v28 = vadd.f32 %v3493_v50, %v3209_v22 }
 0x541   :  { %v3631_v56 = vadd.f32 %v5380_v26, %v3563_v28 }
 0x542   :  { %v2788_v3 = vpop.f32.mrf.mxu2 }
 0x543   :  { %3695 = vst [vmem:[#allocation9 + $0x1e8] sm:$0xff] %v3631_v56  ;;  %v2856_v12 = vadd.f32 %v2788_v3, %v2501_v6 }
 0x545   :  { %v3210_v29 = vadd.f32 %v3142_v51, %v2856_v12 }
 0x547   :  { %v3564_v39 = vadd.f32 %v3496_v54, %v3210_v29 }
 0x549   :  { %v3632_v33 = vadd.f32 %v5380_v26, %v3564_v39 }
 0x54a   :  { %v2791_v45 = vpop.f32.mrf.mxu2 }
 0x54b   :  { %3696 = vst [vmem:[#allocation9 + $0x1f0] sm:$0xff] %v3632_v33  ;;  %v2857_v27 = vadd.f32 %v2791_v45, %v2502_v59 }
 0x54d   :  { %v3211_v37 = vadd.f32 %v3145_v7, %v2857_v27 }
 0x54f   :  { %v3565_v43 = vadd.f32 %v3499_v47, %v3211_v37 }
 0x551   :  { %v3633_v25 = vadd.f32 %v5380_v26, %v3565_v43 }
 0x553   :  { %3697 = vst [vmem:[#allocation9 + $0x1f8] sm:$0xff] %v3633_v25 }
 0x554   :  { %3710 = dma.vmem_to_hbm [thread:$0]  %s3703_s18, 8192, %s3705_s21, [#allocation5], %s3890_s28, %s3890_s28, %s3891_s29  }
 0x555   :  { %3886 = dma.done.wait [#allocation5], 8192  }
 0x556   :  { %3887 = vsyncadd [#allocation5], 4294959104 }
 0x557   :  { %3715 = vsyncpa [#allocation4], 1 }
 0x558   :  { %3716 = vsyncpa [#allocation7], 1 }
 0x559   :  { %3717 = vsyncpa [#allocation5], 1 }

</bundles_post_ra>
